<compile_context>
chip_gen: v7x
topology: tpu7x:2x2x1
jax: 0.10.0
libtpu: 0.0.40
codegen_flags: <defaults>
</compile_context>

<pallas_src>
import jax
import jax.numpy as jnp
from jax.experimental import pallas as pl
from jax.experimental.pallas import tpu as pltpu

EPS = 1e-5
LANE = 128
VMEM_LIMIT = 64 * 1024 * 1024


def _round_up(x, m):
    return (x + m - 1) // m * m


# ---------------- Pallas kernels ----------------

def conv_stats_kernel_1k(cols_ref, w_ref, y_ref, s1_ref, s2_ref):
    """Single-shot contraction: one MXU matmul per (m, n) tile + BN partial stats."""
    acc = jnp.dot(cols_ref[...], w_ref[...], preferred_element_type=jnp.float32)
    y_ref[...] = acc
    col_sum = jnp.sum(acc, axis=0, keepdims=True)
    col_sq = jnp.sum(acc * acc, axis=0, keepdims=True)
    s1_ref[...] = jnp.broadcast_to(col_sum, s1_ref.shape)
    s2_ref[...] = jnp.broadcast_to(col_sq, s2_ref.shape)


def conv_stats_kernel_mk(cols_ref, w_ref, y_ref, s1_ref, s2_ref, acc_ref):
    """K-tiled contraction with an f32 VMEM accumulator (init/finalize via pl.when).

    grid = (m_tiles, n_tiles, k_tiles); k (contraction) is innermost/"arbitrary".
    """
    k = pl.program_id(2)

    @pl.when(k == 0)
    def _():
        acc_ref[...] = jnp.zeros_like(acc_ref)

    acc_ref[...] += jnp.dot(cols_ref[...], w_ref[...],
                            preferred_element_type=jnp.float32)

    @pl.when(k == pl.num_programs(2) - 1)
    def _():
        acc = acc_ref[...]
        y_ref[...] = acc
        col_sum = jnp.sum(acc, axis=0, keepdims=True)
        col_sq = jnp.sum(acc * acc, axis=0, keepdims=True)
        s1_ref[...] = jnp.broadcast_to(col_sum, s1_ref.shape)
        s2_ref[...] = jnp.broadcast_to(col_sq, s2_ref.shape)


def bn_relu_kernel(y_ref, scale_ref, shift_ref, o_ref):
    y = y_ref[...] * scale_ref[...] + shift_ref[...]
    o_ref[...] = jnp.maximum(y, 0.0).astype(o_ref.dtype)


def bn_add_relu_kernel(y_ref, scale_ref, shift_ref, res_ref, o_ref):
    y = y_ref[...] * scale_ref[...] + shift_ref[...] + res_ref[...].astype(jnp.float32)
    o_ref[...] = jnp.maximum(y, 0.0).astype(o_ref.dtype)


# ---------------- pallas_call wrappers ----------------

def _conv_stats(cols, w_mat, *, tm, tn, tk):
    m_pad, kdim = cols.shape
    _, ppad = w_mat.shape
    mt, nt, kt = m_pad // tm, ppad // tn, kdim // tk

    out_shape = (
        jax.ShapeDtypeStruct((m_pad, ppad), jnp.float32),
        jax.ShapeDtypeStruct((mt * 8, ppad), jnp.float32),
        jax.ShapeDtypeStruct((mt * 8, ppad), jnp.float32),
    )

    if kt == 1:
        # Whole contraction resident in VMEM: simpler kernel, no scratch, 2-D grid.
        return pl.pallas_call(
            conv_stats_kernel_1k,
            out_shape=out_shape,
            grid_spec=pltpu.PrefetchScalarGridSpec(
                num_scalar_prefetch=0,
                grid=(mt, nt),
                in_specs=[
                    pl.BlockSpec((tm, tk), lambda i, j: (i, 0)),
                    pl.BlockSpec((tk, tn), lambda i, j: (0, j)),
                ],
                out_specs=(
                    pl.BlockSpec((tm, tn), lambda i, j: (i, j)),
                    pl.BlockSpec((8, tn), lambda i, j: (i, j)),
                    pl.BlockSpec((8, tn), lambda i, j: (i, j)),
                ),
            ),
            compiler_params=pltpu.CompilerParams(
                dimension_semantics=("parallel", "parallel"),
                vmem_limit_bytes=VMEM_LIMIT,
            ),
        )(cols, w_mat)

    return pl.pallas_call(
        conv_stats_kernel_mk,
        out_shape=out_shape,
        grid_spec=pltpu.PrefetchScalarGridSpec(
            num_scalar_prefetch=0,
            grid=(mt, nt, kt),
            in_specs=[
                pl.BlockSpec((tm, tk), lambda i, j, k: (i, k)),
                pl.BlockSpec((tk, tn), lambda i, j, k: (k, j)),
            ],
            out_specs=(
                pl.BlockSpec((tm, tn), lambda i, j, k: (i, j)),
                pl.BlockSpec((8, tn), lambda i, j, k: (i, j)),
                pl.BlockSpec((8, tn), lambda i, j, k: (i, j)),
            ),
            scratch_shapes=[pltpu.VMEM((tm, tn), jnp.float32)],
        ),
        compiler_params=pltpu.CompilerParams(
            dimension_semantics=("parallel", "parallel", "arbitrary"),
            vmem_limit_bytes=VMEM_LIMIT,
        ),
    )(cols, w_mat)


def _bn_act(y, scale, shift, residual, out_dtype, *, tm, tn):
    m_pad, ppad = y.shape
    mt, nt = m_pad // tm, ppad // tn
    args = [y, scale, shift]
    in_specs = [
        pl.BlockSpec((tm, tn), lambda i, j: (i, j)),
        pl.BlockSpec((1, tn), lambda i, j: (0, j)),
        pl.BlockSpec((1, tn), lambda i, j: (0, j)),
    ]
    kernel = bn_relu_kernel
    if residual is not None:
        args.append(residual)
        in_specs.append(pl.BlockSpec((tm, tn), lambda i, j: (i, j)))
        kernel = bn_add_relu_kernel
    return pl.pallas_call(
        kernel,
        out_shape=jax.ShapeDtypeStruct((m_pad, ppad), out_dtype),
        grid_spec=pltpu.PrefetchScalarGridSpec(
            num_scalar_prefetch=0,
            grid=(mt, nt),
            in_specs=in_specs,
            out_specs=pl.BlockSpec((tm, tn), lambda i, j: (i, j)),
        ),
        compiler_params=pltpu.CompilerParams(
            dimension_semantics=("parallel", "parallel"),
            vmem_limit_bytes=VMEM_LIMIT,
        ),
    )(*args)


# ---------------- tiling heuristics ----------------

def _pick_mn(m, kdim_max, ppad):
    """Pick M/N tile sizes: as large as possible while keeping tiles a few MB."""
    tn = 128
    for cand in (512, 256):
        if ppad % cand == 0 and kdim_max * cand * 2 <= (4 << 20):
            tn = cand
            break
    tm = 512
    while tm > 8 and m <= tm // 2:
        tm //= 2
    while tm > 8 and tm * kdim_max * 2 > (4 << 20):
        tm //= 2
    return max(tm, 8), tn


def _pick_tk(kdim, tm, tn):
    """Use the whole contraction in one shot when the double-buffered tiles fit VMEM."""
    if (tm + tn) * kdim * 2 * 2 <= (12 << 20):
        return kdim
    return kdim // 9  # = padded channel count; always divides 9*cpad


# ---------------- JAX glue ----------------

def _im2col_3x3(x_nhwc, m_pad):
    """3x3, stride 1, pad 1 im2col -> (m_pad, 9*C), column order (ky, kx, c)."""
    n, h, w, c = x_nhwc.shape
    xp = jnp.pad(x_nhwc, ((0, 0), (1, 1), (1, 1), (0, 0)))
    cols = []
    for ky in range(3):
        for kx in range(3):
            cols.append(xp[:, ky:ky + h, kx:kx + w, :].reshape(n * h * w, c))
    cols = jnp.concatenate(cols, axis=1)
    return jnp.pad(cols, ((0, m_pad - n * h * w), (0, 0)))


def _weight_to_mat(w_oihw, cin_pad, cout_pad):
    """(out, in, 3, 3) -> (9*cin_pad, cout_pad), rows in (ky, kx, cin) order, zero-padded."""
    out_c, in_c, kh, kw = w_oihw.shape
    wm = jnp.zeros((kh, kw, cin_pad, cout_pad), jnp.float32)
    wm = wm.at[:, :, :in_c, :out_c].set(jnp.transpose(w_oihw, (2, 3, 1, 0)))
    return wm.reshape(kh * kw * cin_pad, cout_pad)


def _pad_vec(v, p):
    return jnp.zeros((p,), jnp.float32).at[: v.size].set(v.reshape(-1))


def _bn_scale_shift(s1, s2, gamma, beta, m_true):
    """Finalize exact training-mode BN stats from the tiny per-tile partials."""
    mt8, ppad = s1.shape
    ch_sum = s1.reshape(mt8 // 8, 8, ppad)[:, 0, :].sum(axis=0)
    ch_sq = s2.reshape(mt8 // 8, 8, ppad)[:, 0, :].sum(axis=0)
    mean = ch_sum / m_true
    var = jnp.maximum(ch_sq / m_true - mean * mean, 0.0)  # biased var (training BN)
    inv = jax.lax.rsqrt(var + EPS)
    scale = gamma * inv
    shift = beta - mean * scale
    return scale.reshape(1, ppad), shift.reshape(1, ppad)


def basic_block_forward(x_nchw, params):
    """BasicBlock.forward: conv3x3-bn-relu-conv3x3-bn (+residual) - relu."""
    n, c, h, w = x_nchw.shape
    planes = params["w1"].shape[0]
    m = n * h * w

    cpad = _round_up(max(c, 1), LANE)
    ppad = _round_up(max(planes, 1), LANE)
    kdim1, kdim2 = 9 * cpad, 9 * ppad

    tm, tn = _pick_mn(m, max(kdim1, kdim2), ppad)
    m_pad = _round_up(m, tm)
    tk1 = _pick_tk(kdim1, tm, tn)
    tk2 = _pick_tk(kdim2, tm, tn)

    x_nhwc = jnp.transpose(x_nchw, (0, 2, 3, 1)).astype(jnp.float32)
    x_p = jnp.pad(x_nhwc, ((0, 0), (0, 0), (0, 0), (0, cpad - c)))

    # ---- stage 1: conv1 -> bn1 -> relu ----
    cols1 = _im2col_3x3(x_p, m_pad).astype(jnp.bfloat16)
    w1 = _weight_to_mat(params["w1"], cpad, ppad).astype(jnp.bfloat16)
    y1, p1a, p1b = _conv_stats(cols1, w1, tm=tm, tn=tn, tk=tk1)
    g1, b1 = _pad_vec(params["g1"], ppad), _pad_vec(params["b1"], ppad)
    sc1, sh1 = _bn_scale_shift(p1a, p1b, g1, b1, float(m))
    a1 = _bn_act(y1, sc1, sh1, None, jnp.bfloat16, tm=tm, tn=tn)

    # ---- stage 2: conv2 -> bn2 -> + residual -> relu ----
    a1_nhwc = a1[:m].reshape(n, h, w, ppad)
    cols2 = _im2col_3x3(a1_nhwc, m_pad)  # already bf16
    w2 = _weight_to_mat(params["w2"], ppad, ppad).astype(jnp.bfloat16)
    y2, p2a, p2b = _conv_stats(cols2, w2, tm=tm, tn=tn, tk=tk2)
    g2, b2 = _pad_vec(params["g2"], ppad), _pad_vec(params["b2"], ppad)
    sc2, sh2 = _bn_scale_shift(p2a, p2b, g2, b2, float(m))

    # residual = x (downsample is None; inplanes == planes, so cpad == ppad)
    resid = jnp.pad(x_p.reshape(m, cpad), ((0, m_pad - m), (0, 0)))
    out = _bn_act(y2, sc2, sh2, resid, jnp.float32, tm=tm, tn=tn)

    out = out[:m, :planes].reshape(n, h, w, planes)
    return jnp.transpose(out, (0, 3, 1, 2))


def init_params(key, inplanes, planes):
    k1, k2, k3, k4, k5, k6 = jax.random.split(key, 6)
    return {
        "w1": 0.1 * jax.random.normal(k1, (planes, inplanes, 3, 3), jnp.float32),
        "w2": 0.1 * jax.random.normal(k2, (planes, planes, 3, 3), jnp.float32),
        "g1": 1.0 + 0.1 * jax.random.normal(k3, (1, planes), jnp.float32),
        "b1": 0.1 * jax.random.normal(k4, (1, planes), jnp.float32),
        "g2": 1.0 + 0.1 * jax.random.normal(k5, (1, planes), jnp.float32),
        "b2": 0.1 * jax.random.normal(k6, (1, planes), jnp.float32),
    }


if __name__ == "__main__":
    key = jax.random.PRNGKey(0)
    kx, kp = jax.random.split(key)

    N, C, H, W = 2, 4, 16, 16  # inplanes = planes = 4, stride = 1
    x = jax.random.normal(kx, (N, C, H, W), jnp.float32)
    params = init_params(kp, inplanes=C, planes=C)

    out = jax.jit(basic_block_forward)(x, params)
    out = jax.block_until_ready(out)
    assert out.shape == (N, C, H, W)
    print("KERNEL_OK")
</pallas_src>

<mosaic_0001>
module attributes {stable_mosaic.version = 11 : i64} {
  func.func @conv_stats_kernel_1k(%arg0: i32, %arg1: i32, %arg2: memref<512x1152xbf16, #tpu.memory_space<vmem>>, %arg3: memref<1152x128xbf16, #tpu.memory_space<vmem>>, %arg4: memref<512x128xf32, #tpu.memory_space<vmem>>, %arg5: memref<8x128xf32, #tpu.memory_space<vmem>>, %arg6: memref<8x128xf32, #tpu.memory_space<vmem>>) attributes {dimension_semantics = [#tpu.dimension_semantics<parallel>, #tpu.dimension_semantics<parallel>], iteration_bounds = array<i64: 1, 1>, scalar_prefetch = 0 : i64, scratch_operands = 0 : i64, tpu.core_type = #tpu.core_type<tc>, window_params = [{transform_indices = @transform_0, window_bounds = array<i64: 512, 1152>}, {transform_indices = @transform_1, window_bounds = array<i64: 1152, 128>}, {transform_indices = @transform_2, window_bounds = array<i64: 512, 128>}, {transform_indices = @transform_3, window_bounds = array<i64: 8, 128>}, {transform_indices = @transform_4, window_bounds = array<i64: 8, 128>}]} {
    %c0 = arith.constant 0 : index
    %c0_0 = arith.constant 0 : index
    %0 = vector.load %arg2[%c0, %c0_0] : memref<512x1152xbf16, #tpu.memory_space<vmem>>, vector<512x1152xbf16>
    %c0_1 = arith.constant 0 : index
    %c0_2 = arith.constant 0 : index
    %1 = vector.load %arg3[%c0_1, %c0_2] : memref<1152x128xbf16, #tpu.memory_space<vmem>>, vector<1152x128xbf16>
    %cst = arith.constant dense<0.000000e+00> : vector<512x128xf32>
    %2 = tpu.matmul %0, %1, %cst {dimension_numbers = #tpu.dot_dimension_numbers<[1], [0], [0], [1], [0, 0, 1, 1], [], []>} : vector<512x1152xbf16>, vector<1152x128xbf16>, vector<512x128xf32> -> vector<512x128xf32>
    %c0_3 = arith.constant 0 : index
    %c0_4 = arith.constant 0 : index
    %3 = vector.load %arg4[%c0_3, %c0_4] : memref<512x128xf32, #tpu.memory_space<vmem>>, vector<512x128xf32>
    tpu.vector_store %arg4[%c0_3, %c0_4], %2 {strides = array<i32>} : memref<512x128xf32, #tpu.memory_space<vmem>>, vector<512x128xf32>,
    %cst_5 = arith.constant dense<0.000000e+00> : vector<128xf32>
    %4 = vector.multi_reduction <add>, %2, %cst_5 [0] : vector<512x128xf32> to vector<128xf32>
    %5 = vector.shape_cast %4 : vector<128xf32> to vector<1x128xf32>
    %6 = arith.mulf %2, %2 : vector<512x128xf32>
    %cst_6 = arith.constant dense<0.000000e+00> : vector<128xf32>
    %7 = vector.multi_reduction <add>, %6, %cst_6 [0] : vector<512x128xf32> to vector<128xf32>
    %8 = vector.shape_cast %7 : vector<128xf32> to vector<1x128xf32>
    %9 = vector.shape_cast %5 : vector<1x128xf32> to vector<1x128xf32>
    %10 = vector.broadcast %9 : vector<1x128xf32> to vector<8x128xf32>
    %c0_7 = arith.constant 0 : index
    %c0_8 = arith.constant 0 : index
    %11 = vector.load %arg5[%c0_7, %c0_8] : memref<8x128xf32, #tpu.memory_space<vmem>>, vector<8x128xf32>
    tpu.vector_store %arg5[%c0_7, %c0_8], %10 {strides = array<i32>} : memref<8x128xf32, #tpu.memory_space<vmem>>, vector<8x128xf32>,
    %12 = vector.shape_cast %8 : vector<1x128xf32> to vector<1x128xf32>
    %13 = vector.broadcast %12 : vector<1x128xf32> to vector<8x128xf32>
    %c0_9 = arith.constant 0 : index
    %c0_10 = arith.constant 0 : index
    %14 = vector.load %arg6[%c0_9, %c0_10] : memref<8x128xf32, #tpu.memory_space<vmem>>, vector<8x128xf32>
    tpu.vector_store %arg6[%c0_9, %c0_10], %13 {strides = array<i32>} : memref<8x128xf32, #tpu.memory_space<vmem>>, vector<8x128xf32>,
    return
  }
  func.func @transform_0(%arg0: i32, %arg1: i32) -> (i32, i32) {
    %c0_i32 = arith.constant 0 : i32
    %c0_i32_0 = arith.constant 0 : i32
    return %arg0, %c0_i32 : i32, i32
  }
  func.func @transform_1(%arg0: i32, %arg1: i32) -> (i32, i32) {
    %c0_i32 = arith.constant 0 : i32
    %c0_i32_0 = arith.constant 0 : i32
    return %c0_i32, %arg1 : i32, i32
  }
  func.func @transform_2(%arg0: i32, %arg1: i32) -> (i32, i32) {
    %c0_i32 = arith.constant 0 : i32
    return %arg0, %arg1 : i32, i32
  }
  func.func @transform_3(%arg0: i32, %arg1: i32) -> (i32, i32) {
    %c0_i32 = arith.constant 0 : i32
    return %arg0, %arg1 : i32, i32
  }
  func.func @transform_4(%arg0: i32, %arg1: i32) -> (i32, i32) {
    %c0_i32 = arith.constant 0 : i32
    return %arg0, %arg1 : i32, i32
  }
}

module attributes {stable_mosaic.version = 11 : i64} {
  func.func @bn_relu_kernel(%arg0: i32, %arg1: i32, %arg2: memref<512x128xf32, #tpu.memory_space<vmem>>, %arg3: memref<1x128xf32, #tpu.memory_space<vmem>>, %arg4: memref<1x128xf32, #tpu.memory_space<vmem>>, %arg5: memref<512x128xbf16, #tpu.memory_space<vmem>>) attributes {dimension_semantics = [#tpu.dimension_semantics<parallel>, #tpu.dimension_semantics<parallel>], iteration_bounds = array<i64: 1, 1>, scalar_prefetch = 0 : i64, scratch_operands = 0 : i64, tpu.core_type = #tpu.core_type<tc>, window_params = [{transform_indices = @transform_0, window_bounds = array<i64: 512, 128>}, {transform_indices = @transform_1, window_bounds = array<i64: 1, 128>}, {transform_indices = @transform_2, window_bounds = array<i64: 1, 128>}, {transform_indices = @transform_3, window_bounds = array<i64: 512, 128>}]} {
    %c0 = arith.constant 0 : index
    %c0_0 = arith.constant 0 : index
    %0 = vector.load %arg2[%c0, %c0_0] : memref<512x128xf32, #tpu.memory_space<vmem>>, vector<512x128xf32>
    %c0_1 = arith.constant 0 : index
    %c0_2 = arith.constant 0 : index
    %1 = vector.load %arg3[%c0_1, %c0_2] : memref<1x128xf32, #tpu.memory_space<vmem>>, vector<1x128xf32>
    %2 = vector.broadcast %1 : vector<1x128xf32> to vector<512x128xf32>
    %3 = arith.mulf %0, %2 : vector<512x128xf32>
    %c0_3 = arith.constant 0 : index
    %c0_4 = arith.constant 0 : index
    %4 = vector.load %arg4[%c0_3, %c0_4] : memref<1x128xf32, #tpu.memory_space<vmem>>, vector<1x128xf32>
    %5 = vector.broadcast %4 : vector<1x128xf32> to vector<512x128xf32>
    %6 = arith.addf %3, %5 : vector<512x128xf32>
    %cst = arith.constant 0.000000e+00 : f32
    %7 = vector.broadcast %cst : f32 to vector<512x128xf32>
    %8 = arith.maximumf %6, %7 : vector<512x128xf32>
    %9 = arith.truncf %8 : vector<512x128xf32> to vector<512x128xbf16>
    %c0_5 = arith.constant 0 : index
    %c0_6 = arith.constant 0 : index
    %10 = vector.load %arg5[%c0_5, %c0_6] : memref<512x128xbf16, #tpu.memory_space<vmem>>, vector<512x128xbf16>
    tpu.vector_store %arg5[%c0_5, %c0_6], %9 {strides = array<i32>} : memref<512x128xbf16, #tpu.memory_space<vmem>>, vector<512x128xbf16>,
    return
  }
  func.func @transform_0(%arg0: i32, %arg1: i32) -> (i32, i32) {
    %c0_i32 = arith.constant 0 : i32
    return %arg0, %arg1 : i32, i32
  }
  func.func @transform_1(%arg0: i32, %arg1: i32) -> (i32, i32) {
    %c0_i32 = arith.constant 0 : i32
    %c0_i32_0 = arith.constant 0 : i32
    return %c0_i32, %arg1 : i32, i32
  }
  func.func @transform_2(%arg0: i32, %arg1: i32) -> (i32, i32) {
    %c0_i32 = arith.constant 0 : i32
    %c0_i32_0 = arith.constant 0 : i32
    return %c0_i32, %arg1 : i32, i32
  }
  func.func @transform_3(%arg0: i32, %arg1: i32) -> (i32, i32) {
    %c0_i32 = arith.constant 0 : i32
    return %arg0, %arg1 : i32, i32
  }
}

module attributes {stable_mosaic.version = 11 : i64} {
  func.func @bn_add_relu_kernel(%arg0: i32, %arg1: i32, %arg2: memref<512x128xf32, #tpu.memory_space<vmem>>, %arg3: memref<1x128xf32, #tpu.memory_space<vmem>>, %arg4: memref<1x128xf32, #tpu.memory_space<vmem>>, %arg5: memref<512x128xf32, #tpu.memory_space<vmem>>, %arg6: memref<512x128xf32, #tpu.memory_space<vmem>>) attributes {dimension_semantics = [#tpu.dimension_semantics<parallel>, #tpu.dimension_semantics<parallel>], iteration_bounds = array<i64: 1, 1>, scalar_prefetch = 0 : i64, scratch_operands = 0 : i64, tpu.core_type = #tpu.core_type<tc>, window_params = [{transform_indices = @transform_0, window_bounds = array<i64: 512, 128>}, {transform_indices = @transform_1, window_bounds = array<i64: 1, 128>}, {transform_indices = @transform_2, window_bounds = array<i64: 1, 128>}, {transform_indices = @transform_3, window_bounds = array<i64: 512, 128>}, {transform_indices = @transform_4, window_bounds = array<i64: 512, 128>}]} {
    %c0 = arith.constant 0 : index
    %c0_0 = arith.constant 0 : index
    %0 = vector.load %arg2[%c0, %c0_0] : memref<512x128xf32, #tpu.memory_space<vmem>>, vector<512x128xf32>
    %c0_1 = arith.constant 0 : index
    %c0_2 = arith.constant 0 : index
    %1 = vector.load %arg3[%c0_1, %c0_2] : memref<1x128xf32, #tpu.memory_space<vmem>>, vector<1x128xf32>
    %2 = vector.broadcast %1 : vector<1x128xf32> to vector<512x128xf32>
    %3 = arith.mulf %0, %2 : vector<512x128xf32>
    %c0_3 = arith.constant 0 : index
    %c0_4 = arith.constant 0 : index
    %4 = vector.load %arg4[%c0_3, %c0_4] : memref<1x128xf32, #tpu.memory_space<vmem>>, vector<1x128xf32>
    %5 = vector.broadcast %4 : vector<1x128xf32> to vector<512x128xf32>
    %6 = arith.addf %3, %5 : vector<512x128xf32>
    %c0_5 = arith.constant 0 : index
    %c0_6 = arith.constant 0 : index
    %7 = vector.load %arg5[%c0_5, %c0_6] : memref<512x128xf32, #tpu.memory_space<vmem>>, vector<512x128xf32>
    %8 = arith.addf %6, %7 : vector<512x128xf32>
    %cst = arith.constant 0.000000e+00 : f32
    %9 = vector.broadcast %cst : f32 to vector<512x128xf32>
    %10 = arith.maximumf %8, %9 : vector<512x128xf32>
    %c0_7 = arith.constant 0 : index
    %c0_8 = arith.constant 0 : index
    %11 = vector.load %arg6[%c0_7, %c0_8] : memref<512x128xf32, #tpu.memory_space<vmem>>, vector<512x128xf32>
    tpu.vector_store %arg6[%c0_7, %c0_8], %10 {strides = array<i32>} : memref<512x128xf32, #tpu.memory_space<vmem>>, vector<512x128xf32>,
    return
  }
  func.func @transform_0(%arg0: i32, %arg1: i32) -> (i32, i32) {
    %c0_i32 = arith.constant 0 : i32
    return %arg0, %arg1 : i32, i32
  }
  func.func @transform_1(%arg0: i32, %arg1: i32) -> (i32, i32) {
    %c0_i32 = arith.constant 0 : i32
    %c0_i32_0 = arith.constant 0 : i32
    return %c0_i32, %arg1 : i32, i32
  }
  func.func @transform_2(%arg0: i32, %arg1: i32) -> (i32, i32) {
    %c0_i32 = arith.constant 0 : i32
    %c0_i32_0 = arith.constant 0 : i32
    return %c0_i32, %arg1 : i32, i32
  }
  func.func @transform_3(%arg0: i32, %arg1: i32) -> (i32, i32) {
    %c0_i32 = arith.constant 0 : i32
    return %arg0, %arg1 : i32, i32
  }
  func.func @transform_4(%arg0: i32, %arg1: i32) -> (i32, i32) {
    %c0_i32 = arith.constant 0 : i32
    return %arg0, %arg1 : i32, i32
  }
}

</mosaic_0001>

<bundles_post_ra>
// kernel: basic_block_forward.5
= control target key start
LH: loop header
LB: loop body
LE: loop exit
PB: predicated region body
PF: predicated region fallthrough
CT: control target
= control target key end

     0   :  { %8 = vsyncpa [#allocation3], 0  ;;  %s1298_s0 = inlined_call_operand.hbm [shape: f32[512,128], index: 0, kind: input, shape index: {}]   ;;  %s1299_s1 = inlined_call_operand.hbm [shape: f32[1,128], index: 1, kind: input, shape index: {}]   ;;  %s1300_s2 = inlined_call_operand.hbm [shape: f32[1,128], index: 2, kind: input, shape index: {}]   ;;  %s1301_s3 = inlined_call_operand.hbm [shape: bf16[512,128], index: 3, kind: output, shape index: {}]  }
   0x1   :  { %9 = vsyncpa [#allocation6], 0 }
   0x2   :  { %10 = vsyncpa [#allocation4], 0  ;;  %s1083_s12 = smov [#allocation5]   ;;  %s1084_s14 = smov [#allocation2]  }
   0x3   :  { %s29_s13 = sshll.u32 %s1083_s12, 4  ;;  %s16_s15 = sshll.u32 %s1084_s14, 4  ;;  %s30_s13 = int_to_ptr.vmem [resolvable:$true] %s29_s13  ;;  %s1111_s15 = int_to_ptr.vmem [resolvable:$true] %s16_s15 }
   0x4   :  { %s989_s18 = scalar_lea.hbm %s1299_s1, 16 }
   0x5   :  { %p990_p0 = scmp.ne.s32.totalorder %s1299_s1, %s989_s18  ;;  %p993_p1 = scmp.lt.u32.totalorder %s989_s18, %s1299_s1 }
   0x7   :  { %p995_p2 = pnand %p993_p1, %p990_p0 }
   0x9   :  { %998 = shalt.err (!%p995_p2)
}
   0xa   :  { %s999_s23 = scalar_lea.vmem %s30_s13, 16  ;;  %s1003_s24 = scalar_lea.vmem %s30_s13, 32 }
   0xb   :  { %p1000_p3 = scmp.ne.s32.totalorder %s30_s13, %s999_s23  ;;  %p1004_p4 = scmp.lt.s32.totalorder %s30_s13, %s30_s13 }
   0xc   :  { %p1005_p5 = scmp.lt.s32.totalorder %s1003_s24, %s999_s23 }
   0xe   :  { %p1006_p6 = por %p1005_p5, %p1004_p4 }
  0x10   :  { %p1007_p7 = pnand %p1006_p6, %p1000_p3 }
  0x12   :  { %1010 = shalt.err (!%p1007_p7)
}
  0x13   :  { %32 = dma.hbm_to_vmem [thread:$0]  %s1299_s1, 16, %s30_s13, [#allocation6]  }
  0x14   :  { %s1011_s29 = scalar_lea.hbm %s1298_s0, 8192 }
  0x15   :  { %p1012_p8 = scmp.ne.s32.totalorder %s1298_s0, %s1011_s29  ;;  %p1015_p9 = scmp.lt.u32.totalorder %s1011_s29, %s1298_s0 }
  0x17   :  { %p1017_p10 = pnand %p1015_p9, %p1012_p8 }
  0x19   :  { %1020 = shalt.err (!%p1017_p10)
}
  0x1a   :  { %s1021_s7 = scalar_lea.vmem %s1111_s15, 8192  ;;  %p1026_p12 = scmp.lt.s32.totalorder %s1111_s15, %s1111_s15 }
  0x1b   :  { %p1022_p11 = scmp.ne.s32.totalorder %s1111_s15, %s1021_s7  ;;  %p1027_p13 = scmp.lt.s32.totalorder %s1021_s7, %s1021_s7 }
  0x1d   :  { %p1028_p0 = por %p1027_p13, %p1026_p12 }
  0x1f   :  { %p1029_p1 = pnand %p1028_p0, %p1022_p11 }
  0x21   :  { %1032 = shalt.err (!%p1029_p1)
}
  0x22   :  { %s1085_s1 = smov 128   ;;  %s1086_s8 = smov 8  }
  0x23   :  { %22 = dma.hbm_to_vmem [thread:$0]  %s1298_s0, 8192, %s1111_s15, [#allocation3], %s1085_s1, %s1085_s1, %s1086_s8  }
  0x24   :  { %s1087_s11 = smov [#allocation7]   ;;  %s1033_s16 = scalar_lea.hbm %s1300_s2, 16 }
  0x25   :  { %s39_s12 = sshll.u32 %s1087_s11, 4  ;;  %p1034_p2 = scmp.ne.s32.totalorder %s1300_s2, %s1033_s16  ;;  %s40_s12 = int_to_ptr.vmem [resolvable:$true] %s39_s12 }
  0x26   :  { %p1037_p3 = scmp.lt.u32.totalorder %s1033_s16, %s1300_s2 }
  0x28   :  { %p1039_p4 = pnand %p1037_p3, %p1034_p2 }
  0x2a   :  { %1042 = shalt.err (!%p1039_p4)
}
  0x2b   :  { %s1043_s21 = scalar_lea.vmem %s40_s12, 16  ;;  %s1047_s0 = scalar_lea.vmem %s40_s12, 32 }
  0x2c   :  { %p1044_p5 = scmp.ne.s32.totalorder %s40_s12, %s1043_s21  ;;  %p1048_p6 = scmp.lt.s32.totalorder %s40_s12, %s40_s12 }
  0x2d   :  { %p1049_p7 = scmp.lt.s32.totalorder %s1047_s0, %s1043_s21 }
  0x2f   :  { %p1050_p8 = por %p1049_p7, %p1048_p6 }
  0x31   :  { %p1051_p9 = pnand %p1050_p8, %p1044_p5 }
  0x33   :  { %1054 = shalt.err (!%p1051_p9)
}
  0x34   :  { %42 = dma.hbm_to_vmem [thread:$0]  %s1300_s2, 16, %s40_s12, [#allocation6]  }
  0x35   :  { %1077 = dma.done.wait [#allocation3], 8192  }
  0x36   :  { %1078 = vsyncadd [#allocation3], 4294959104 }
  0x37   :  { %1079 = dma.done.wait [#allocation6], 32  }
  0x38   :  { %1080 = vsyncadd [#allocation6], 4294967264  ;;  %v52_v0 = vld [vmem:[#allocation2] sm:$0xff]  ;;  %v53_v1 = vld [vmem:[#allocation2 + $0x8] sm:$0xff]  ;;  %s1088_s2 = smov [#allocation8]  }
  0x39   :  { %v1154_v2 = vld [vmem:[#allocation5] ss:$0 sm:$0xff]  ;;  %v1158_v5 = vld [vmem:[#allocation7] ss:$0 sm:$0xff]  ;;  %v54_v6 = vld [vmem:[#allocation2 + $0x10] sm:$0xff]  ;;  %s647_s23 = sshll.u32 %s1088_s2, 4  ;;  %s648_s23 = int_to_ptr.vmem [resolvable:$true] %s647_s23 }
  0x3a   :  { %v123_v3 = vmul.f32 %v1154_v2, %v52_v0  ;;  %v124_v4 = vmul.f32 %v1154_v2, %v53_v1  ;;  %v55_v7 = vld [vmem:[#allocation2 + $0x18] sm:$0xff]  ;;  %v125_v8 = vmul.f32 %v1154_v2, %v54_v6  ;;  %v56_v10 = vld [vmem:[#allocation2 + $0x20] sm:$0xff]  ;;  %v57_v11 = vld [vmem:[#allocation2 + $0x28] sm:$0xff]  ;;  %s1055_s24 = scalar_lea.vmem %s648_s23, 4096  ;;  %p1060_p11 = scmp.lt.s32.totalorder %s648_s23, %s648_s23 }
  0x3b   :  { %v126_v9 = vmul.f32 %v1154_v2, %v55_v7  ;;  %v58_v12 = vld [vmem:[#allocation2 + $0x30] sm:$0xff]  ;;  %v127_v15 = vmul.f32 %v1154_v2, %v56_v10  ;;  %v128_v16 = vmul.f32 %v1154_v2, %v57_v11  ;;  %v59_v17 = vld [vmem:[#allocation2 + $0x38] sm:$0xff]  ;;  %v60_v22 = vld [vmem:[#allocation2 + $0x40] sm:$0xff]  ;;  %p1056_p10 = scmp.ne.s32.totalorder %s648_s23, %s1055_s24  ;;  %p1061_p12 = scmp.lt.s32.totalorder %s1055_s24, %s1055_s24 }
  0x3c   :  { %v194_v13 = vadd.f32 %v1158_v5, %v123_v3  ;;  %v195_v14 = vadd.f32 %v1158_v5, %v124_v4  ;;  %v196_v18 = vadd.f32 %v1158_v5, %v125_v8  ;;  %v129_v20 = vmul.f32 %v1154_v2, %v58_v12  ;;  %v61_v27 = vld [vmem:[#allocation2 + $0x48] sm:$0xff]  ;;  %v62_v32 = vld [vmem:[#allocation2 + $0x50] sm:$0xff]  ;;  %v63_v33 = vld [vmem:[#allocation2 + $0x58] sm:$0xff] }
  0x3d   :  { %v197_v19 = vadd.f32 %v1158_v5, %v126_v9  ;;  %v130_v21 = vmul.f32 %v1154_v2, %v59_v17  ;;  %v198_v25 = vadd.f32 %v1158_v5, %v127_v15  ;;  %v199_v26 = vadd.f32 %v1158_v5, %v128_v16  ;;  %v64_v38 = vld [vmem:[#allocation2 + $0x60] sm:$0xff]  ;;  %v65_v39 = vld [vmem:[#allocation2 + $0x68] sm:$0xff]  ;;  %v66_v44 = vld [vmem:[#allocation2 + $0x70] sm:$0xff]  ;;  %p1062_p13 = por %p1061_p12, %p1060_p11 }
  0x3e   :  { %v258_v23 = vmax.f32 %v194_v13, 0.0  ;;  %v259_v24 = vmax.f32 %v195_v14, 0.0  ;;  %v260_v28 = vmax.f32 %v196_v18, 0.0  ;;  %v200_v30 = vadd.f32 %v1158_v5, %v129_v20  ;;  %v67_v49 = vld [vmem:[#allocation2 + $0x78] sm:$0xff]  ;;  %v68_v54 = vld [vmem:[#allocation2 + $0x80] sm:$0xff]  ;;  %v69_v63 = vld [vmem:[#allocation2 + $0x88] sm:$0xff] }
  0x3f   :  { %v261_v29 = vmax.f32 %v197_v19, 0.0  ;;  %v201_v31 = vadd.f32 %v1158_v5, %v130_v21  ;;  %v262_v35 = vmax.f32 %v198_v25, 0.0  ;;  %v263_v36 = vmax.f32 %v199_v26, 0.0  ;;  %v70_v6 = vld [vmem:[#allocation2 + $0x90] sm:$0xff]  ;;  %v71_v7 = vld [vmem:[#allocation2 + $0x98] sm:$0xff]  ;;  %v72_v12 = vld [vmem:[#allocation2 + $0xa0] sm:$0xff]  ;;  %p1063_p0 = pnand %p1062_p13, %p1056_p10 }
  0x40   :  { %v793_v34 = vpack.c.bf16 %v259_v24, %v258_v23  ;;  %v131_v37 = vmul.f32 %v1154_v2, %v60_v22  ;;  %v264_v41 = vmax.f32 %v200_v30, 0.0  ;;  %v132_v43 = vmul.f32 %v1154_v2, %v61_v27  ;;  %v73_v13 = vld [vmem:[#allocation2 + $0xa8] sm:$0xff]  ;;  %v74_v18 = vld [vmem:[#allocation2 + $0xb0] sm:$0xff]  ;;  %v75_v23 = vld [vmem:[#allocation2 + $0xb8] sm:$0xff] }
  0x41   :  { %v798_v40 = vpack.c.bf16 %v261_v29, %v260_v28  ;;  %v265_v42 = vmax.f32 %v201_v31, 0.0  ;;  %v803_v45 = vpack.c.bf16 %v263_v36, %v262_v35  ;;  %v133_v47 = vmul.f32 %v1154_v2, %v62_v32  ;;  %v76_v28 = vld [vmem:[#allocation2 + $0xc0] sm:$0xff] }
  0x42   :  { %794 = vst [vmem:[#allocation8] sm:$0xff] %v793_v34   ;;  %v202_v46 = vadd.f32 %v1158_v5, %v131_v37  ;;  %v134_v48 = vmul.f32 %v1154_v2, %v63_v33  ;;  %v203_v51 = vadd.f32 %v1158_v5, %v132_v43  ;;  %v135_v52 = vmul.f32 %v1154_v2, %v64_v38  ;;  %v77_v37 = vld [vmem:[#allocation2 + $0xc8] sm:$0xff]  ;;  %v79_v43 = vld [vmem:[#allocation2 + $0xd8] sm:$0xff] }
  0x43   :  { %950 = vst [vmem:[#allocation8 + $0x8] sm:$0xff] %v798_v40   ;;  %v808_v50 = vpack.c.bf16 %v265_v42, %v264_v41  ;;  %v136_v53 = vmul.f32 %v1154_v2, %v65_v39  ;;  %951 = vst [vmem:[#allocation8 + $0x10] sm:$0xff] %v803_v45   ;;  %v204_v56 = vadd.f32 %v1158_v5, %v133_v47  ;;  %v78_v42 = vld [vmem:[#allocation2 + $0xd0] sm:$0xff] }
  0x44   :  { %v266_v55 = vmax.f32 %v202_v46, 0.0  ;;  %v205_v57 = vadd.f32 %v1158_v5, %v134_v48  ;;  %v137_v58 = vmul.f32 %v1154_v2, %v66_v44  ;;  %v267_v59 = vmax.f32 %v203_v51, 0.0  ;;  %v80_v48 = vld [vmem:[#allocation2 + $0xe0] sm:$0xff] }
  0x45   :  { %952 = vst [vmem:[#allocation8 + $0x18] sm:$0xff] %v808_v50   ;;  %v206_v60 = vadd.f32 %v1158_v5, %v135_v52  ;;  %v207_v61 = vadd.f32 %v1158_v5, %v136_v53  ;;  %v138_v62 = vmul.f32 %v1154_v2, %v67_v49  ;;  %v268_v0 = vmax.f32 %v204_v56, 0.0  ;;  %v81_v49 = vld [vmem:[#allocation2 + $0xe8] sm:$0xff] }
  0x46   :  { %v269_v1 = vmax.f32 %v205_v57, 0.0  ;;  %v208_v3 = vadd.f32 %v1158_v5, %v137_v58  ;;  %v139_v4 = vmul.f32 %v1154_v2, %v68_v54  ;;  %v813_v8 = vpack.c.bf16 %v267_v59, %v266_v55  ;;  %v82_v54 = vld [vmem:[#allocation2 + $0xf0] sm:$0xff]  ;;  %v83_v59 = vld [vmem:[#allocation2 + $0xf8] sm:$0xff] }
  0x47   :  { %v270_v9 = vmax.f32 %v206_v60, 0.0  ;;  %v271_v10 = vmax.f32 %v207_v61, 0.0  ;;  %v209_v11 = vadd.f32 %v1158_v5, %v138_v62  ;;  %v140_v16 = vmul.f32 %v1154_v2, %v69_v63 }
  0x48   :  { %v818_v14 = vpack.c.bf16 %v269_v1, %v268_v0  ;;  %v272_v15 = vmax.f32 %v208_v3, 0.0  ;;  %v210_v17 = vadd.f32 %v1158_v5, %v139_v4  ;;  %953 = vst [vmem:[#allocation8 + $0x20] sm:$0xff] %v813_v8   ;;  %v141_v21 = vmul.f32 %v1154_v2, %v70_v6  ;;  %v84_v0 = vld [vmem:[#allocation2 + $0x100] sm:$0xff] }
  0x49   :  { %v823_v19 = vpack.c.bf16 %v271_v10, %v270_v9  ;;  %v273_v20 = vmax.f32 %v209_v11, 0.0  ;;  %v142_v22 = vmul.f32 %v1154_v2, %v71_v7  ;;  %v211_v24 = vadd.f32 %v1158_v5, %v140_v16  ;;  %v85_v11 = vld [vmem:[#allocation2 + $0x108] sm:$0xff]  ;;  %v86_v16 = vld [vmem:[#allocation2 + $0x110] sm:$0xff] }
  0x4a   :  { %954 = vst [vmem:[#allocation8 + $0x28] sm:$0xff] %v818_v14   ;;  %v274_v25 = vmax.f32 %v210_v17, 0.0  ;;  %v143_v26 = vmul.f32 %v1154_v2, %v72_v12  ;;  %v144_v27 = vmul.f32 %v1154_v2, %v73_v13  ;;  %v212_v30 = vadd.f32 %v1158_v5, %v141_v21  ;;  %v87_v17 = vld [vmem:[#allocation2 + $0x118] sm:$0xff] }
  0x4b   :  { %955 = vst [vmem:[#allocation8 + $0x30] sm:$0xff] %v823_v19   ;;  %v828_v29 = vpack.c.bf16 %v273_v20, %v272_v15  ;;  %v213_v31 = vadd.f32 %v1158_v5, %v142_v22  ;;  %v145_v32 = vmul.f32 %v1154_v2, %v74_v18  ;;  %v275_v33 = vmax.f32 %v211_v24, 0.0  ;;  %v88_v22 = vld [vmem:[#allocation2 + $0x120] sm:$0xff] }
  0x4c   :  { %v214_v34 = vadd.f32 %v1158_v5, %v143_v26  ;;  %v215_v35 = vadd.f32 %v1158_v5, %v144_v27  ;;  %v146_v36 = vmul.f32 %v1154_v2, %v75_v23  ;;  %v276_v38 = vmax.f32 %v212_v30, 0.0  ;;  %v89_v23 = vld [vmem:[#allocation2 + $0x128] sm:$0xff] }
  0x4d   :  { %956 = vst [vmem:[#allocation8 + $0x38] sm:$0xff] %v828_v29   ;;  %v277_v39 = vmax.f32 %v213_v31, 0.0  ;;  %v216_v40 = vadd.f32 %v1158_v5, %v145_v32  ;;  %v147_v41 = vmul.f32 %v1154_v2, %v76_v28  ;;  %v833_v44 = vpack.c.bf16 %v275_v33, %v274_v25  ;;  %v90_v28 = vld [vmem:[#allocation2 + $0x130] sm:$0xff]  ;;  %v91_v33 = vld [vmem:[#allocation2 + $0x138] sm:$0xff] }
  0x4e   :  { %v278_v45 = vmax.f32 %v214_v34, 0.0  ;;  %v279_v46 = vmax.f32 %v215_v35, 0.0  ;;  %v217_v47 = vadd.f32 %v1158_v5, %v146_v36  ;;  %v148_v52 = vmul.f32 %v1154_v2, %v77_v37 }
  0x4f   :  { %v838_v50 = vpack.c.bf16 %v277_v39, %v276_v38  ;;  %v280_v51 = vmax.f32 %v216_v40, 0.0  ;;  %v218_v53 = vadd.f32 %v1158_v5, %v147_v41  ;;  %957 = vst [vmem:[#allocation8 + $0x40] sm:$0xff] %v833_v44   ;;  %v149_v57 = vmul.f32 %v1154_v2, %v78_v42  ;;  %v92_v38 = vld [vmem:[#allocation2 + $0x140] sm:$0xff] }
  0x50   :  { %v843_v55 = vpack.c.bf16 %v279_v46, %v278_v45  ;;  %v281_v56 = vmax.f32 %v217_v47, 0.0  ;;  %v150_v58 = vmul.f32 %v1154_v2, %v79_v43  ;;  %v219_v60 = vadd.f32 %v1158_v5, %v148_v52  ;;  %v93_v47 = vld [vmem:[#allocation2 + $0x148] sm:$0xff]  ;;  %v94_v52 = vld [vmem:[#allocation2 + $0x150] sm:$0xff] }
  0x51   :  { %958 = vst [vmem:[#allocation8 + $0x48] sm:$0xff] %v838_v50   ;;  %v282_v61 = vmax.f32 %v218_v53, 0.0  ;;  %v151_v62 = vmul.f32 %v1154_v2, %v80_v48  ;;  %v152_v63 = vmul.f32 %v1154_v2, %v81_v49  ;;  %v220_v3 = vadd.f32 %v1158_v5, %v149_v57  ;;  %v95_v53 = vld [vmem:[#allocation2 + $0x158] sm:$0xff] }
  0x52   :  { %959 = vst [vmem:[#allocation8 + $0x50] sm:$0xff] %v843_v55   ;;  %v848_v1 = vpack.c.bf16 %v281_v56, %v280_v51  ;;  %v221_v4 = vadd.f32 %v1158_v5, %v150_v58  ;;  %v153_v6 = vmul.f32 %v1154_v2, %v82_v54  ;;  %v283_v7 = vmax.f32 %v219_v60, 0.0  ;;  %v96_v58 = vld [vmem:[#allocation2 + $0x160] sm:$0xff] }
  0x53   :  { %v222_v8 = vadd.f32 %v1158_v5, %v151_v62  ;;  %v223_v9 = vadd.f32 %v1158_v5, %v152_v63  ;;  %v154_v10 = vmul.f32 %v1154_v2, %v83_v59  ;;  %v284_v12 = vmax.f32 %v220_v3, 0.0  ;;  %v97_v59 = vld [vmem:[#allocation2 + $0x168] sm:$0xff] }
  0x54   :  { %960 = vst [vmem:[#allocation8 + $0x58] sm:$0xff] %v848_v1   ;;  %v285_v13 = vmax.f32 %v221_v4, 0.0  ;;  %v224_v14 = vadd.f32 %v1158_v5, %v153_v6  ;;  %v155_v15 = vmul.f32 %v1154_v2, %v84_v0  ;;  %v853_v18 = vpack.c.bf16 %v283_v7, %v282_v61  ;;  %v98_v0 = vld [vmem:[#allocation2 + $0x170] sm:$0xff]  ;;  %v99_v7 = vld [vmem:[#allocation2 + $0x178] sm:$0xff] }
  0x55   :  { %v286_v19 = vmax.f32 %v222_v8, 0.0  ;;  %v287_v20 = vmax.f32 %v223_v9, 0.0  ;;  %v225_v21 = vadd.f32 %v1158_v5, %v154_v10  ;;  %v156_v26 = vmul.f32 %v1154_v2, %v85_v11 }
  0x56   :  { %v858_v24 = vpack.c.bf16 %v285_v13, %v284_v12  ;;  %v288_v25 = vmax.f32 %v224_v14, 0.0  ;;  %v226_v27 = vadd.f32 %v1158_v5, %v155_v15  ;;  %961 = vst [vmem:[#allocation8 + $0x60] sm:$0xff] %v853_v18   ;;  %v157_v31 = vmul.f32 %v1154_v2, %v86_v16  ;;  %v100_v12 = vld [vmem:[#allocation2 + $0x180] sm:$0xff] }
  0x57   :  { %v863_v29 = vpack.c.bf16 %v287_v20, %v286_v19  ;;  %v289_v30 = vmax.f32 %v225_v21, 0.0  ;;  %v158_v32 = vmul.f32 %v1154_v2, %v87_v17  ;;  %v227_v34 = vadd.f32 %v1158_v5, %v156_v26  ;;  %v101_v21 = vld [vmem:[#allocation2 + $0x188] sm:$0xff]  ;;  %v102_v26 = vld [vmem:[#allocation2 + $0x190] sm:$0xff] }
  0x58   :  { %962 = vst [vmem:[#allocation8 + $0x68] sm:$0xff] %v858_v24   ;;  %v290_v35 = vmax.f32 %v226_v27, 0.0  ;;  %v159_v36 = vmul.f32 %v1154_v2, %v88_v22  ;;  %v160_v37 = vmul.f32 %v1154_v2, %v89_v23  ;;  %v228_v40 = vadd.f32 %v1158_v5, %v157_v31  ;;  %v103_v27 = vld [vmem:[#allocation2 + $0x198] sm:$0xff] }
  0x59   :  { %963 = vst [vmem:[#allocation8 + $0x70] sm:$0xff] %v863_v29   ;;  %v868_v39 = vpack.c.bf16 %v289_v30, %v288_v25  ;;  %v229_v41 = vadd.f32 %v1158_v5, %v158_v32  ;;  %v161_v42 = vmul.f32 %v1154_v2, %v90_v28  ;;  %v291_v43 = vmax.f32 %v227_v34, 0.0  ;;  %v104_v32 = vld [vmem:[#allocation2 + $0x1a0] sm:$0xff] }
  0x5a   :  { %v230_v44 = vadd.f32 %v1158_v5, %v159_v36  ;;  %v231_v45 = vadd.f32 %v1158_v5, %v160_v37  ;;  %v162_v46 = vmul.f32 %v1154_v2, %v91_v33  ;;  %v292_v48 = vmax.f32 %v228_v40, 0.0  ;;  %v105_v33 = vld [vmem:[#allocation2 + $0x1a8] sm:$0xff] }
  0x5b   :  { %964 = vst [vmem:[#allocation8 + $0x78] sm:$0xff] %v868_v39   ;;  %v293_v49 = vmax.f32 %v229_v41, 0.0  ;;  %v232_v50 = vadd.f32 %v1158_v5, %v161_v42  ;;  %v163_v51 = vmul.f32 %v1154_v2, %v92_v38  ;;  %v873_v54 = vpack.c.bf16 %v291_v43, %v290_v35  ;;  %v106_v38 = vld [vmem:[#allocation2 + $0x1b0] sm:$0xff]  ;;  %v107_v43 = vld [vmem:[#allocation2 + $0x1b8] sm:$0xff] }
  0x5c   :  { %v294_v55 = vmax.f32 %v230_v44, 0.0  ;;  %v295_v56 = vmax.f32 %v231_v45, 0.0  ;;  %v233_v57 = vadd.f32 %v1158_v5, %v162_v46  ;;  %v164_v62 = vmul.f32 %v1154_v2, %v93_v47 }
  0x5d   :  { %v878_v60 = vpack.c.bf16 %v293_v49, %v292_v48  ;;  %v296_v61 = vmax.f32 %v232_v50, 0.0  ;;  %v234_v63 = vadd.f32 %v1158_v5, %v163_v51  ;;  %965 = vst [vmem:[#allocation8 + $0x80] sm:$0xff] %v873_v54   ;;  %v165_v4 = vmul.f32 %v1154_v2, %v94_v52  ;;  %v108_v48 = vld [vmem:[#allocation2 + $0x1c0] sm:$0xff] }
  0x5e   :  { %v883_v1 = vpack.c.bf16 %v295_v56, %v294_v55  ;;  %v297_v3 = vmax.f32 %v233_v57, 0.0  ;;  %v166_v6 = vmul.f32 %v1154_v2, %v95_v53  ;;  %v235_v8 = vadd.f32 %v1158_v5, %v164_v62  ;;  %v109_v57 = vld [vmem:[#allocation2 + $0x1c8] sm:$0xff]  ;;  %v110_v62 = vld [vmem:[#allocation2 + $0x1d0] sm:$0xff] }
  0x5f   :  { %966 = vst [vmem:[#allocation8 + $0x88] sm:$0xff] %v878_v60   ;;  %v298_v9 = vmax.f32 %v234_v63, 0.0  ;;  %v167_v10 = vmul.f32 %v1154_v2, %v96_v58  ;;  %v168_v11 = vmul.f32 %v1154_v2, %v97_v59  ;;  %v236_v14 = vadd.f32 %v1158_v5, %v165_v4  ;;  %v111_v63 = vld [vmem:[#allocation2 + $0x1d8] sm:$0xff] }
  0x60   :  { %967 = vst [vmem:[#allocation8 + $0x90] sm:$0xff] %v883_v1   ;;  %v888_v13 = vpack.c.bf16 %v297_v3, %v296_v61  ;;  %v237_v15 = vadd.f32 %v1158_v5, %v166_v6  ;;  %v169_v16 = vmul.f32 %v1154_v2, %v98_v0  ;;  %v299_v17 = vmax.f32 %v235_v8, 0.0  ;;  %v112_v6 = vld [vmem:[#allocation2 + $0x1e0] sm:$0xff] }
  0x61   :  { %v238_v18 = vadd.f32 %v1158_v5, %v167_v10  ;;  %v239_v19 = vadd.f32 %v1158_v5, %v168_v11  ;;  %v170_v20 = vmul.f32 %v1154_v2, %v99_v7  ;;  %v300_v22 = vmax.f32 %v236_v14, 0.0  ;;  %v113_v7 = vld [vmem:[#allocation2 + $0x1e8] sm:$0xff] }
  0x62   :  { %968 = vst [vmem:[#allocation8 + $0x98] sm:$0xff] %v888_v13   ;;  %v301_v23 = vmax.f32 %v237_v15, 0.0  ;;  %v240_v24 = vadd.f32 %v1158_v5, %v169_v16  ;;  %v171_v25 = vmul.f32 %v1154_v2, %v100_v12  ;;  %v893_v28 = vpack.c.bf16 %v299_v17, %v298_v9  ;;  %v114_v12 = vld [vmem:[#allocation2 + $0x1f0] sm:$0xff]  ;;  %v115_v17 = vld [vmem:[#allocation2 + $0x1f8] sm:$0xff] }
  0x63   :  { %v302_v29 = vmax.f32 %v238_v18, 0.0  ;;  %v303_v30 = vmax.f32 %v239_v19, 0.0  ;;  %v241_v31 = vadd.f32 %v1158_v5, %v170_v20  ;;  %v172_v36 = vmul.f32 %v1154_v2, %v101_v21 }
  0x64   :  { %v898_v34 = vpack.c.bf16 %v301_v23, %v300_v22  ;;  %v304_v35 = vmax.f32 %v240_v24, 0.0  ;;  %v242_v37 = vadd.f32 %v1158_v5, %v171_v25  ;;  %969 = vst [vmem:[#allocation8 + $0xa0] sm:$0xff] %v893_v28   ;;  %v173_v41 = vmul.f32 %v1154_v2, %v102_v26 }
  0x65   :  { %v903_v39 = vpack.c.bf16 %v303_v30, %v302_v29  ;;  %v305_v40 = vmax.f32 %v241_v31, 0.0  ;;  %v174_v42 = vmul.f32 %v1154_v2, %v103_v27  ;;  %v243_v44 = vadd.f32 %v1158_v5, %v172_v36 }
  0x66   :  { %970 = vst [vmem:[#allocation8 + $0xa8] sm:$0xff] %v898_v34   ;;  %v306_v45 = vmax.f32 %v242_v37, 0.0  ;;  %v175_v46 = vmul.f32 %v1154_v2, %v104_v32  ;;  %v176_v47 = vmul.f32 %v1154_v2, %v105_v33  ;;  %v244_v50 = vadd.f32 %v1158_v5, %v173_v41 }
  0x67   :  { %971 = vst [vmem:[#allocation8 + $0xb0] sm:$0xff] %v903_v39   ;;  %v908_v49 = vpack.c.bf16 %v305_v40, %v304_v35  ;;  %v245_v51 = vadd.f32 %v1158_v5, %v174_v42  ;;  %v177_v52 = vmul.f32 %v1154_v2, %v106_v38  ;;  %v307_v53 = vmax.f32 %v243_v44, 0.0 }
  0x68   :  { %v246_v54 = vadd.f32 %v1158_v5, %v175_v46  ;;  %v247_v55 = vadd.f32 %v1158_v5, %v176_v47  ;;  %v178_v56 = vmul.f32 %v1154_v2, %v107_v43  ;;  %v308_v58 = vmax.f32 %v244_v50, 0.0 }
  0x69   :  { %972 = vst [vmem:[#allocation8 + $0xb8] sm:$0xff] %v908_v49   ;;  %v309_v59 = vmax.f32 %v245_v51, 0.0  ;;  %v248_v60 = vadd.f32 %v1158_v5, %v177_v52  ;;  %v179_v61 = vmul.f32 %v1154_v2, %v108_v48  ;;  %v913_v0 = vpack.c.bf16 %v307_v53, %v306_v45 }
  0x6a   :  { %v310_v1 = vmax.f32 %v246_v54, 0.0  ;;  %v311_v3 = vmax.f32 %v247_v55, 0.0  ;;  %v249_v4 = vadd.f32 %v1158_v5, %v178_v56  ;;  %v180_v10 = vmul.f32 %v1154_v2, %v109_v57 }
  0x6b   :  { %v918_v8 = vpack.c.bf16 %v309_v59, %v308_v58  ;;  %v312_v9 = vmax.f32 %v248_v60, 0.0  ;;  %v250_v11 = vadd.f32 %v1158_v5, %v179_v61  ;;  %973 = vst [vmem:[#allocation8 + $0xc0] sm:$0xff] %v913_v0   ;;  %v181_v15 = vmul.f32 %v1154_v2, %v110_v62 }
  0x6c   :  { %v923_v13 = vpack.c.bf16 %v311_v3, %v310_v1  ;;  %v313_v14 = vmax.f32 %v249_v4, 0.0  ;;  %v182_v16 = vmul.f32 %v1154_v2, %v111_v63  ;;  %v251_v18 = vadd.f32 %v1158_v5, %v180_v10 }
  0x6d   :  { %974 = vst [vmem:[#allocation8 + $0xc8] sm:$0xff] %v918_v8   ;;  %v314_v19 = vmax.f32 %v250_v11, 0.0  ;;  %v183_v20 = vmul.f32 %v1154_v2, %v112_v6  ;;  %v184_v21 = vmul.f32 %v1154_v2, %v113_v7  ;;  %v252_v23 = vadd.f32 %v1158_v5, %v181_v15 }
  0x6e   :  { %975 = vst [vmem:[#allocation8 + $0xd0] sm:$0xff] %v923_v13   ;;  %v928_v22 = vpack.c.bf16 %v313_v14, %v312_v9  ;;  %v253_v24 = vadd.f32 %v1158_v5, %v182_v16  ;;  %v185_v25 = vmul.f32 %v1154_v2, %v114_v12  ;;  %v315_v26 = vmax.f32 %v251_v18, 0.0 }
  0x6f   :  { %v254_v27 = vadd.f32 %v1158_v5, %v183_v20  ;;  %v255_v28 = vadd.f32 %v1158_v5, %v184_v21  ;;  %v186_v29 = vmul.f32 %v1154_v2, %v115_v17  ;;  %v316_v30 = vmax.f32 %v252_v23, 0.0 }
  0x70   :  { %976 = vst [vmem:[#allocation8 + $0xd8] sm:$0xff] %v928_v22   ;;  %v317_v31 = vmax.f32 %v253_v24, 0.0  ;;  %v256_v32 = vadd.f32 %v1158_v5, %v185_v25  ;;  %v933_v33 = vpack.c.bf16 %v315_v26, %v314_v19 }
  0x71   :  { %v318_v34 = vmax.f32 %v254_v27, 0.0  ;;  %v319_v35 = vmax.f32 %v255_v28, 0.0  ;;  %v257_v36 = vadd.f32 %v1158_v5, %v186_v29 }
  0x72   :  { %v938_v37 = vpack.c.bf16 %v317_v31, %v316_v30  ;;  %v320_v38 = vmax.f32 %v256_v32, 0.0  ;;  %977 = vst [vmem:[#allocation8 + $0xe0] sm:$0xff] %v933_v33  }
  0x73   :  { %v943_v39 = vpack.c.bf16 %v319_v35, %v318_v34  ;;  %v321_v40 = vmax.f32 %v257_v36, 0.0 }
  0x74   :  { %978 = vst [vmem:[#allocation8 + $0xe8] sm:$0xff] %v938_v37  }
  0x75   :  { %979 = vst [vmem:[#allocation8 + $0xf0] sm:$0xff] %v943_v39   ;;  %v948_v2 = vpack.c.bf16 %v321_v40, %v320_v38 }
  0x77   :  { %980 = vst [vmem:[#allocation8 + $0xf8] sm:$0xff] %v948_v2  }
  0x78   :  { %1066 = shalt.err (!%p1063_p0)
}
  0x79   :  { %s1067_s27 = scalar_lea.hbm %s1301_s3, 4096 }
  0x7a   :  { %p1068_p1 = scmp.ne.s32.totalorder %s1301_s3, %s1067_s27  ;;  %p1071_p2 = scmp.lt.u32.totalorder %s1067_s27, %s1301_s3 }
  0x7c   :  { %p1073_p3 = pnand %p1071_p2, %p1068_p1 }
  0x7e   :  { %1076 = shalt.err (!%p1073_p3)
}
  0x7f   :  { %s1089_s5 = smov 64   ;;  %s1090_s6 = smov 4  }
  0x80   :  { %653 = dma.vmem_to_hbm [thread:$0]  %s648_s23, 4096, %s1301_s3, [#allocation4], %s1089_s5, %s1089_s5, %s1090_s6  }
  0x81   :  { %1081 = dma.done.wait [#allocation4], 4096  }
  0x82   :  { %1082 = vsyncadd [#allocation4], 4294963200 }
  0x83   :  { %657 = vsyncpa [#allocation3], 1 }
  0x84   :  { %658 = vsyncpa [#allocation6], 1 }
  0x85   :  { %659 = vsyncpa [#allocation4], 1 }

// kernel: basic_block_forward.4
= control target key start
LH: loop header
LB: loop body
LE: loop exit
PB: predicated region body
PF: predicated region fallthrough
CT: control target
= control target key end

     0   :  { %10 = vsyncpa [#allocation3], 0  ;;  %s6220_s0 = inlined_call_operand.hbm [shape: bf16[512,1152], index: 0, kind: input, shape index: {}]   ;;  %s6221_s1 = inlined_call_operand.hbm [shape: bf16[1152,128], index: 1, kind: input, shape index: {}]   ;;  %s6222_s2 = inlined_call_operand.hbm [shape: f32[512,128], index: 2, kind: output, shape index: {0}]   ;;  %s6223_s3 = inlined_call_operand.hbm [shape: f32[8,128], index: 3, kind: output, shape index: {1}]   ;;  %s6224_s4 = inlined_call_operand.hbm [shape: f32[8,128], index: 4, kind: output, shape index: {2}]  }
   0x1   :  { %11 = vsyncpa [#allocation6], 0 }
   0x2   :  { %12 = vsyncpa [#allocation4], 0 }
   0x3   :  { %13 = vsyncpa [#allocation9], 0  ;;  %s5621_s15 = smov [#allocation2]   ;;  %s5503_s19 = scalar_lea.hbm %s6220_s0, 36864 }
   0x4   :  { %s19_s16 = sshll.u32 %s5621_s15, 4  ;;  %p5504_p0 = scmp.ne.s32.totalorder %s6220_s0, %s5503_s19  ;;  %s20_s16 = int_to_ptr.vmem [resolvable:$true] %s19_s16 }
   0x5   :  { %p5507_p1 = scmp.lt.u32.totalorder %s5503_s19, %s6220_s0 }
   0x7   :  { %p5509_p2 = pnand %p5507_p1, %p5504_p0 }
   0x9   :  { %5512 = shalt.err (!%p5509_p2)
}
   0xa   :  { %s5513_s24 = scalar_lea.vmem %s20_s16, 36864  ;;  %p5518_p4 = scmp.lt.s32.totalorder %s20_s16, %s20_s16 }
   0xb   :  { %p5514_p3 = scmp.ne.s32.totalorder %s20_s16, %s5513_s24  ;;  %p5519_p5 = scmp.lt.s32.totalorder %s5513_s24, %s5513_s24 }
   0xd   :  { %p5520_p6 = por %p5519_p5, %p5518_p4 }
   0xf   :  { %p5521_p7 = pnand %p5520_p6, %p5514_p3 }
  0x11   :  { %5524 = shalt.err (!%p5521_p7)
}
  0x12   :  { %s5622_s25 = smov 576   ;;  %s5623_s26 = smov 36  }
  0x13   :  { %25 = dma.hbm_to_vmem [thread:$0]  %s6220_s0, 36864, %s20_s16, [#allocation3], %s5622_s25, %s5622_s25, %s5623_s26  }
  0x14   :  { %s5624_s29 = smov [#allocation5]   ;;  %s5525_s7 = scalar_lea.hbm %s6221_s1, 9216 }
  0x15   :  { %s31_s30 = sshll.u32 %s5624_s29, 4  ;;  %p5526_p8 = scmp.ne.s32.totalorder %s6221_s1, %s5525_s7  ;;  %s32_s30 = int_to_ptr.vmem [resolvable:$true] %s31_s30 }
  0x16   :  { %p5529_p9 = scmp.lt.u32.totalorder %s5525_s7, %s6221_s1 }
  0x18   :  { %p5531_p10 = pnand %p5529_p9, %p5526_p8 }
  0x1a   :  { %5534 = shalt.err (!%p5531_p10)
}
  0x1b   :  { %s5535_s12 = scalar_lea.vmem %s32_s30, 9216  ;;  %p5540_p12 = scmp.lt.s32.totalorder %s32_s30, %s32_s30 }
  0x1c   :  { %p5536_p11 = scmp.ne.s32.totalorder %s32_s30, %s5535_s12  ;;  %p5541_p13 = scmp.lt.s32.totalorder %s5535_s12, %s5535_s12 }
  0x1e   :  { %p5542_p0 = por %p5541_p13, %p5540_p12 }
  0x20   :  { %p5543_p1 = pnand %p5542_p0, %p5536_p11 }
  0x22   :  { %5546 = shalt.err (!%p5543_p1)
}
  0x23   :  { %s5625_s0 = smov 64   ;;  %s5626_s13 = smov 4  }
  0x24   :  { %37 = dma.hbm_to_vmem [thread:$0]  %s6221_s1, 9216, %s32_s30, [#allocation6], %s5625_s0, %s5625_s0, %s5626_s13  }
  0x25   :  { %5613 = dma.done.wait [#allocation3], 36864  }
  0x26   :  { %5614 = vsyncadd [#allocation3], 4294930432 }
  0x27   :  { %5615 = dma.done.wait [#allocation6], 9216  }
  0x28   :  { %5616 = vsyncadd [#allocation6], 4294958080  ;;  %v5627_v0 = vmov 0   ;;  %v5015_v1 = vld [vmem:[#allocation5] sm:$0xff]   ;;  %v5017_v3 = vld [vmem:[#allocation5 + $0x8] sm:$0xff]   ;;  %s5628_s1 = smov [#allocation7]  }
  0x29   :  { %2413 = vmatprep.subr.bf16.mxu1 %v5627_v0  ;;  %2702 = vmatprep.subr.bf16.mxu0 %v5627_v0  ;;  %v5684_v2 = vld [vmem:[#allocation5 + $0x80] sm:$0xff]   ;;  %v5688_v4 = vld [vmem:[#allocation5 + $0x88] sm:$0xff]   ;;  %v5019_v5 = vld [vmem:[#allocation5 + $0x10] sm:$0xff]   ;;  %s4131_s16 = sshll.u32 %s5628_s1, 4  ;;  %s4132_s16 = int_to_ptr.vmem [resolvable:$true] %s4131_s16 }
  0x2a   :  { %2414 = vmatpush1.bf16.msra.mxu1 %v5015_v1  ;;  %2703 = vmatpush1.bf16.msra.mxu0 %v5684_v2  ;;  %v5693_v6 = vld [vmem:[#allocation5 + $0x90] sm:$0xff]   ;;  %v5021_v7 = vld [vmem:[#allocation5 + $0x18] sm:$0xff]   ;;  %v5023_v9 = vld [vmem:[#allocation5 + $0x20] sm:$0xff]   ;;  %s5547_s17 = scalar_lea.vmem %s4132_s16, 8192  ;;  %p5552_p3 = scmp.lt.s32.totalorder %s4132_s16, %s4132_s16 }
  0x2b   :  { %2415 = vmatprep.subr.bf16.mxu1 %v5627_v0  ;;  %2704 = vmatprep.subr.bf16.mxu0 %v5627_v0  ;;  %v5698_v8 = vld [vmem:[#allocation5 + $0x98] sm:$0xff]   ;;  %v5703_v10 = vld [vmem:[#allocation5 + $0xa0] sm:$0xff]   ;;  %v5025_v11 = vld [vmem:[#allocation5 + $0x28] sm:$0xff]   ;;  %p5548_p2 = scmp.ne.s32.totalorder %s4132_s16, %s5547_s17  ;;  %p5553_p4 = scmp.lt.s32.totalorder %s5547_s17, %s5547_s17 }
  0x2c   :  { %v5708_v12 = vld [vmem:[#allocation5 + $0xa8] sm:$0xff]   ;;  %v5027_v13 = vld [vmem:[#allocation5 + $0x30] sm:$0xff]   ;;  %v5029_v15 = vld [vmem:[#allocation5 + $0x38] sm:$0xff]  }
  0x2d   :  { %v5713_v14 = vld [vmem:[#allocation5 + $0xb0] sm:$0xff]   ;;  %v5718_v16 = vld [vmem:[#allocation5 + $0xb8] sm:$0xff]   ;;  %v5031_v17 = vld [vmem:[#allocation5 + $0x40] sm:$0xff]   ;;  %p5554_p5 = por %p5553_p4, %p5552_p3 }
  0x2e   :  { %2416 = vmatpush1.bf16.msra.mxu1 %v5017_v3  ;;  %2705 = vmatpush1.bf16.msra.mxu0 %v5688_v4  ;;  %v5723_v18 = vld [vmem:[#allocation5 + $0xc0] sm:$0xff]   ;;  %v5033_v20 = vld [vmem:[#allocation5 + $0x48] sm:$0xff]   ;;  %v5035_v23 = vld [vmem:[#allocation5 + $0x50] sm:$0xff]  }
  0x2f   :  { %2417 = vmatprep.subr.bf16.mxu1 %v5627_v0  ;;  %2706 = vmatprep.subr.bf16.mxu0 %v5627_v0  ;;  %v5049_v19 = vld [vmem:[#allocation2 + $0x4] ss:$36 sps:$4 sm:$0xff]   ;;  %v5052_v21 = vld [vmem:[#allocation2 + $0xc] ss:$36 sps:$4 sm:$0xff]   ;;  %v5037_v25 = vld [vmem:[#allocation5 + $0x58] sm:$0xff]   ;;  %p5555_p6 = pnand %p5554_p5, %p5548_p2 }
  0x30   :  { %v5728_v22 = vld [vmem:[#allocation5 + $0xc8] sm:$0xff]   ;;  %2445 = vmatprep.mubr.bf16.mxu1 %v5049_v19  ;;  %2734 = vmatprep.mubr.bf16.mxu0 %v5052_v21  ;;  %v5733_v24 = vld [vmem:[#allocation5 + $0xd0] sm:$0xff]   ;;  %v5738_v26 = vld [vmem:[#allocation5 + $0xd8] sm:$0xff]  }
  0x31   :  { %v5039_v27 = vld [vmem:[#allocation5 + $0x60] sm:$0xff]   ;;  %v5041_v29 = vld [vmem:[#allocation5 + $0x68] sm:$0xff]   ;;  %v5043_v31 = vld [vmem:[#allocation5 + $0x70] sm:$0xff]  }
  0x32   :  { %2418 = vmatpush1.bf16.msra.mxu1 %v5019_v5  ;;  %2707 = vmatpush1.bf16.msra.mxu0 %v5693_v6  ;;  %v5743_v28 = vld [vmem:[#allocation5 + $0xe0] sm:$0xff]   ;;  %v5748_v30 = vld [vmem:[#allocation5 + $0xe8] sm:$0xff]   ;;  %v5753_v32 = vld [vmem:[#allocation5 + $0xf0] sm:$0xff]  }
  0x33   :  { %2419 = vmatprep.subr.bf16.mxu1 %v5627_v0  ;;  %2708 = vmatprep.subr.bf16.mxu0 %v5627_v0  ;;  %v5045_v33 = vld [vmem:[#allocation5 + $0x78] sm:$0xff]   ;;  %v5047_v35 = vld [vmem:[#allocation2] ss:$36 sps:$4 sm:$0xff]   ;;  %v5050_v36 = vld [vmem:[#allocation2 + $0x8] ss:$36 sps:$4 sm:$0xff]  }
  0x34   :  { %v5758_v34 = vld [vmem:[#allocation5 + $0xf8] sm:$0xff]   ;;  %v5053_v37 = vld [vmem:[#allocation5 + $0x100] sm:$0xff]   ;;  %v5055_v38 = vld [vmem:[#allocation2 + $0x4c] ss:$36 sps:$4 sm:$0xff]  }
  0x35   :  { %v5057_v39 = vld [vmem:[#allocation2 + $0x54] ss:$36 sps:$4 sm:$0xff]   ;;  %v5054_v40 = vld [vmem:[#allocation5 + $0x108] sm:$0xff]   ;;  %v5065_v45 = vld [vmem:[#allocation2 + $0x9c] ss:$36 sps:$4 sm:$0xff]  }
  0x36   :  { %2420 = vmatpush1.bf16.msra.mxu1 %v5021_v7  ;;  %2709 = vmatpush1.bf16.msra.mxu0 %v5698_v8  ;;  %v5059_v41 = vld [vmem:[#allocation2 + $0x48] ss:$36 sps:$4 sm:$0xff]   ;;  %v5060_v42 = vld [vmem:[#allocation2 + $0x50] ss:$36 sps:$4 sm:$0xff]   ;;  %v5062_v46 = vld [vmem:[#allocation5 + $0x118] sm:$0xff]  }
  0x37   :  { %2421 = vmatprep.subr.bf16.mxu1 %v5627_v0  ;;  %2710 = vmatprep.subr.bf16.mxu0 %v5627_v0  ;;  %v5063_v43 = vld [vmem:[#allocation2 + $0x94] ss:$36 sps:$4 sm:$0xff]   ;;  %v5069_v49 = vld [vmem:[#allocation5 + $0x120] sm:$0xff]   ;;  %v5070_v52 = vld [vmem:[#allocation5 + $0x128] sm:$0xff]  }
  0x38   :  { %v5061_v44 = vld [vmem:[#allocation5 + $0x110] sm:$0xff]   ;;  %v5068_v48 = vld [vmem:[#allocation2 + $0x98] ss:$36 sps:$4 sm:$0xff]   ;;  %v5073_v51 = vld [vmem:[#allocation2 + $0xe4] ss:$36 sps:$4 sm:$0xff]  }
  0x39   :  { %v5067_v47 = vld [vmem:[#allocation2 + $0x90] ss:$36 sps:$4 sm:$0xff]   ;;  %v5071_v50 = vld [vmem:[#allocation2 + $0xdc] ss:$36 sps:$4 sm:$0xff]   ;;  %v5079_v55 = vld [vmem:[#allocation2 + $0x124] ss:$36 sps:$4 sm:$0xff]  }
  0x3a   :  { %2422 = vmatpush1.bf16.msra.mxu1 %v5023_v9  ;;  %2711 = vmatpush1.bf16.msra.mxu0 %v5703_v10  ;;  %v5075_v53 = vld [vmem:[#allocation2 + $0xd8] ss:$36 sps:$4 sm:$0xff]   ;;  %v5076_v54 = vld [vmem:[#allocation2 + $0xe0] ss:$36 sps:$4 sm:$0xff]   ;;  %v5077_v56 = vld [vmem:[#allocation5 + $0x130] sm:$0xff]  }
  0x3b   :  { %2423 = vmatprep.subr.bf16.mxu1 %v5627_v0  ;;  %2712 = vmatprep.subr.bf16.mxu0 %v5627_v0  ;;  %v5081_v57 = vld [vmem:[#allocation2 + $0x12c] ss:$36 sps:$4 sm:$0xff]   ;;  %v5078_v58 = vld [vmem:[#allocation5 + $0x138] sm:$0xff]   ;;  %v5083_v59 = vld [vmem:[#allocation2 + $0x120] ss:$36 sps:$4 sm:$0xff]  }
  0x3c   :  { %v5084_v60 = vld [vmem:[#allocation2 + $0x128] ss:$36 sps:$4 sm:$0xff]   ;;  %v5085_v61 = vld [vmem:[#allocation5 + $0x140] sm:$0xff]   ;;  %v5089_v63 = vld [vmem:[#allocation2 + $0x174] ss:$36 sps:$4 sm:$0xff]  }
  0x3d   :  { %v5087_v62 = vld [vmem:[#allocation2 + $0x16c] ss:$36 sps:$4 sm:$0xff]   ;;  %v5094_v7 = vld [vmem:[#allocation5 + $0x158] sm:$0xff]  }
  0x3e   :  { %2424 = vmatpush1.bf16.msra.mxu1 %v5025_v11  ;;  %2713 = vmatpush1.bf16.msra.mxu0 %v5708_v12  ;;  %v5086_v1 = vld [vmem:[#allocation5 + $0x148] sm:$0xff]   ;;  %v5092_v3 = vld [vmem:[#allocation2 + $0x170] ss:$36 sps:$4 sm:$0xff]   ;;  %v5100_v9 = vld [vmem:[#allocation2 + $0x1b8] ss:$36 sps:$4 sm:$0xff]  }
  0x3f   :  { %2425 = vmatprep.subr.bf16.mxu1 %v5627_v0  ;;  %2714 = vmatprep.subr.bf16.mxu0 %v5627_v0  ;;  %v5093_v5 = vld [vmem:[#allocation5 + $0x150] sm:$0xff]   ;;  %v5103_v11 = vld [vmem:[#allocation2 + $0x1fc] ss:$36 sps:$4 sm:$0xff]  }
  0x40   :  { %v5110_v19 = vld [vmem:[#allocation5 + $0x178] sm:$0xff]   ;;  %v5113_v21 = vld [vmem:[#allocation2 + $0x10] ss:$36 sps:$4 sm:$0xff]  }
  0x42   :  { %2426 = vmatpush1.bf16.msra.mxu1 %v5027_v13  ;;  %2715 = vmatpush1.bf16.msra.mxu0 %v5713_v14  ;;  %v5102_v13 = vld [vmem:[#allocation5 + $0x168] sm:$0xff]  }
  0x43   :  { %2427 = vmatprep.subr.bf16.mxu1 %v5627_v0  ;;  %2716 = vmatprep.subr.bf16.mxu0 %v5627_v0 }
  0x46   :  { %2428 = vmatpush1.bf16.msra.mxu1 %v5029_v15  ;;  %2717 = vmatpush1.bf16.msra.mxu0 %v5718_v16  ;;  %v5108_v15 = vld [vmem:[#allocation2 + $0x200] ss:$36 sps:$4 sm:$0xff]  }
  0x47   :  { %2429 = vmatprep.subr.bf16.mxu1 %v5627_v0  ;;  %2718 = vmatprep.subr.bf16.mxu0 %v5627_v0 }
  0x4a   :  { %2430 = vmatpush1.bf16.msra.mxu1 %v5031_v17  ;;  %2719 = vmatpush1.bf16.msra.mxu0 %v5723_v18  ;;  %v5109_v17 = vld [vmem:[#allocation5 + $0x170] sm:$0xff]  }
  0x4b   :  { %2431 = vmatprep.subr.bf16.mxu1 %v5627_v0  ;;  %2720 = vmatprep.subr.bf16.mxu0 %v5627_v0 }
  0x4e   :  { %2432 = vmatpush1.bf16.msra.mxu1 %v5033_v20  ;;  %2721 = vmatpush1.bf16.msra.mxu0 %v5728_v22  ;;  %v5116_v20 = vld [vmem:[#allocation2 + $0x240] ss:$36 sps:$4 sm:$0xff]  }
  0x4f   :  { %2433 = vmatprep.subr.bf16.mxu1 %v5627_v0  ;;  %2722 = vmatprep.subr.bf16.mxu0 %v5627_v0 }
  0x52   :  { %2434 = vmatpush1.bf16.msra.mxu1 %v5035_v23  ;;  %2723 = vmatpush1.bf16.msra.mxu0 %v5733_v24  ;;  %v5117_v23 = vld [vmem:[#allocation5 + $0x180] sm:$0xff]  }
  0x53   :  { %2435 = vmatprep.subr.bf16.mxu1 %v5627_v0  ;;  %2724 = vmatprep.subr.bf16.mxu0 %v5627_v0 }
  0x56   :  { %2436 = vmatpush1.bf16.msra.mxu1 %v5037_v25  ;;  %2725 = vmatpush1.bf16.msra.mxu0 %v5738_v26  ;;  %v5122_v25 = vld [vmem:[#allocation2 + $0x288] ss:$36 sps:$4 sm:$0xff]  }
  0x57   :  { %2437 = vmatprep.subr.bf16.mxu1 %v5627_v0  ;;  %2726 = vmatprep.subr.bf16.mxu0 %v5627_v0 }
  0x5a   :  { %2438 = vmatpush1.bf16.msra.mxu1 %v5039_v27  ;;  %2727 = vmatpush1.bf16.msra.mxu0 %v5743_v28  ;;  %v5123_v27 = vld [vmem:[#allocation2 + $0x58] ss:$36 sps:$4 sm:$0xff]  }
  0x5b   :  { %2439 = vmatprep.subr.bf16.mxu1 %v5627_v0  ;;  %2728 = vmatprep.subr.bf16.mxu0 %v5627_v0 }
  0x5e   :  { %2440 = vmatpush1.bf16.msra.mxu1 %v5041_v29  ;;  %2729 = vmatpush1.bf16.msra.mxu0 %v5748_v30  ;;  %v5126_v29 = vld [vmem:[#allocation2 + $0xa4] ss:$36 sps:$4 sm:$0xff]  }
  0x5f   :  { %2441 = vmatprep.subr.bf16.mxu1 %v5627_v0  ;;  %2730 = vmatprep.subr.bf16.mxu0 %v5627_v0 }
  0x62   :  { %2442 = vmatpush1.bf16.msra.mxu1 %v5043_v31  ;;  %2731 = vmatpush1.bf16.msra.mxu0 %v5753_v32  ;;  %v5128_v31 = vld [vmem:[#allocation2 + $0x2d0] ss:$36 sps:$4 sm:$0xff]  }
  0x63   :  { %2443 = vmatprep.subr.bf16.mxu1 %v5627_v0  ;;  %2732 = vmatprep.subr.bf16.mxu0 %v5627_v0 }
  0x66   :  { %2444 = vmatpush1.bf16.msra.mxu1 %v5045_v33  ;;  %2733 = vmatpush1.bf16.msra.mxu0 %v5758_v34  ;;  %v5129_v33 = vld [vmem:[#allocation2 + $0xa0] ss:$36 sps:$4 sm:$0xff]  }
  0x67   :  { %4651 = vmatprep.subr.bf16.mxu1 %v5627_v0  ;;  %2991 = vmatprep.subr.bf16.mxu0 %v5627_v0 }
  0x69   :  { %2446 = vmatmul.mubr.bf16.vlgmr.msra.gmra.mrb[0].mxu1 %v5047_v35  ;;  %2735 = vmatmul.mubr.bf16.vlgmr.msra.gmra.mrb[0].mxu0 %v5050_v36  ;;  %v5133_v35 = vld [vmem:[#allocation2 + $0xec] ss:$36 sps:$4 sm:$0xff]   ;;  %v5169_v36 = vld [vmem:[#allocation5 + $0x1a0] sm:$0xff]  }
  0x6a   :  { %4667 = vmatpush1.bf16.msra.mxu1 %v5684_v2  ;;  %2992 = vmatpush1.bf16.msra.mxu0 %v5053_v37  ;;  %v5091_v2 = vld [vmem:[#allocation2 + $0x168] ss:$36 sps:$4 sm:$0xff]  }
  0x6b   :  { %2453 = vmatprep.mubr.bf16.mxu1 %v5055_v38  ;;  %2993 = vmatprep.subr.bf16.mxu0 %v5627_v0  ;;  %v5182_v37 = vld [vmem:[#allocation5 + $0x1a8] sm:$0xff]   ;;  %v5135_v38 = vld [vmem:[#allocation2 + $0x318] ss:$36 sps:$4 sm:$0xff]  }
  0x6c   :  { %2742 = vmatprep.mubr.bf16.mxu0 %v5057_v39  ;;  %4652 = vmatprep.subr.bf16.mxu1 %v5627_v0  ;;  %v5136_v39 = vld [vmem:[#allocation2 + $0xe8] ss:$36 sps:$4 sm:$0xff]  }
  0x6e   :  { %4668 = vmatpush1.bf16.msra.mxu1 %v5688_v4  ;;  %2994 = vmatpush1.bf16.msra.mxu0 %v5054_v40  ;;  %v5095_v4 = vld [vmem:[#allocation2 + $0x1b4] ss:$36 sps:$4 sm:$0xff]   ;;  %v5137_v40 = vld [vmem:[#allocation2 + $0x364] ss:$36 sps:$4 sm:$0xff]  }
  0x6f   :  { %4653 = vmatprep.subr.bf16.mxu1 %v5627_v0  ;;  %2995 = vmatprep.subr.bf16.mxu0 %v5627_v0 }
  0x71   :  { %2454 = vmatmul.mubr.bf16.gmra.mrb[4].mxu1 %v5059_v41  ;;  %2743 = vmatmul.mubr.bf16.gmra.mrb[4].mxu0 %v5060_v42  ;;  %v5139_v41 = vld [vmem:[#allocation2 + $0x134] ss:$36 sps:$4 sm:$0xff]  }
  0x72   :  { %2461 = vmatprep.mubr.bf16.mxu1 %v5063_v43  ;;  %2996 = vmatpush1.bf16.msra.mxu0 %v5061_v44  ;;  %v5195_v42 = vld [vmem:[#allocation5 + $0x1b0] sm:$0xff]   ;;  %v5208_v43 = vld [vmem:[#allocation5 + $0x1b8] sm:$0xff]   ;;  %v5141_v44 = vld [vmem:[#allocation2 + $0x360] ss:$36 sps:$4 sm:$0xff]  }
  0x73   :  { %2750 = vmatprep.mubr.bf16.mxu0 %v5065_v45  ;;  %2997 = vmatprep.subr.bf16.mxu0 %v5627_v0  ;;  %v5142_v45 = vld [vmem:[#allocation2 + $0x130] ss:$36 sps:$4 sm:$0xff]  }
  0x74   :  { %4669 = vmatpush1.bf16.msra.mxu1 %v5693_v6  ;;  %v5097_v6 = vld [vmem:[#allocation2 + $0x1bc] ss:$36 sps:$4 sm:$0xff]  }
  0x75   :  { %4654 = vmatprep.subr.bf16.mxu1 %v5627_v0 }
  0x76   :  { %2998 = vmatpush1.bf16.msra.mxu0 %v5062_v46  ;;  %v5144_v46 = vld [vmem:[#allocation2 + $0x3ac] ss:$36 sps:$4 sm:$0xff]  }
  0x77   :  { %2999 = vmatprep.subr.bf16.mxu0 %v5627_v0 }
  0x78   :  { %4670 = vmatpush1.bf16.msra.mxu1 %v5698_v8  ;;  %v5099_v8 = vld [vmem:[#allocation2 + $0x1b0] ss:$36 sps:$4 sm:$0xff]  }
  0x79   :  { %2462 = vmatmul.mubr.bf16.gmra.mrb[8].mxu1 %v5067_v47  ;;  %4655 = vmatprep.subr.bf16.mxu1 %v5627_v0  ;;  %v5146_v47 = vld [vmem:[#allocation2 + $0x17c] ss:$36 sps:$4 sm:$0xff]  }
  0x7a   :  { %2751 = vmatmul.mubr.bf16.gmra.mrb[8].mxu0 %v5068_v48  ;;  %2469 = vmatprep.mubr.bf16.mxu1 %v5071_v50  ;;  %v5221_v48 = vld [vmem:[#allocation5 + $0x1c0] sm:$0xff]   ;;  %v5148_v50 = vld [vmem:[#allocation2 + $0x3a8] ss:$36 sps:$4 sm:$0xff]  }
  0x7b   :  { %3000 = vmatpush1.bf16.msra.mxu0 %v5069_v49  ;;  %2758 = vmatprep.mubr.bf16.mxu0 %v5073_v51  ;;  %v5234_v49 = vld [vmem:[#allocation5 + $0x1c8] sm:$0xff]   ;;  %v5149_v51 = vld [vmem:[#allocation2 + $0x178] ss:$36 sps:$4 sm:$0xff]  }
  0x7c   :  { %3001 = vmatprep.subr.bf16.mxu0 %v5627_v0  ;;  %4671 = vmatpush1.bf16.msra.mxu1 %v5703_v10  ;;  %v5101_v10 = vld [vmem:[#allocation5 + $0x160] sm:$0xff]  }
  0x7d   :  { %4656 = vmatprep.subr.bf16.mxu1 %v5627_v0 }
  0x7f   :  { %3002 = vmatpush1.bf16.msra.mxu0 %v5070_v52  ;;  %v5150_v52 = vld [vmem:[#allocation2 + $0x3f4] ss:$36 sps:$4 sm:$0xff]  }
  0x80   :  { %3003 = vmatprep.subr.bf16.mxu0 %v5627_v0  ;;  %4672 = vmatpush1.bf16.msra.mxu1 %v5708_v12  ;;  %v5105_v12 = vld [vmem:[#allocation2 + $0x204] ss:$36 sps:$4 sm:$0xff]  }
  0x81   :  { %2470 = vmatmul.mubr.bf16.gmra.mrb[12].mxu1 %v5075_v53  ;;  %4657 = vmatprep.subr.bf16.mxu1 %v5627_v0  ;;  %v5152_v53 = vld [vmem:[#allocation2 + $0x1c4] ss:$36 sps:$4 sm:$0xff]  }
  0x82   :  { %2759 = vmatmul.mubr.bf16.gmra.mrb[12].mxu0 %v5076_v54  ;;  %2477 = vmatprep.mubr.bf16.mxu1 %v5079_v55  ;;  %v5247_v54 = vld [vmem:[#allocation5 + $0x1d0] sm:$0xff]  }
  0x83   :  { %3004 = vmatpush1.bf16.msra.mxu0 %v5077_v56  ;;  %2766 = vmatprep.mubr.bf16.mxu0 %v5081_v57  ;;  %v5154_v55 = vld [vmem:[#allocation2 + $0x3f0] ss:$36 sps:$4 sm:$0xff]   ;;  %v5155_v56 = vld [vmem:[#allocation2 + $0x1c0] ss:$36 sps:$4 sm:$0xff]  }
  0x84   :  { %3005 = vmatprep.subr.bf16.mxu0 %v5627_v0  ;;  %4673 = vmatpush1.bf16.msra.mxu1 %v5713_v14  ;;  %v5107_v14 = vld [vmem:[#allocation2 + $0x1f8] ss:$36 sps:$4 sm:$0xff]  }
  0x85   :  { %4658 = vmatprep.subr.bf16.mxu1 %v5627_v0  ;;  %v5157_v57 = vld [vmem:[#allocation2 + $0x43c] ss:$36 sps:$4 sm:$0xff]  }
  0x87   :  { %3006 = vmatpush1.bf16.msra.mxu0 %v5078_v58  ;;  %v5159_v58 = vld [vmem:[#allocation2 + $0x20c] ss:$36 sps:$4 sm:$0xff]  }
  0x88   :  { %3007 = vmatprep.subr.bf16.mxu0 %v5627_v0  ;;  %4674 = vmatpush1.bf16.msra.mxu1 %v5718_v16  ;;  %v5111_v16 = vld [vmem:[#allocation2 + $0x244] ss:$36 sps:$4 sm:$0xff]  }
  0x89   :  { %2478 = vmatmul.mubr.bf16.gmra.mrb[16].mxu1 %v5083_v59  ;;  %4659 = vmatprep.subr.bf16.mxu1 %v5627_v0  ;;  %v5161_v59 = vld [vmem:[#allocation2 + $0x438] ss:$36 sps:$4 sm:$0xff]  }
  0x8a   :  { %2767 = vmatmul.mubr.bf16.gmra.mrb[16].mxu0 %v5084_v60  ;;  %2485 = vmatprep.mubr.bf16.mxu1 %v5087_v62  ;;  %v5162_v60 = vld [vmem:[#allocation2 + $0x208] ss:$36 sps:$4 sm:$0xff]   ;;  %v5260_v62 = vld [vmem:[#allocation5 + $0x1d8] sm:$0xff]  }
  0x8b   :  { %3008 = vmatpush1.bf16.msra.mxu0 %v5085_v61  ;;  %2774 = vmatprep.mubr.bf16.mxu0 %v5089_v63  ;;  %v5163_v61 = vld [vmem:[#allocation2 + $0x484] ss:$36 sps:$4 sm:$0xff]   ;;  %v5165_v63 = vld [vmem:[#allocation2 + $0x254] ss:$36 sps:$4 sm:$0xff]  }
  0x8c   :  { %3009 = vmatprep.subr.bf16.mxu0 %v5627_v0  ;;  %4675 = vmatpush1.bf16.msra.mxu1 %v5723_v18  ;;  %v5115_v18 = vld [vmem:[#allocation2 + $0x14] ss:$36 sps:$4 sm:$0xff]  }
  0x8d   :  { %4660 = vmatprep.subr.bf16.mxu1 %v5627_v0 }
  0x8f   :  { %3010 = vmatpush1.bf16.msra.mxu0 %v5086_v1  ;;  %v5167_v1 = vld [vmem:[#allocation2 + $0x480] ss:$36 sps:$4 sm:$0xff]  }
  0x90   :  { %3011 = vmatprep.subr.bf16.mxu0 %v5627_v0  ;;  %4676 = vmatpush1.bf16.msra.mxu1 %v5728_v22  ;;  %v5118_v22 = vld [vmem:[#allocation2 + $0x28c] ss:$36 sps:$4 sm:$0xff]  }
  0x91   :  { %2486 = vmatmul.mubr.bf16.gmra.mrb[20].mxu1 %v5091_v2  ;;  %4661 = vmatprep.subr.bf16.mxu1 %v5627_v0  ;;  %v5168_v2 = vld [vmem:[#allocation2 + $0x250] ss:$36 sps:$4 sm:$0xff]  }
  0x92   :  { %2775 = vmatmul.mubr.bf16.gmra.mrb[20].mxu0 %v5092_v3  ;;  %2493 = vmatprep.mubr.bf16.mxu1 %v5095_v4  ;;  %v5170_v3 = vld [vmem:[#allocation2 + $0x4cc] ss:$36 sps:$4 sm:$0xff]   ;;  %v5172_v4 = vld [vmem:[#allocation2 + $0x29c] ss:$36 sps:$4 sm:$0xff]  }
  0x93   :  { %3012 = vmatpush1.bf16.msra.mxu0 %v5093_v5  ;;  %2782 = vmatprep.mubr.bf16.mxu0 %v5097_v6  ;;  %v5823_v5 = vld [vmem:[#allocation5 + $0x200] sm:$0xff]   ;;  %v5174_v6 = vld [vmem:[#allocation2 + $0x4c8] ss:$36 sps:$4 sm:$0xff]  }
  0x94   :  { %3013 = vmatprep.subr.bf16.mxu0 %v5627_v0  ;;  %4677 = vmatpush1.bf16.msra.mxu1 %v5733_v24  ;;  %v5120_v24 = vld [vmem:[#allocation2 + $0x5c] ss:$36 sps:$4 sm:$0xff]  }
  0x95   :  { %4662 = vmatprep.subr.bf16.mxu1 %v5627_v0 }
  0x97   :  { %3014 = vmatpush1.bf16.msra.mxu0 %v5094_v7  ;;  %v5175_v7 = vld [vmem:[#allocation2 + $0x298] ss:$36 sps:$4 sm:$0xff]  }
  0x98   :  { %3015 = vmatprep.subr.bf16.mxu0 %v5627_v0  ;;  %4678 = vmatpush1.bf16.msra.mxu1 %v5738_v26  ;;  %v5130_v26 = vld [vmem:[#allocation5 + $0x188] sm:$0xff]  }
  0x99   :  { %2494 = vmatmul.mubr.bf16.gmra.mrb[24].mxu1 %v5099_v8  ;;  %4663 = vmatprep.subr.bf16.mxu1 %v5627_v0  ;;  %v5176_v8 = vld [vmem:[#allocation2 + $0x514] ss:$36 sps:$4 sm:$0xff]  }
  0x9a   :  { %2783 = vmatmul.mubr.bf16.gmra.mrb[24].mxu0 %v5100_v9  ;;  %2501 = vmatprep.mubr.bf16.mxu1 %v5103_v11  ;;  %v5274_v9 = vld [vmem:[#allocation5 + $0x1e0] sm:$0xff]   ;;  %v5180_v11 = vld [vmem:[#allocation2 + $0x510] ss:$36 sps:$4 sm:$0xff]  }
  0x9b   :  { %3016 = vmatpush1.bf16.msra.mxu0 %v5101_v10  ;;  %2790 = vmatprep.mubr.bf16.mxu0 %v5105_v12  ;;  %v5178_v10 = vld [vmem:[#allocation2 + $0x2e4] ss:$36 sps:$4 sm:$0xff]  }
  0x9c   :  { %3017 = vmatprep.subr.bf16.mxu0 %v5627_v0  ;;  %4679 = vmatpush1.bf16.msra.mxu1 %v5743_v28  ;;  %v5124_v28 = vld [vmem:[#allocation2 + $0x2d4] ss:$36 sps:$4 sm:$0xff]   ;;  %v5181_v12 = vld [vmem:[#allocation2 + $0x2e0] ss:$36 sps:$4 sm:$0xff]  }
  0x9d   :  { %4664 = vmatprep.subr.bf16.mxu1 %v5627_v0 }
  0x9f   :  { %3018 = vmatpush1.bf16.msra.mxu0 %v5102_v13  ;;  %v5183_v13 = vld [vmem:[#allocation2 + $0x55c] ss:$36 sps:$4 sm:$0xff]  }
  0xa0   :  { %3019 = vmatprep.subr.bf16.mxu0 %v5627_v0  ;;  %4680 = vmatpush1.bf16.msra.mxu1 %v5748_v30  ;;  %v5143_v30 = vld [vmem:[#allocation5 + $0x190] sm:$0xff]  }
  0xa1   :  { %2502 = vmatmul.mubr.bf16.gmra.mrb[28].mxu1 %v5107_v14  ;;  %4665 = vmatprep.subr.bf16.mxu1 %v5627_v0  ;;  %v5185_v14 = vld [vmem:[#allocation2 + $0x32c] ss:$36 sps:$4 sm:$0xff]  }
  0xa2   :  { %2791 = vmatmul.mubr.bf16.gmra.mrb[28].mxu0 %v5108_v15  ;;  %2509 = vmatprep.mubr.bf16.mxu1 %v5111_v16  ;;  %v5287_v15 = vld [vmem:[#allocation5 + $0x1e8] sm:$0xff]   ;;  %v5187_v16 = vld [vmem:[#allocation2 + $0x558] ss:$36 sps:$4 sm:$0xff]  }
  0xa3   :  { %3020 = vmatpush1.bf16.msra.mxu0 %v5109_v17  ;;  %3023 = vmatprep.mubr.bf16.mxu0 %v5115_v18  ;;  %v5188_v17 = vld [vmem:[#allocation2 + $0x328] ss:$36 sps:$4 sm:$0xff]  }
  0xa4   :  { %3021 = vmatprep.subr.bf16.mxu0 %v5627_v0  ;;  %4681 = vmatpush1.bf16.msra.mxu1 %v5753_v32  ;;  %v5156_v32 = vld [vmem:[#allocation5 + $0x198] sm:$0xff]   ;;  %v5189_v18 = vld [vmem:[#allocation2 + $0x5a4] ss:$36 sps:$4 sm:$0xff]  }
  0xa5   :  { %4666 = vmatprep.subr.bf16.mxu1 %v5627_v0 }
  0xa7   :  { %3022 = vmatpush1.bf16.msra.mxu0 %v5110_v19  ;;  %v5191_v19 = vld [vmem:[#allocation2 + $0x374] ss:$36 sps:$4 sm:$0xff]  }
  0xa8   :  { %3280 = vmatprep.subr.bf16.mxu0 %v5627_v0  ;;  %4682 = vmatpush1.bf16.msra.mxu1 %v5758_v34  ;;  %v5131_v34 = vld [vmem:[#allocation2 + $0x31c] ss:$36 sps:$4 sm:$0xff]  }
  0xa9   :  { %2510 = vmatmul.mubr.bf16.gmra.mrb[32].mxu1 %v5116_v20  ;;  %4571 = vmatprep.subr.bf16.mxu1 %v5823_v5  ;;  %v5193_v20 = vld [vmem:[#allocation2 + $0x5a0] ss:$36 sps:$4 sm:$0xff]  }
  0xaa   :  { %3024 = vmatmul.mubr.bf16.vlgmr.msra.gmra.mrb[0].mxu0 %v5113_v21  ;;  %2517 = vmatprep.mubr.bf16.mxu1 %v5118_v22  ;;  %v5194_v21 = vld [vmem:[#allocation2 + $0x370] ss:$36 sps:$4 sm:$0xff]  }
  0xab   :  { %3281 = vmatpush1.bf16.msra.mxu0 %v5117_v23  ;;  %3031 = vmatprep.mubr.bf16.mxu0 %v5120_v24  ;;  %v5196_v22 = vld [vmem:[#allocation2 + $0x5ec] ss:$36 sps:$4 sm:$0xff]   ;;  %v5198_v23 = vld [vmem:[#allocation2 + $0x3bc] ss:$36 sps:$4 sm:$0xff]  }
  0xac   :  { %3282 = vmatprep.subr.bf16.mxu0 %v5627_v0  ;;  %v5301_v24 = vld [vmem:[#allocation5 + $0x1f0] sm:$0xff]  }
  0xaf   :  { %3283 = vmatpush1.bf16.msra.mxu0 %v5130_v26  ;;  %v5201_v26 = vld [vmem:[#allocation2 + $0x3b8] ss:$36 sps:$4 sm:$0xff]  }
  0xb0   :  { %3284 = vmatprep.subr.bf16.mxu0 %v5627_v0 }
  0xb1   :  { %2518 = vmatmul.mubr.bf16.gmra.mrb[36].mxu1 %v5122_v25  ;;  %v5200_v25 = vld [vmem:[#allocation2 + $0x5e8] ss:$36 sps:$4 sm:$0xff]  }
  0xb2   :  { %3032 = vmatmul.mubr.bf16.gmra.mrb[4].mxu0 %v5123_v27  ;;  %2525 = vmatprep.mubr.bf16.mxu1 %v5124_v28  ;;  %v5202_v27 = vld [vmem:[#allocation2 + $0x634] ss:$36 sps:$4 sm:$0xff]   ;;  %v5204_v28 = vld [vmem:[#allocation2 + $0x404] ss:$36 sps:$4 sm:$0xff]  }
  0xb3   :  { %3039 = vmatprep.mubr.bf16.mxu0 %v5126_v29  ;;  %3285 = vmatpush1.bf16.msra.mxu0 %v5143_v30  ;;  %v5206_v29 = vld [vmem:[#allocation2 + $0x630] ss:$36 sps:$4 sm:$0xff]   ;;  %v5207_v30 = vld [vmem:[#allocation2 + $0x400] ss:$36 sps:$4 sm:$0xff]  }
  0xb4   :  { %3286 = vmatprep.subr.bf16.mxu0 %v5627_v0 }
  0xb7   :  { %3287 = vmatpush1.bf16.msra.mxu0 %v5156_v32  ;;  %v5211_v32 = vld [vmem:[#allocation2 + $0x44c] ss:$36 sps:$4 sm:$0xff]  }
  0xb8   :  { %3288 = vmatprep.subr.bf16.mxu0 %v5627_v0 }
  0xb9   :  { %2526 = vmatmul.mubr.bf16.gmra.mrb[40].mxu1 %v5128_v31  ;;  %v5209_v31 = vld [vmem:[#allocation2 + $0x67c] ss:$36 sps:$4 sm:$0xff]  }
  0xba   :  { %3040 = vmatmul.mubr.bf16.gmra.mrb[8].mxu0 %v5129_v33  ;;  %2533 = vmatprep.mubr.bf16.mxu1 %v5131_v34  ;;  %v5315_v33 = vld [vmem:[#allocation5 + $0x1f8] sm:$0xff]  }
  0xbb   :  { %3047 = vmatprep.mubr.bf16.mxu0 %v5133_v35  ;;  %3289 = vmatpush1.bf16.msra.mxu0 %v5169_v36  ;;  %v5213_v34 = vld [vmem:[#allocation2 + $0x678] ss:$36 sps:$4 sm:$0xff]   ;;  %v5214_v35 = vld [vmem:[#allocation2 + $0x448] ss:$36 sps:$4 sm:$0xff]  }
  0xbc   :  { %3290 = vmatprep.subr.bf16.mxu0 %v5627_v0  ;;  %v5217_v36 = vld [vmem:[#allocation2 + $0x494] ss:$36 sps:$4 sm:$0xff]  }
  0xbf   :  { %3291 = vmatpush1.bf16.msra.mxu0 %v5182_v37  ;;  %v5219_v37 = vld [vmem:[#allocation2 + $0x6c0] ss:$36 sps:$4 sm:$0xff]  }
  0xc0   :  { %3292 = vmatprep.subr.bf16.mxu0 %v5627_v0 }
  0xc1   :  { %2534 = vmatmul.mubr.bf16.gmra.mrb[44].mxu1 %v5135_v38  ;;  %v5220_v38 = vld [vmem:[#allocation2 + $0x490] ss:$36 sps:$4 sm:$0xff]  }
  0xc2   :  { %3048 = vmatmul.mubr.bf16.gmra.mrb[12].mxu0 %v5136_v39  ;;  %2541 = vmatprep.mubr.bf16.mxu1 %v5137_v40  ;;  %v5222_v39 = vld [vmem:[#allocation2 + $0x70c] ss:$36 sps:$4 sm:$0xff]   ;;  %v5224_v40 = vld [vmem:[#allocation2 + $0x4dc] ss:$36 sps:$4 sm:$0xff]  }
  0xc3   :  { %3055 = vmatprep.mubr.bf16.mxu0 %v5139_v41  ;;  %3293 = vmatpush1.bf16.msra.mxu0 %v5195_v42  ;;  %v5226_v41 = vld [vmem:[#allocation2 + $0x708] ss:$36 sps:$4 sm:$0xff]   ;;  %v5227_v42 = vld [vmem:[#allocation2 + $0x4d8] ss:$36 sps:$4 sm:$0xff]  }
  0xc4   :  { %3294 = vmatprep.subr.bf16.mxu0 %v5627_v0 }
  0xc7   :  { %3295 = vmatpush1.bf16.msra.mxu0 %v5208_v43  ;;  %v5228_v43 = vld [vmem:[#allocation2 + $0x754] ss:$36 sps:$4 sm:$0xff]  }
  0xc8   :  { %3296 = vmatprep.subr.bf16.mxu0 %v5627_v0 }
  0xc9   :  { %2542 = vmatmul.mubr.bf16.gmra.mrb[48].mxu1 %v5141_v44  ;;  %v5230_v44 = vld [vmem:[#allocation2 + $0x524] ss:$36 sps:$4 sm:$0xff]  }
  0xca   :  { %3056 = vmatmul.mubr.bf16.gmra.mrb[16].mxu0 %v5142_v45  ;;  %2549 = vmatprep.mubr.bf16.mxu1 %v5144_v46  ;;  %v5232_v45 = vld [vmem:[#allocation2 + $0x750] ss:$36 sps:$4 sm:$0xff]   ;;  %v5233_v46 = vld [vmem:[#allocation2 + $0x520] ss:$36 sps:$4 sm:$0xff]  }
  0xcb   :  { %3063 = vmatprep.mubr.bf16.mxu0 %v5146_v47  ;;  %3297 = vmatpush1.bf16.msra.mxu0 %v5221_v48  ;;  %v5235_v47 = vld [vmem:[#allocation2 + $0x79c] ss:$36 sps:$4 sm:$0xff]   ;;  %v5237_v48 = vld [vmem:[#allocation2 + $0x56c] ss:$36 sps:$4 sm:$0xff]  }
  0xcc   :  { %3298 = vmatprep.subr.bf16.mxu0 %v5627_v0 }
  0xcf   :  { %3299 = vmatpush1.bf16.msra.mxu0 %v5234_v49 }
  0xd0   :  { %3300 = vmatprep.subr.bf16.mxu0 %v5627_v0 }
  0xd1   :  { %2550 = vmatmul.mubr.bf16.gmra.mrb[52].mxu1 %v5148_v50 }
  0xd2   :  { %3064 = vmatmul.mubr.bf16.gmra.mrb[20].mxu0 %v5149_v51  ;;  %2557 = vmatprep.mubr.bf16.mxu1 %v5150_v52  ;;  %v5239_v51 = vld [vmem:[#allocation2 + $0x798] ss:$36 sps:$4 sm:$0xff]  }
  0xd3   :  { %3071 = vmatprep.mubr.bf16.mxu0 %v5152_v53  ;;  %3301 = vmatpush1.bf16.msra.mxu0 %v5247_v54  ;;  %v5240_v53 = vld [vmem:[#allocation2 + $0x568] ss:$36 sps:$4 sm:$0xff]  }
  0xd4   :  { %3302 = vmatprep.subr.bf16.mxu0 %v5627_v0  ;;  %v5241_v54 = vld [vmem:[#allocation2 + $0x7e4] ss:$36 sps:$4 sm:$0xff]  }
  0xd7   :  { %3303 = vmatpush1.bf16.msra.mxu0 %v5260_v62  ;;  %v5248_v62 = vld [vmem:[#allocation2 + $0x82c] ss:$36 sps:$4 sm:$0xff]  }
  0xd8   :  { %3304 = vmatprep.subr.bf16.mxu0 %v5627_v0 }
  0xd9   :  { %2558 = vmatmul.mubr.bf16.gmra.mrb[56].mxu1 %v5154_v55 }
  0xda   :  { %3072 = vmatmul.mubr.bf16.gmra.mrb[24].mxu0 %v5155_v56  ;;  %2565 = vmatprep.mubr.bf16.mxu1 %v5157_v57  ;;  %v5243_v56 = vld [vmem:[#allocation2 + $0x5b4] ss:$36 sps:$4 sm:$0xff]  }
  0xdb   :  { %3079 = vmatprep.mubr.bf16.mxu0 %v5159_v58  ;;  %3305 = vmatpush1.bf16.msra.mxu0 %v5274_v9 }
  0xdc   :  { %3306 = vmatprep.subr.bf16.mxu0 %v5627_v0 }
  0xdf   :  { %3307 = vmatpush1.bf16.msra.mxu0 %v5287_v15  ;;  %v5259_v15 = vld [vmem:[#allocation2 + $0x640] ss:$36 sps:$4 sm:$0xff]  }
  0xe0   :  { %3308 = vmatprep.subr.bf16.mxu0 %v5627_v0 }
  0xe1   :  { %2566 = vmatmul.mubr.bf16.gmra.mrb[60].mxu1 %v5161_v59  ;;  %v5245_v59 = vld [vmem:[#allocation2 + $0x7e0] ss:$36 sps:$4 sm:$0xff]  }
  0xe2   :  { %3080 = vmatmul.mubr.bf16.gmra.mrb[28].mxu0 %v5162_v60  ;;  %2573 = vmatprep.mubr.bf16.mxu1 %v5163_v61  ;;  %v5246_v61 = vld [vmem:[#allocation2 + $0x5b0] ss:$36 sps:$4 sm:$0xff]  }
  0xe3   :  { %3087 = vmatprep.mubr.bf16.mxu0 %v5165_v63  ;;  %3309 = vmatpush1.bf16.msra.mxu0 %v5301_v24  ;;  %v5269_v24 = vld [vmem:[#allocation2 + $0x24c] ss:$36 sps:$4 sm:$0xff]  }
  0xe4   :  { %3310 = vmatprep.subr.bf16.mxu0 %v5627_v0  ;;  %v5215_v0 = vld [vmem:[#allocation2 + $0x6c4] ss:$36 sps:$4 sm:$0xff]  }
  0xe7   :  { %3311 = vmatpush1.bf16.msra.mxu0 %v5315_v33  ;;  %v5275_v33 = vld [vmem:[#allocation2 + $0x294] ss:$36 sps:$4 sm:$0xff]  }
  0xe9   :  { %2574 = vmatmul.mubr.bf16.gmra.mrb[64].mxu1 %v5167_v1  ;;  %v5250_v1 = vld [vmem:[#allocation2 + $0x5fc] ss:$36 sps:$4 sm:$0xff]  }
  0xea   :  { %3088 = vmatmul.mubr.bf16.gmra.mrb[32].mxu0 %v5168_v2  ;;  %2581 = vmatprep.mubr.bf16.mxu1 %v5170_v3 }
  0xeb   :  { %3095 = vmatprep.mubr.bf16.mxu0 %v5172_v4  ;;  %v5252_v4 = vld [vmem:[#allocation2 + $0x828] ss:$36 sps:$4 sm:$0xff]  }
  0xf1   :  { %2582 = vmatmul.mubr.bf16.gmra.mrb[68].mxu1 %v5174_v6 }
  0xf2   :  { %3096 = vmatmul.mubr.bf16.gmra.mrb[36].mxu0 %v5175_v7  ;;  %2589 = vmatprep.mubr.bf16.mxu1 %v5176_v8  ;;  %v5253_v7 = vld [vmem:[#allocation2 + $0x5f8] ss:$36 sps:$4 sm:$0xff]  }
  0xf3   :  { %3103 = vmatprep.mubr.bf16.mxu0 %v5178_v10  ;;  %v5254_v8 = vld [vmem:[#allocation2 + $0x874] ss:$36 sps:$4 sm:$0xff]   ;;  %v5256_v10 = vld [vmem:[#allocation2 + $0x644] ss:$36 sps:$4 sm:$0xff]  }
  0xf9   :  { %2590 = vmatmul.mubr.bf16.gmra.mrb[72].mxu1 %v5180_v11 }
  0xfa   :  { %3104 = vmatmul.mubr.bf16.gmra.mrb[40].mxu0 %v5181_v12  ;;  %2597 = vmatprep.mubr.bf16.mxu1 %v5183_v13  ;;  %v5258_v13 = vld [vmem:[#allocation2 + $0x870] ss:$36 sps:$4 sm:$0xff]  }
  0xfb   :  { %3111 = vmatprep.mubr.bf16.mxu0 %v5185_v14 }
 0x101   :  { %2598 = vmatmul.mubr.bf16.gmra.mrb[76].mxu1 %v5187_v16  ;;  %v5261_v16 = vld [vmem:[#allocation2 + $0x8bc] ss:$36 sps:$4 sm:$0xff]  }
 0x102   :  { %3112 = vmatmul.mubr.bf16.gmra.mrb[44].mxu0 %v5188_v17  ;;  %2605 = vmatprep.mubr.bf16.mxu1 %v5189_v18  ;;  %v5263_v18 = vld [vmem:[#allocation2 + $0x68c] ss:$36 sps:$4 sm:$0xff]  }
 0x103   :  { %3119 = vmatprep.mubr.bf16.mxu0 %v5191_v19 }
 0x109   :  { %2606 = vmatmul.mubr.bf16.gmra.mrb[80].mxu1 %v5193_v20 }
 0x10a   :  { %3120 = vmatmul.mubr.bf16.gmra.mrb[48].mxu0 %v5194_v21  ;;  %2613 = vmatprep.mubr.bf16.mxu1 %v5196_v22  ;;  %v5265_v21 = vld [vmem:[#allocation2 + $0x8b8] ss:$36 sps:$4 sm:$0xff]  }
 0x10b   :  { %3127 = vmatprep.mubr.bf16.mxu0 %v5198_v23  ;;  %v5266_v23 = vld [vmem:[#allocation2 + $0x688] ss:$36 sps:$4 sm:$0xff]  }
 0x111   :  { %2614 = vmatmul.mubr.bf16.gmra.mrb[84].mxu1 %v5200_v25 }
 0x112   :  { %3128 = vmatmul.mubr.bf16.gmra.mrb[52].mxu0 %v5201_v26  ;;  %2621 = vmatprep.mubr.bf16.mxu1 %v5202_v27  ;;  %v5270_v26 = vld [vmem:[#allocation2 + $0x6d4] ss:$36 sps:$4 sm:$0xff]  }
 0x113   :  { %3135 = vmatprep.mubr.bf16.mxu0 %v5204_v28 }
 0x119   :  { %2622 = vmatmul.mubr.bf16.gmra.mrb[88].mxu1 %v5206_v29  ;;  %v5267_v29 = vld [vmem:[#allocation2 + $0x248] ss:$36 sps:$4 sm:$0xff]  }
 0x11a   :  { %3136 = vmatmul.mubr.bf16.gmra.mrb[56].mxu0 %v5207_v30  ;;  %2629 = vmatprep.mubr.bf16.mxu1 %v5209_v31  ;;  %v5272_v31 = vld [vmem:[#allocation2 + $0x6d0] ss:$36 sps:$4 sm:$0xff]  }
 0x11b   :  { %3143 = vmatprep.mubr.bf16.mxu0 %v5211_v32 }
 0x121   :  { %2630 = vmatmul.mubr.bf16.gmra.mrb[92].mxu1 %v5213_v34  ;;  %v5277_v34 = vld [vmem:[#allocation2 + $0x71c] ss:$36 sps:$4 sm:$0xff]  }
 0x122   :  { %3144 = vmatmul.mubr.bf16.gmra.mrb[60].mxu0 %v5214_v35  ;;  %2637 = vmatprep.mubr.bf16.mxu1 %v5215_v0  ;;  %v5294_v35 = vld [vmem:[#allocation5 + $0x208] sm:$0xff]   ;;  %v5314_v0 = vld [vmem:[#allocation5 + $0x210] sm:$0xff]  }
 0x123   :  { %3151 = vmatprep.mubr.bf16.mxu0 %v5217_v36 }
 0x129   :  { %2638 = vmatmul.mubr.bf16.gmra.mrb[96].mxu1 %v5219_v37 }
 0x12a   :  { %3152 = vmatmul.mubr.bf16.gmra.mrb[64].mxu0 %v5220_v38  ;;  %2645 = vmatprep.mubr.bf16.mxu1 %v5222_v39  ;;  %v5279_v38 = vld [vmem:[#allocation2 + $0x290] ss:$36 sps:$4 sm:$0xff]  }
 0x12b   :  { %3159 = vmatprep.mubr.bf16.mxu0 %v5224_v40  ;;  %v5280_v40 = vld [vmem:[#allocation2 + $0x718] ss:$36 sps:$4 sm:$0xff]  }
 0x131   :  { %2646 = vmatmul.mubr.bf16.gmra.mrb[100].mxu1 %v5226_v41  ;;  %v5281_v41 = vld [vmem:[#allocation2 + $0x2dc] ss:$36 sps:$4 sm:$0xff]  }
 0x132   :  { %3160 = vmatmul.mubr.bf16.gmra.mrb[68].mxu0 %v5227_v42  ;;  %2653 = vmatprep.mubr.bf16.mxu1 %v5228_v43  ;;  %v5283_v43 = vld [vmem:[#allocation2 + $0x764] ss:$36 sps:$4 sm:$0xff]  }
 0x133   :  { %3167 = vmatprep.mubr.bf16.mxu0 %v5230_v44  ;;  %v5334_v44 = vld [vmem:[#allocation5 + $0x218] sm:$0xff]  }
 0x139   :  { %2654 = vmatmul.mubr.bf16.gmra.mrb[104].mxu1 %v5232_v45  ;;  %v5353_v45 = vld [vmem:[#allocation5 + $0x220] sm:$0xff]  }
 0x13a   :  { %3168 = vmatmul.mubr.bf16.gmra.mrb[72].mxu0 %v5233_v46  ;;  %2661 = vmatprep.mubr.bf16.mxu1 %v5235_v47  ;;  %v5285_v47 = vld [vmem:[#allocation2 + $0x2d8] ss:$36 sps:$4 sm:$0xff]  }
 0x13b   :  { %3175 = vmatprep.mubr.bf16.mxu0 %v5237_v48 }
 0x13c   :  { %v5829_v49 = vpop.f32.mrb[0].mxu1 }
 0x13d   :  { %v2449_v50 = vpop.f32.mrb[1].mxu1 }
 0x13e   :  { %v5831_v52 = vpop.f32.mrb[2].mxu1  ;;  %v5286_v50 = vld [vmem:[#allocation2 + $0x760] ss:$36 sps:$4 sm:$0xff]  }
 0x13f   :  { %v2452_v55 = vpop.f32.mrb[3].mxu1 }
 0x140   :  { %v5372_v55 = vld [vmem:[#allocation5 + $0x228] sm:$0xff]  }
 0x141   :  { %2662 = vmatmul.mubr.bf16.gmra.mrb[108].mxu1 %v5239_v51  ;;  %v5288_v51 = vld [vmem:[#allocation2 + $0x324] ss:$36 sps:$4 sm:$0xff]  }
 0x142   :  { %3176 = vmatmul.mubr.bf16.gmra.mrb[76].mxu0 %v5240_v53  ;;  %2669 = vmatprep.mubr.bf16.mxu1 %v5241_v54  ;;  %v5290_v54 = vld [vmem:[#allocation2 + $0x7ac] ss:$36 sps:$4 sm:$0xff]  }
 0x143   :  { %3183 = vmatprep.mubr.bf16.mxu0 %v5243_v56  ;;  %v5391_v56 = vld [vmem:[#allocation5 + $0x230] sm:$0xff]  }
 0x144   :  { %v5833_v57 = vpop.f32.mrb[4].mxu1 }
 0x145   :  { %v2457_v58 = vpop.f32.mrb[5].mxu1 }
 0x146   :  { %v5835_v60 = vpop.f32.mrb[6].mxu1  ;;  %v5292_v58 = vld [vmem:[#allocation2 + $0x320] ss:$36 sps:$4 sm:$0xff]  }
 0x147   :  { %v2460_v63 = vpop.f32.mrb[7].mxu1 }
 0x148   :  { %v5299_v63 = vld [vmem:[#allocation2 + $0x368] ss:$36 sps:$4 sm:$0xff]  }
 0x149   :  { %2670 = vmatmul.mubr.bf16.gmra.mrb[112].mxu1 %v5245_v59  ;;  %v5293_v59 = vld [vmem:[#allocation2 + $0x7a8] ss:$36 sps:$4 sm:$0xff]  }
 0x14a   :  { %3184 = vmatmul.mubr.bf16.gmra.mrb[80].mxu0 %v5246_v61  ;;  %2677 = vmatprep.mubr.bf16.mxu1 %v5248_v62  ;;  %v5295_v61 = vld [vmem:[#allocation2 + $0x36c] ss:$36 sps:$4 sm:$0xff]   ;;  %v5297_v62 = vld [vmem:[#allocation2 + $0x7f4] ss:$36 sps:$4 sm:$0xff]  }
 0x14b   :  { %3191 = vmatprep.mubr.bf16.mxu0 %v5250_v1  ;;  %v5300_v1 = vld [vmem:[#allocation2 + $0x7f0] ss:$36 sps:$4 sm:$0xff]  }
 0x14c   :  { %v5837_v2 = vpop.f32.mrb[8].mxu1 }
 0x14d   :  { %v2465_v3 = vpop.f32.mrb[9].mxu1 }
 0x14e   :  { %v5839_v6 = vpop.f32.mrb[10].mxu1  ;;  %v5302_v3 = vld [vmem:[#allocation2 + $0x3b4] ss:$36 sps:$4 sm:$0xff]  }
 0x14f   :  { %v2468_v9 = vpop.f32.mrb[11].mxu1 }
 0x150   :  { %v5308_v9 = vld [vmem:[#allocation2 + $0x3fc] ss:$36 sps:$4 sm:$0xff]  }
 0x151   :  { %2678 = vmatmul.mubr.bf16.gmra.mrb[116].mxu1 %v5252_v4  ;;  %v5304_v4 = vld [vmem:[#allocation2 + $0x83c] ss:$36 sps:$4 sm:$0xff]  }
 0x152   :  { %3192 = vmatmul.mubr.bf16.gmra.mrb[84].mxu0 %v5253_v7  ;;  %2685 = vmatprep.mubr.bf16.mxu1 %v5254_v8  ;;  %v5306_v7 = vld [vmem:[#allocation2 + $0x3b0] ss:$36 sps:$4 sm:$0xff]   ;;  %v5307_v8 = vld [vmem:[#allocation2 + $0x838] ss:$36 sps:$4 sm:$0xff]  }
 0x153   :  { %3199 = vmatprep.mubr.bf16.mxu0 %v5256_v10  ;;  %v5310_v10 = vld [vmem:[#allocation2 + $0x884] ss:$36 sps:$4 sm:$0xff]  }
 0x154   :  { %v5841_v11 = vpop.f32.mrb[12].mxu1 }
 0x155   :  { %v2473_v12 = vpop.f32.mrb[13].mxu1 }
 0x156   :  { %v5843_v14 = vpop.f32.mrb[14].mxu1  ;;  %v5410_v12 = vld [vmem:[#allocation5 + $0x238] sm:$0xff]  }
 0x157   :  { %v2476_v17 = vpop.f32.mrb[15].mxu1 }
 0x158   :  { %v5318_v17 = vld [vmem:[#allocation2 + $0x8cc] ss:$36 sps:$4 sm:$0xff]  }
 0x159   :  { %2686 = vmatmul.mubr.bf16.gmra.mrb[120].mxu1 %v5258_v13  ;;  %v5312_v13 = vld [vmem:[#allocation2 + $0x3f8] ss:$36 sps:$4 sm:$0xff]  }
 0x15a   :  { %3200 = vmatmul.mubr.bf16.gmra.mrb[88].mxu0 %v5259_v15  ;;  %2693 = vmatprep.mubr.bf16.mxu1 %v5261_v16  ;;  %v5313_v15 = vld [vmem:[#allocation2 + $0x880] ss:$36 sps:$4 sm:$0xff]  }
 0x15b   :  { %3207 = vmatprep.mubr.bf16.mxu0 %v5263_v18  ;;  %v5316_v16 = vld [vmem:[#allocation2 + $0x444] ss:$36 sps:$4 sm:$0xff]  }
 0x15c   :  { %v5845_v19 = vpop.f32.mrb[16].mxu1  ;;  %v5320_v18 = vld [vmem:[#allocation2 + $0x440] ss:$36 sps:$4 sm:$0xff]  }
 0x15d   :  { %v2481_v20 = vpop.f32.mrb[17].mxu1 }
 0x15e   :  { %v5847_v22 = vpop.f32.mrb[18].mxu1  ;;  %v5321_v20 = vld [vmem:[#allocation2 + $0x8c8] ss:$36 sps:$4 sm:$0xff]  }
 0x15f   :  { %v2484_v25 = vpop.f32.mrb[19].mxu1 }
 0x160   :  { %v5324_v25 = vld [vmem:[#allocation2 + $0x18] ss:$36 sps:$4 sm:$0xff]  }
 0x161   :  { %2694 = vmatmul.mubr.bf16.gmra.mrb[124].mxu1 %v5265_v21  ;;  %v5322_v21 = vld [vmem:[#allocation2 + $0x48c] ss:$36 sps:$4 sm:$0xff]  }
 0x162   :  { %3208 = vmatmul.mubr.bf16.gmra.mrb[92].mxu0 %v5266_v23  ;;  %2798 = vmatprep.mubr.bf16.mxu1 %v5269_v24  ;;  %v5326_v23 = vld [vmem:[#allocation2 + $0x1c] ss:$36 sps:$4 sm:$0xff]   ;;  %v5327_v24 = vld [vmem:[#allocation2 + $0x488] ss:$36 sps:$4 sm:$0xff]  }
 0x163   :  { %3215 = vmatprep.mubr.bf16.mxu0 %v5270_v26  ;;  %v5328_v26 = vld [vmem:[#allocation2 + $0x4d4] ss:$36 sps:$4 sm:$0xff]  }
 0x164   :  { %v5849_v27 = vpop.f32.mrb[20].mxu1 }
 0x165   :  { %v2489_v28 = vpop.f32.mrb[21].mxu1 }
 0x166   :  { %v5851_v30 = vpop.f32.mrb[22].mxu1  ;;  %v5330_v28 = vld [vmem:[#allocation2 + $0x64] ss:$36 sps:$4 sm:$0xff]  }
 0x167   :  { %v2492_v32 = vpop.f32.mrb[23].mxu1 }
 0x168   :  { %v5335_v32 = vld [vmem:[#allocation2 + $0x51c] ss:$36 sps:$4 sm:$0xff]  }
 0x169   :  { %2799 = vmatmul.mubr.bf16.vlgmr.msra.gmra.mrb[32].mxu1 %v5267_v29  ;;  %v5332_v29 = vld [vmem:[#allocation2 + $0x4d0] ss:$36 sps:$4 sm:$0xff]  }
 0x16a   :  { %3216 = vmatmul.mubr.bf16.gmra.mrb[96].mxu0 %v5272_v31  ;;  %4572 = vmatpush3.bf16.msra.mxu1 %v5823_v5  ;;  %v5333_v31 = vld [vmem:[#allocation2 + $0x60] ss:$36 sps:$4 sm:$0xff]  }
 0x16b   :  { %2806 = vmatprep.mubr.bf16.mxu1 %v5275_v33  ;;  %3223 = vmatprep.mubr.bf16.mxu0 %v5277_v34  ;;  %v5337_v33 = vld [vmem:[#allocation2 + $0xac] ss:$36 sps:$4 sm:$0xff]   ;;  %v5339_v34 = vld [vmem:[#allocation2 + $0x518] ss:$36 sps:$4 sm:$0xff]  }
 0x16c   :  { %v5854_v36 = vpop.f32.mrb[24].mxu1  ;;  %4573 = vmatprep.subr.bf16.mxu1 %v5294_v35 }
 0x16d   :  { %v2497_v37 = vpop.f32.mrb[25].mxu1 }
 0x16e   :  { %v5856_v39 = vpop.f32.mrb[26].mxu1  ;;  %4574 = vmatpush3.bf16.msra.mxu1 %v5294_v35  ;;  %v5340_v35 = vld [vmem:[#allocation2 + $0xa8] ss:$36 sps:$4 sm:$0xff]   ;;  %v5343_v37 = vld [vmem:[#allocation2 + $0xf4] ss:$36 sps:$4 sm:$0xff]  }
 0x16f   :  { %v2500_v42 = vpop.f32.mrb[27].mxu1  ;;  %4575 = vmatprep.subr.bf16.mxu1 %v5314_v0 }
 0x170   :  { %v5349_v42 = vld [vmem:[#allocation2 + $0x13c] ss:$36 sps:$4 sm:$0xff]  }
 0x171   :  { %2807 = vmatmul.mubr.bf16.gmra.mrb[36].mxu1 %v5279_v38  ;;  %v5345_v38 = vld [vmem:[#allocation2 + $0x560] ss:$36 sps:$4 sm:$0xff]  }
 0x172   :  { %3224 = vmatmul.mubr.bf16.gmra.mrb[100].mxu0 %v5280_v40  ;;  %2814 = vmatprep.mubr.bf16.mxu1 %v5281_v41  ;;  %v5346_v40 = vld [vmem:[#allocation2 + $0xf0] ss:$36 sps:$4 sm:$0xff]  }
 0x173   :  { %3231 = vmatprep.mubr.bf16.mxu0 %v5283_v43  ;;  %4576 = vmatpush3.bf16.msra.mxu1 %v5314_v0  ;;  %v5341_v0 = vld [vmem:[#allocation2 + $0x564] ss:$36 sps:$4 sm:$0xff]   ;;  %v5347_v41 = vld [vmem:[#allocation2 + $0x5ac] ss:$36 sps:$4 sm:$0xff]  }
 0x174   :  { %v5858_v5 = vpop.f32.mrb[28].mxu1  ;;  %4577 = vmatprep.subr.bf16.mxu1 %v5334_v44  ;;  %v5351_v43 = vld [vmem:[#allocation2 + $0x5a8] ss:$36 sps:$4 sm:$0xff]  }
 0x175   :  { %v2505_v46 = vpop.f32.mrb[29].mxu1 }
 0x176   :  { %v5860_v48 = vpop.f32.mrb[30].mxu1  ;;  %v5356_v46 = vld [vmem:[#allocation2 + $0x184] ss:$36 sps:$4 sm:$0xff]  }
 0x177   :  { %v2508_v53 = vpop.f32.mrb[31].mxu1  ;;  %4578 = vmatpush3.bf16.msra.mxu1 %v5334_v44  ;;  %v5352_v44 = vld [vmem:[#allocation2 + $0x138] ss:$36 sps:$4 sm:$0xff]  }
 0x178   :  { %4579 = vmatprep.subr.bf16.mxu1 %v5353_v45  ;;  %v5362_v53 = vld [vmem:[#allocation2 + $0x1cc] ss:$36 sps:$4 sm:$0xff]  }
 0x179   :  { %2815 = vmatmul.mubr.bf16.gmra.mrb[40].mxu1 %v5285_v47  ;;  %v5358_v47 = vld [vmem:[#allocation2 + $0x5f0] ss:$36 sps:$4 sm:$0xff]  }
 0x17a   :  { %3232 = vmatmul.mubr.bf16.gmra.mrb[104].mxu0 %v5286_v50  ;;  %2822 = vmatprep.mubr.bf16.mxu1 %v5288_v51  ;;  %v5359_v50 = vld [vmem:[#allocation2 + $0x180] ss:$36 sps:$4 sm:$0xff]  }
 0x17b   :  { %3239 = vmatprep.mubr.bf16.mxu0 %v5290_v54  ;;  %4580 = vmatpush3.bf16.msra.mxu1 %v5353_v45  ;;  %v5354_v45 = vld [vmem:[#allocation2 + $0x5f4] ss:$36 sps:$4 sm:$0xff]   ;;  %v5360_v51 = vld [vmem:[#allocation2 + $0x63c] ss:$36 sps:$4 sm:$0xff]  }
 0x17c   :  { %4581 = vmatprep.subr.bf16.mxu1 %v5372_v55  ;;  %v5364_v54 = vld [vmem:[#allocation2 + $0x638] ss:$36 sps:$4 sm:$0xff]  }
 0x17f   :  { %4582 = vmatpush3.bf16.msra.mxu1 %v5372_v55  ;;  %v5365_v55 = vld [vmem:[#allocation2 + $0x1c8] ss:$36 sps:$4 sm:$0xff]  }
 0x180   :  { %4583 = vmatprep.subr.bf16.mxu1 %v5391_v56 }
 0x181   :  { %2823 = vmatmul.mubr.bf16.gmra.mrb[44].mxu1 %v5292_v58  ;;  %v5368_v58 = vld [vmem:[#allocation2 + $0x214] ss:$36 sps:$4 sm:$0xff]  }
 0x182   :  { %3240 = vmatmul.mubr.bf16.gmra.mrb[108].mxu0 %v5293_v59  ;;  %2830 = vmatprep.mubr.bf16.mxu1 %v5295_v61  ;;  %v5370_v59 = vld [vmem:[#allocation2 + $0x680] ss:$36 sps:$4 sm:$0xff]   ;;  %v5371_v61 = vld [vmem:[#allocation2 + $0x210] ss:$36 sps:$4 sm:$0xff]  }
 0x183   :  { %3247 = vmatprep.mubr.bf16.mxu0 %v5297_v62  ;;  %4584 = vmatpush3.bf16.msra.mxu1 %v5391_v56  ;;  %v5366_v56 = vld [vmem:[#allocation2 + $0x684] ss:$36 sps:$4 sm:$0xff]   ;;  %v5373_v62 = vld [vmem:[#allocation2 + $0x6cc] ss:$36 sps:$4 sm:$0xff]  }
 0x184   :  { %4585 = vmatprep.subr.bf16.mxu1 %v5410_v12 }
 0x187   :  { %4586 = vmatpush3.bf16.msra.mxu1 %v5410_v12  ;;  %v5387_v12 = vld [vmem:[#allocation2 + $0x2ec] ss:$36 sps:$4 sm:$0xff]  }
 0x189   :  { %2831 = vmatmul.mubr.bf16.gmra.mrb[48].mxu1 %v5299_v63  ;;  %v5375_v63 = vld [vmem:[#allocation2 + $0x25c] ss:$36 sps:$4 sm:$0xff]  }
 0x18a   :  { %3248 = vmatmul.mubr.bf16.gmra.mrb[112].mxu0 %v5300_v1  ;;  %2838 = vmatprep.mubr.bf16.mxu1 %v5302_v3  ;;  %v5377_v1 = vld [vmem:[#allocation2 + $0x6c8] ss:$36 sps:$4 sm:$0xff]   ;;  %v5378_v3 = vld [vmem:[#allocation2 + $0x258] ss:$36 sps:$4 sm:$0xff]  }
 0x18b   :  { %3255 = vmatprep.mubr.bf16.mxu0 %v5304_v4  ;;  %v5379_v4 = vld [vmem:[#allocation2 + $0x714] ss:$36 sps:$4 sm:$0xff]  }
 0x191   :  { %2839 = vmatmul.mubr.bf16.gmra.mrb[52].mxu1 %v5306_v7  ;;  %v5381_v7 = vld [vmem:[#allocation2 + $0x2a4] ss:$36 sps:$4 sm:$0xff]  }
 0x192   :  { %3256 = vmatmul.mubr.bf16.gmra.mrb[116].mxu0 %v5307_v8  ;;  %2846 = vmatprep.mubr.bf16.mxu1 %v5308_v9  ;;  %v5383_v8 = vld [vmem:[#allocation2 + $0x710] ss:$36 sps:$4 sm:$0xff]   ;;  %v5384_v9 = vld [vmem:[#allocation2 + $0x2a0] ss:$36 sps:$4 sm:$0xff]  }
 0x193   :  { %3263 = vmatprep.mubr.bf16.mxu0 %v5310_v10  ;;  %v5385_v10 = vld [vmem:[#allocation2 + $0x75c] ss:$36 sps:$4 sm:$0xff]  }
 0x199   :  { %2847 = vmatmul.mubr.bf16.gmra.mrb[56].mxu1 %v5312_v13  ;;  %v5389_v13 = vld [vmem:[#allocation2 + $0x758] ss:$36 sps:$4 sm:$0xff]  }
 0x19a   :  { %3264 = vmatmul.mubr.bf16.gmra.mrb[120].mxu0 %v5313_v15  ;;  %2854 = vmatprep.mubr.bf16.mxu1 %v5316_v16  ;;  %v5390_v15 = vld [vmem:[#allocation2 + $0x2e8] ss:$36 sps:$4 sm:$0xff]  }
 0x19b   :  { %3271 = vmatprep.mubr.bf16.mxu0 %v5318_v17  ;;  %v5392_v16 = vld [vmem:[#allocation2 + $0x7a4] ss:$36 sps:$4 sm:$0xff]   ;;  %v5394_v17 = vld [vmem:[#allocation2 + $0x334] ss:$36 sps:$4 sm:$0xff]  }
 0x1a1   :  { %2855 = vmatmul.mubr.bf16.gmra.mrb[60].mxu1 %v5320_v18  ;;  %v5396_v18 = vld [vmem:[#allocation2 + $0x7a0] ss:$36 sps:$4 sm:$0xff]  }
 0x1a2   :  { %3272 = vmatmul.mubr.bf16.gmra.mrb[124].mxu0 %v5321_v20  ;;  %2862 = vmatprep.mubr.bf16.mxu1 %v5322_v21  ;;  %v5397_v20 = vld [vmem:[#allocation2 + $0x330] ss:$36 sps:$4 sm:$0xff]  }
 0x1a3   :  { %3312 = vmatprep.mubr.bf16.mxu0 %v5326_v23  ;;  %v5398_v21 = vld [vmem:[#allocation2 + $0x7ec] ss:$36 sps:$4 sm:$0xff]   ;;  %v5400_v23 = vld [vmem:[#allocation2 + $0x37c] ss:$36 sps:$4 sm:$0xff]  }
 0x1a9   :  { %2863 = vmatmul.mubr.bf16.gmra.mrb[64].mxu1 %v5327_v24  ;;  %v5402_v24 = vld [vmem:[#allocation2 + $0x7e8] ss:$36 sps:$4 sm:$0xff]  }
 0x1aa   :  { %3313 = vmatmul.mubr.bf16.vlgmr.msra.gmra.mrb[0].mxu0 %v5324_v25  ;;  %2870 = vmatprep.mubr.bf16.mxu1 %v5328_v26  ;;  %v5403_v25 = vld [vmem:[#allocation2 + $0x378] ss:$36 sps:$4 sm:$0xff]  }
 0x1ab   :  { %3320 = vmatprep.mubr.bf16.mxu0 %v5330_v28  ;;  %v5404_v26 = vld [vmem:[#allocation2 + $0x834] ss:$36 sps:$4 sm:$0xff]   ;;  %v5406_v28 = vld [vmem:[#allocation2 + $0x3c4] ss:$36 sps:$4 sm:$0xff]  }
 0x1b1   :  { %2871 = vmatmul.mubr.bf16.gmra.mrb[68].mxu1 %v5332_v29  ;;  %v5408_v29 = vld [vmem:[#allocation2 + $0x830] ss:$36 sps:$4 sm:$0xff]  }
 0x1b2   :  { %3321 = vmatmul.mubr.bf16.gmra.mrb[4].mxu0 %v5333_v31  ;;  %2878 = vmatprep.mubr.bf16.mxu1 %v5335_v32  ;;  %v5409_v31 = vld [vmem:[#allocation2 + $0x3c0] ss:$36 sps:$4 sm:$0xff]  }
 0x1b3   :  { %3328 = vmatprep.mubr.bf16.mxu0 %v5337_v33  ;;  %v5411_v32 = vld [vmem:[#allocation2 + $0x87c] ss:$36 sps:$4 sm:$0xff]   ;;  %v5413_v33 = vld [vmem:[#allocation2 + $0x40c] ss:$36 sps:$4 sm:$0xff]  }
 0x1b9   :  { %2879 = vmatmul.mubr.bf16.gmra.mrb[72].mxu1 %v5339_v34  ;;  %v5415_v34 = vld [vmem:[#allocation2 + $0x878] ss:$36 sps:$4 sm:$0xff]  }
 0x1ba   :  { %3329 = vmatmul.mubr.bf16.gmra.mrb[8].mxu0 %v5340_v35  ;;  %2886 = vmatprep.mubr.bf16.mxu1 %v5341_v0  ;;  %v5416_v35 = vld [vmem:[#allocation2 + $0x408] ss:$36 sps:$4 sm:$0xff]  }
 0x1bb   :  { %3336 = vmatprep.mubr.bf16.mxu0 %v5343_v37  ;;  %v5417_v0 = vld [vmem:[#allocation2 + $0x8c4] ss:$36 sps:$4 sm:$0xff]   ;;  %v5419_v37 = vld [vmem:[#allocation2 + $0x454] ss:$36 sps:$4 sm:$0xff]  }
 0x1c1   :  { %2887 = vmatmul.mubr.bf16.gmra.mrb[76].mxu1 %v5345_v38  ;;  %v5421_v38 = vld [vmem:[#allocation2 + $0x8c0] ss:$36 sps:$4 sm:$0xff]  }
 0x1c2   :  { %3337 = vmatmul.mubr.bf16.gmra.mrb[12].mxu0 %v5346_v40  ;;  %2894 = vmatprep.mubr.bf16.mxu1 %v5347_v41  ;;  %v5422_v40 = vld [vmem:[#allocation2 + $0x450] ss:$36 sps:$4 sm:$0xff]   ;;  %v5425_v41 = vld [vmem:[#allocation2 + $0x20] ss:$36 sps:$4 sm:$0xff]  }
 0x1c3   :  { %3344 = vmatprep.mubr.bf16.mxu0 %v5349_v42  ;;  %v5423_v42 = vld [vmem:[#allocation2 + $0x49c] ss:$36 sps:$4 sm:$0xff]  }
 0x1c9   :  { %2895 = vmatmul.mubr.bf16.gmra.mrb[80].mxu1 %v5351_v43  ;;  %v5427_v43 = vld [vmem:[#allocation2 + $0x68] ss:$36 sps:$4 sm:$0xff]  }
 0x1ca   :  { %3345 = vmatmul.mubr.bf16.gmra.mrb[16].mxu0 %v5352_v44  ;;  %2902 = vmatprep.mubr.bf16.mxu1 %v5354_v45  ;;  %v5426_v44 = vld [vmem:[#allocation2 + $0x498] ss:$36 sps:$4 sm:$0xff]   ;;  %v5430_v45 = vld [vmem:[#allocation2 + $0xb0] ss:$36 sps:$4 sm:$0xff]  }
 0x1cb   :  { %3352 = vmatprep.mubr.bf16.mxu0 %v5356_v46  ;;  %v5428_v46 = vld [vmem:[#allocation2 + $0x4e4] ss:$36 sps:$4 sm:$0xff]  }
 0x1d1   :  { %2903 = vmatmul.mubr.bf16.gmra.mrb[84].mxu1 %v5358_v47  ;;  %v5432_v47 = vld [vmem:[#allocation2 + $0xf8] ss:$36 sps:$4 sm:$0xff]  }
 0x1d2   :  { %3353 = vmatmul.mubr.bf16.gmra.mrb[20].mxu0 %v5359_v50  ;;  %2910 = vmatprep.mubr.bf16.mxu1 %v5360_v51  ;;  %v5431_v50 = vld [vmem:[#allocation2 + $0x4e0] ss:$36 sps:$4 sm:$0xff]  }
 0x1d3   :  { %3360 = vmatprep.mubr.bf16.mxu0 %v5362_v53  ;;  %v5435_v51 = vld [vmem:[#allocation2 + $0x140] ss:$36 sps:$4 sm:$0xff]   ;;  %v5433_v53 = vld [vmem:[#allocation2 + $0x52c] ss:$36 sps:$4 sm:$0xff]  }
 0x1d9   :  { %2911 = vmatmul.mubr.bf16.gmra.mrb[88].mxu1 %v5364_v54  ;;  %v5437_v54 = vld [vmem:[#allocation2 + $0x188] ss:$36 sps:$4 sm:$0xff]  }
 0x1da   :  { %3361 = vmatmul.mubr.bf16.gmra.mrb[24].mxu0 %v5365_v55  ;;  %2918 = vmatprep.mubr.bf16.mxu1 %v5366_v56  ;;  %v5436_v55 = vld [vmem:[#allocation2 + $0x528] ss:$36 sps:$4 sm:$0xff]   ;;  %v5440_v56 = vld [vmem:[#allocation2 + $0x1d0] ss:$36 sps:$4 sm:$0xff]  }
 0x1db   :  { %3368 = vmatprep.mubr.bf16.mxu0 %v5368_v58  ;;  %v5438_v58 = vld [vmem:[#allocation2 + $0x574] ss:$36 sps:$4 sm:$0xff]  }
 0x1e1   :  { %2919 = vmatmul.mubr.bf16.gmra.mrb[92].mxu1 %v5370_v59 }
 0x1e2   :  { %3369 = vmatmul.mubr.bf16.gmra.mrb[28].mxu0 %v5371_v61  ;;  %2926 = vmatprep.mubr.bf16.mxu1 %v5373_v62  ;;  %v5442_v62 = vld [vmem:[#allocation2 + $0x218] ss:$36 sps:$4 sm:$0xff]  }
 0x1e3   :  { %3376 = vmatprep.mubr.bf16.mxu0 %v5375_v63 }
 0x1e9   :  { %2927 = vmatmul.mubr.bf16.gmra.mrb[96].mxu1 %v5377_v1  ;;  %v5441_v1 = vld [vmem:[#allocation2 + $0x570] ss:$36 sps:$4 sm:$0xff]  }
 0x1ea   :  { %3377 = vmatmul.mubr.bf16.gmra.mrb[32].mxu0 %v5378_v3  ;;  %2934 = vmatprep.mubr.bf16.mxu1 %v5379_v4  ;;  %v5445_v3 = vld [vmem:[#allocation2 + $0x260] ss:$36 sps:$4 sm:$0xff]  }
 0x1eb   :  { %3384 = vmatprep.mubr.bf16.mxu0 %v5381_v7  ;;  %v5443_v7 = vld [vmem:[#allocation2 + $0x5bc] ss:$36 sps:$4 sm:$0xff]  }
 0x1f1   :  { %2935 = vmatmul.mubr.bf16.gmra.mrb[100].mxu1 %v5383_v8 }
 0x1f2   :  { %3385 = vmatmul.mubr.bf16.gmra.mrb[36].mxu0 %v5384_v9  ;;  %2942 = vmatprep.mubr.bf16.mxu1 %v5385_v10  ;;  %v5447_v10 = vld [vmem:[#allocation2 + $0x2a8] ss:$36 sps:$4 sm:$0xff]  }
 0x1f3   :  { %3392 = vmatprep.mubr.bf16.mxu0 %v5387_v12 }
 0x1f9   :  { %2943 = vmatmul.mubr.bf16.gmra.mrb[104].mxu1 %v5389_v13  ;;  %v5446_v13 = vld [vmem:[#allocation2 + $0x5b8] ss:$36 sps:$4 sm:$0xff]  }
 0x1fa   :  { %3393 = vmatmul.mubr.bf16.gmra.mrb[40].mxu0 %v5390_v15  ;;  %2950 = vmatprep.mubr.bf16.mxu1 %v5392_v16  ;;  %v5450_v15 = vld [vmem:[#allocation2 + $0x2f0] ss:$36 sps:$4 sm:$0xff]  }
 0x1fb   :  { %3400 = vmatprep.mubr.bf16.mxu0 %v5394_v17  ;;  %v5448_v17 = vld [vmem:[#allocation2 + $0x604] ss:$36 sps:$4 sm:$0xff]  }
 0x201   :  { %2951 = vmatmul.mubr.bf16.gmra.mrb[108].mxu1 %v5396_v18 }
 0x202   :  { %3401 = vmatmul.mubr.bf16.gmra.mrb[44].mxu0 %v5397_v20  ;;  %2958 = vmatprep.mubr.bf16.mxu1 %v5398_v21  ;;  %v5452_v21 = vld [vmem:[#allocation2 + $0x338] ss:$36 sps:$4 sm:$0xff]  }
 0x203   :  { %3408 = vmatprep.mubr.bf16.mxu0 %v5400_v23 }
 0x209   :  { %2959 = vmatmul.mubr.bf16.gmra.mrb[112].mxu1 %v5402_v24  ;;  %v5451_v24 = vld [vmem:[#allocation2 + $0x600] ss:$36 sps:$4 sm:$0xff]  }
 0x20a   :  { %3409 = vmatmul.mubr.bf16.gmra.mrb[48].mxu0 %v5403_v25  ;;  %2966 = vmatprep.mubr.bf16.mxu1 %v5404_v26  ;;  %v5455_v25 = vld [vmem:[#allocation2 + $0x380] ss:$36 sps:$4 sm:$0xff]  }
 0x20b   :  { %3416 = vmatprep.mubr.bf16.mxu0 %v5406_v28  ;;  %v5453_v28 = vld [vmem:[#allocation2 + $0x64c] ss:$36 sps:$4 sm:$0xff]  }
 0x211   :  { %2967 = vmatmul.mubr.bf16.gmra.mrb[116].mxu1 %v5408_v29 }
 0x212   :  { %3417 = vmatmul.mubr.bf16.gmra.mrb[52].mxu0 %v5409_v31  ;;  %2974 = vmatprep.mubr.bf16.mxu1 %v5411_v32  ;;  %v5457_v32 = vld [vmem:[#allocation2 + $0x3c8] ss:$36 sps:$4 sm:$0xff]  }
 0x213   :  { %3424 = vmatprep.mubr.bf16.mxu0 %v5413_v33 }
 0x219   :  { %2975 = vmatmul.mubr.bf16.gmra.mrb[120].mxu1 %v5415_v34  ;;  %v5456_v34 = vld [vmem:[#allocation2 + $0x648] ss:$36 sps:$4 sm:$0xff]  }
 0x21a   :  { %3425 = vmatmul.mubr.bf16.gmra.mrb[56].mxu0 %v5416_v35  ;;  %2982 = vmatprep.mubr.bf16.mxu1 %v5417_v0  ;;  %v5460_v35 = vld [vmem:[#allocation2 + $0x410] ss:$36 sps:$4 sm:$0xff]  }
 0x21b   :  { %3432 = vmatprep.mubr.bf16.mxu0 %v5419_v37  ;;  %v5458_v37 = vld [vmem:[#allocation2 + $0x694] ss:$36 sps:$4 sm:$0xff]  }
 0x221   :  { %2983 = vmatmul.mubr.bf16.gmra.mrb[124].mxu1 %v5421_v38 }
 0x222   :  { %3433 = vmatmul.mubr.bf16.gmra.mrb[60].mxu0 %v5422_v40  ;;  %4587 = vmatprep.mubr.bf16.mxu1 %v5425_v41  ;;  %v5462_v41 = vld [vmem:[#allocation2 + $0x458] ss:$36 sps:$4 sm:$0xff]  }
 0x223   :  { %3440 = vmatprep.mubr.bf16.mxu0 %v5423_v42 }
 0x229   :  { %4588 = vmatmul.mubr.bf16.vlgmr.msra.gmra.mrb[128].mxu1 %v5427_v43  ;;  %v5461_v43 = vld [vmem:[#allocation2 + $0x690] ss:$36 sps:$4 sm:$0xff]  }
 0x22a   :  { %3441 = vmatmul.mubr.bf16.gmra.mrb[64].mxu0 %v5426_v44  ;;  %4591 = vmatprep.mubr.bf16.mxu1 %v5430_v45  ;;  %v5465_v44 = vld [vmem:[#allocation2 + $0x4a0] ss:$36 sps:$4 sm:$0xff]  }
 0x22b   :  { %3448 = vmatprep.mubr.bf16.mxu0 %v5428_v46  ;;  %v5463_v46 = vld [vmem:[#allocation2 + $0x6dc] ss:$36 sps:$4 sm:$0xff]  }
 0x231   :  { %4592 = vmatmul.mubr.bf16.gmra.mrb[132].mxu1 %v5432_v47 }
 0x232   :  { %3449 = vmatmul.mubr.bf16.gmra.mrb[68].mxu0 %v5431_v50  ;;  %4595 = vmatprep.mubr.bf16.mxu1 %v5435_v51  ;;  %v5467_v51 = vld [vmem:[#allocation2 + $0x4e8] ss:$36 sps:$4 sm:$0xff]  }
 0x233   :  { %3456 = vmatprep.mubr.bf16.mxu0 %v5433_v53 }
 0x239   :  { %4596 = vmatmul.mubr.bf16.gmra.mrb[136].mxu1 %v5437_v54  ;;  %v5466_v54 = vld [vmem:[#allocation2 + $0x6d8] ss:$36 sps:$4 sm:$0xff]  }
 0x23a   :  { %3457 = vmatmul.mubr.bf16.gmra.mrb[72].mxu0 %v5436_v55  ;;  %4599 = vmatprep.mubr.bf16.mxu1 %v5440_v56  ;;  %v5470_v55 = vld [vmem:[#allocation2 + $0x530] ss:$36 sps:$4 sm:$0xff]  }
 0x23b   :  { %3464 = vmatprep.mubr.bf16.mxu0 %v5438_v58  ;;  %v5468_v58 = vld [vmem:[#allocation2 + $0x724] ss:$36 sps:$4 sm:$0xff]  }
 0x23c   :  { %v5862_v59 = vpop.f32.mrb[32].mxu1 }
 0x23d   :  { %v2802_v61 = vpop.f32.mrb[33].mxu1 }
 0x23e   :  { %v5864_v63 = vpop.f32.mrb[34].mxu1 }
 0x23f   :  { %v2805_v4 = vpop.f32.mrb[35].mxu1 }
 0x240   :  { %v5471_v4 = vld [vmem:[#allocation2 + $0x720] ss:$36 sps:$4 sm:$0xff]  }
 0x241   :  { %4600 = vmatmul.mubr.bf16.gmra.mrb[140].mxu1 %v5442_v62 }
 0x242   :  { %3465 = vmatmul.mubr.bf16.gmra.mrb[76].mxu0 %v5441_v1  ;;  %4603 = vmatprep.mubr.bf16.mxu1 %v5445_v3  ;;  %v5472_v1 = vld [vmem:[#allocation2 + $0x578] ss:$36 sps:$4 sm:$0xff]  }
 0x243   :  { %3472 = vmatprep.mubr.bf16.mxu0 %v5443_v7  ;;  %v5475_v7 = vld [vmem:[#allocation2 + $0x5c0] ss:$36 sps:$4 sm:$0xff]  }
 0x244   :  { %v5866_v8 = vpop.f32.mrb[36].mxu1 }
 0x245   :  { %v2810_v9 = vpop.f32.mrb[37].mxu1 }
 0x246   :  { %v5868_v12 = vpop.f32.mrb[38].mxu1 }
 0x247   :  { %v2813_v16 = vpop.f32.mrb[39].mxu1 }
 0x248   :  { %v5477_v16 = vld [vmem:[#allocation2 + $0x608] ss:$36 sps:$4 sm:$0xff]  }
 0x249   :  { %4604 = vmatmul.mubr.bf16.gmra.mrb[144].mxu1 %v5447_v10  ;;  %v5473_v10 = vld [vmem:[#allocation2 + $0x76c] ss:$36 sps:$4 sm:$0xff]  }
 0x24a   :  { %3473 = vmatmul.mubr.bf16.gmra.mrb[80].mxu0 %v5446_v13  ;;  %4607 = vmatprep.mubr.bf16.mxu1 %v5450_v15 }
 0x24b   :  { %3480 = vmatprep.mubr.bf16.mxu0 %v5448_v17 }
 0x24c   :  { %v5870_v18 = vpop.f32.mrb[40].mxu1 }
 0x24d   :  { %v2818_v20 = vpop.f32.mrb[41].mxu1 }
 0x24e   :  { %v5872_v23 = vpop.f32.mrb[42].mxu1  ;;  %v5476_v20 = vld [vmem:[#allocation2 + $0x768] ss:$36 sps:$4 sm:$0xff]  }
 0x24f   :  { %v2821_v26 = vpop.f32.mrb[43].mxu1 }
 0x251   :  { %4608 = vmatmul.mubr.bf16.gmra.mrb[148].mxu1 %v5452_v21  ;;  %v5480_v21 = vld [vmem:[#allocation2 + $0x650] ss:$36 sps:$4 sm:$0xff]  }
 0x252   :  { %3481 = vmatmul.mubr.bf16.gmra.mrb[84].mxu0 %v5451_v24  ;;  %4611 = vmatprep.mubr.bf16.mxu1 %v5455_v25  ;;  %v5478_v25 = vld [vmem:[#allocation2 + $0x7b4] ss:$36 sps:$4 sm:$0xff]  }
 0x253   :  { %3488 = vmatprep.mubr.bf16.mxu0 %v5453_v28 }
 0x254   :  { %v5874_v29 = vpop.f32.mrb[44].mxu1 }
 0x255   :  { %v2826_v31 = vpop.f32.mrb[45].mxu1 }
 0x256   :  { %v5876_v33 = vpop.f32.mrb[46].mxu1 }
 0x257   :  { %v2829_v0 = vpop.f32.mrb[47].mxu1 }
 0x259   :  { %4612 = vmatmul.mubr.bf16.gmra.mrb[152].mxu1 %v5457_v32  ;;  %v5482_v32 = vld [vmem:[#allocation2 + $0x698] ss:$36 sps:$4 sm:$0xff]  }
 0x25a   :  { %3489 = vmatmul.mubr.bf16.gmra.mrb[88].mxu0 %v5456_v34  ;;  %4615 = vmatprep.mubr.bf16.mxu1 %v5460_v35 }
 0x25b   :  { %3496 = vmatprep.mubr.bf16.mxu0 %v5458_v37  ;;  %v5481_v37 = vld [vmem:[#allocation2 + $0x7b0] ss:$36 sps:$4 sm:$0xff]  }
 0x25c   :  { %v5878_v38 = vpop.f32.mrb[48].mxu1 }
 0x25d   :  { %v2834_v40 = vpop.f32.mrb[49].mxu1 }
 0x25e   :  { %v5880_v42 = vpop.f32.mrb[50].mxu1  ;;  %v5485_v40 = vld [vmem:[#allocation2 + $0x6e0] ss:$36 sps:$4 sm:$0xff]  }
 0x25f   :  { %v2837_v45 = vpop.f32.mrb[51].mxu1 }
 0x261   :  { %4616 = vmatmul.mubr.bf16.gmra.mrb[156].mxu1 %v5462_v41 }
 0x262   :  { %3497 = vmatmul.mubr.bf16.gmra.mrb[92].mxu0 %v5461_v43  ;;  %4619 = vmatprep.mubr.bf16.mxu1 %v5465_v44  ;;  %v5483_v44 = vld [vmem:[#allocation2 + $0x7fc] ss:$36 sps:$4 sm:$0xff]  }
 0x263   :  { %3504 = vmatprep.mubr.bf16.mxu0 %v5463_v46 }
 0x264   :  { %v5882_v47 = vpop.f32.mrb[52].mxu1 }
 0x265   :  { %v2842_v50 = vpop.f32.mrb[53].mxu1 }
 0x266   :  { %v5884_v53 = vpop.f32.mrb[54].mxu1 }
 0x267   :  { %v2845_v56 = vpop.f32.mrb[55].mxu1 }
 0x269   :  { %4620 = vmatmul.mubr.bf16.gmra.mrb[160].mxu1 %v5467_v51 }
 0x26a   :  { %3505 = vmatmul.mubr.bf16.gmra.mrb[96].mxu0 %v5466_v54  ;;  %4623 = vmatprep.mubr.bf16.mxu1 %v5470_v55  ;;  %v5487_v54 = vld [vmem:[#allocation2 + $0x728] ss:$36 sps:$4 sm:$0xff]  }
 0x26b   :  { %3512 = vmatprep.mubr.bf16.mxu0 %v5468_v58 }
 0x26c   :  { %v5886_v61 = vpop.f32.mrb[56].mxu1 }
 0x26d   :  { %v2850_v62 = vpop.f32.mrb[57].mxu1 }
 0x26e   :  { %v5888_v3 = vpop.f32.mrb[58].mxu1  ;;  %v5486_v62 = vld [vmem:[#allocation2 + $0x7f8] ss:$36 sps:$4 sm:$0xff]  }
 0x26f   :  { %v2853_v9 = vpop.f32.mrb[59].mxu1 }
 0x271   :  { %4624 = vmatmul.mubr.bf16.gmra.mrb[164].mxu1 %v5472_v1  ;;  %v5490_v1 = vld [vmem:[#allocation2 + $0x770] ss:$36 sps:$4 sm:$0xff]  }
 0x272   :  { %3513 = vmatmul.mubr.bf16.gmra.mrb[100].mxu0 %v5471_v4  ;;  %4627 = vmatprep.mubr.bf16.mxu1 %v5475_v7  ;;  %v5488_v7 = vld [vmem:[#allocation2 + $0x844] ss:$36 sps:$4 sm:$0xff]  }
 0x273   :  { %3520 = vmatprep.mubr.bf16.mxu0 %v5473_v10 }
 0x274   :  { %v5890_v13 = vpop.f32.mrb[60].mxu1 }
 0x275   :  { %v2858_v15 = vpop.f32.mrb[61].mxu1 }
 0x276   :  { %v5892_v17 = vpop.f32.mrb[62].mxu1 }
 0x277   :  { %v2861_v24 = vpop.f32.mrb[63].mxu1 }
 0x279   :  { %4628 = vmatmul.mubr.bf16.gmra.mrb[168].mxu1 %v5477_v16 }
 0x27a   :  { %3521 = vmatmul.mubr.bf16.gmra.mrb[104].mxu0 %v5476_v20  ;;  %4631 = vmatprep.mubr.bf16.mxu1 %v5480_v21  ;;  %v5492_v20 = vld [vmem:[#allocation2 + $0x7b8] ss:$36 sps:$4 sm:$0xff]  }
 0x27b   :  { %3528 = vmatprep.mubr.bf16.mxu0 %v5478_v25 }
 0x27c   :  { %v5894_v26 = vpop.f32.mrb[64].mxu1 }
 0x27d   :  { %v3314_v28 = vpop.f32.mrb[0].mxu0  ;;  %v2866_v31 = vpop.f32.mrb[65].mxu1 }
 0x27e   :  { %v5897_v34 = vadd.f32 %v3314_v28, %v5829_v49  ;;  %v3316_v35 = vpop.f32.mrb[1].mxu0  ;;  %v5899_v0 = vpop.f32.mrb[66].mxu1  ;;  %v5491_v28 = vld [vmem:[#allocation2 + $0x840] ss:$36 sps:$4 sm:$0xff]  }
 0x27f   :  { %v3317_v41 = vpop.f32.mrb[2].mxu0  ;;  %v2869_v43 = vpop.f32.mrb[67].mxu1  ;;  %v5495_v31 = vld [vmem:[#allocation2 + $0x800] ss:$36 sps:$4 sm:$0xff]   ;;  %v5493_v35 = vld [vmem:[#allocation2 + $0x88c] ss:$36 sps:$4 sm:$0xff]  }
 0x280   :  { %v5902_v45 = vadd.f32 %v3317_v41, %v5831_v52  ;;  %v3319_v46 = vpop.f32.mrb[3].mxu0 }
 0x281   :  { %4632 = vmatmul.mubr.bf16.gmra.mrb[172].mxu1 %v5482_v32 }
 0x282   :  { %3529 = vmatmul.mubr.bf16.gmra.mrb[108].mxu0 %v5481_v37  ;;  %4635 = vmatprep.mubr.bf16.mxu1 %v5485_v40 }
 0x283   :  { %3536 = vmatprep.mubr.bf16.mxu0 %v5483_v44  ;;  %v5497_v44 = vld [vmem:[#allocation2 + $0x848] ss:$36 sps:$4 sm:$0xff]  }
 0x284   :  { %v5904_v50 = vpop.f32.mrb[68].mxu1 }
 0x285   :  { %v3322_v49 = vpop.f32.mrb[4].mxu0  ;;  %v2874_v51 = vpop.f32.mrb[69].mxu1 }
 0x286   :  { %v5907_v55 = vadd.f32 %v3322_v49, %v5833_v57  ;;  %v3324_v56 = vpop.f32.mrb[5].mxu0  ;;  %v5909_v58 = vpop.f32.mrb[70].mxu1 }
 0x287   :  { %v3325_v52 = vpop.f32.mrb[6].mxu0  ;;  %v2877_v4 = vpop.f32.mrb[71].mxu1  ;;  %v5500_v56 = vld [vmem:[#allocation2 + $0x890] ss:$36 sps:$4 sm:$0xff]  }
 0x288   :  { %v5912_v9 = vadd.f32 %v3325_v52, %v5835_v60  ;;  %v3327_v10 = vpop.f32.mrb[7].mxu0 }
 0x289   :  { %4636 = vmatmul.mubr.bf16.gmra.mrb[176].mxu1 %v5487_v54  ;;  %v5496_v54 = vld [vmem:[#allocation2 + $0x888] ss:$36 sps:$4 sm:$0xff]  }
 0x28a   :  { %3537 = vmatmul.mubr.bf16.gmra.mrb[112].mxu0 %v5486_v62  ;;  %4639 = vmatprep.mubr.bf16.mxu1 %v5490_v1  ;;  %v5498_v1 = vld [vmem:[#allocation2 + $0x8d4] ss:$36 sps:$4 sm:$0xff]  }
 0x28b   :  { %3544 = vmatprep.mubr.bf16.mxu0 %v5488_v7 }
 0x28c   :  { %v5914_v15 = vpop.f32.mrb[72].mxu1 }
 0x28d   :  { %v3330_v57 = vpop.f32.mrb[8].mxu0  ;;  %v2882_v16 = vpop.f32.mrb[73].mxu1 }
 0x28e   :  { %v5917_v21 = vadd.f32 %v3330_v57, %v5837_v2  ;;  %v3332_v24 = vpop.f32.mrb[9].mxu0  ;;  %v5919_v25 = vpop.f32.mrb[74].mxu1  ;;  %v5502_v57 = vld [vmem:[#allocation2 + $0x8d8] ss:$36 sps:$4 sm:$0xff]  }
 0x28f   :  { %v3333_v60 = vpop.f32.mrb[10].mxu0  ;;  %v2885_v32 = vpop.f32.mrb[75].mxu1 }
 0x290   :  { %v5922_v37 = vadd.f32 %v3333_v60, %v5839_v6  ;;  %v3335_v40 = vpop.f32.mrb[11].mxu0 }
 0x291   :  { %4640 = vmatmul.mubr.bf16.gmra.mrb[180].mxu1 %v5492_v20 }
 0x292   :  { %3545 = vmatmul.mubr.bf16.gmra.mrb[116].mxu0 %v5491_v28  ;;  %4643 = vmatprep.mubr.bf16.mxu1 %v5495_v31  ;;  %v5501_v28 = vld [vmem:[#allocation2 + $0x8d0] ss:$36 sps:$4 sm:$0xff]  }
 0x293   :  { %3552 = vmatprep.mubr.bf16.mxu0 %v5493_v35 }
 0x294   :  { %v5924_v41 = vpop.f32.mrb[76].mxu1 }
 0x295   :  { %v3338_v2 = vpop.f32.mrb[12].mxu0  ;;  %v2890_v43 = vpop.f32.mrb[77].mxu1 }
 0x296   :  { %v5927_v46 = vadd.f32 %v3338_v2, %v5841_v11  ;;  %v3340_v49 = vpop.f32.mrb[13].mxu0  ;;  %v5929_v51 = vpop.f32.mrb[78].mxu1 }
 0x297   :  { %v3341_v6 = vpop.f32.mrb[14].mxu0  ;;  %v2893_v62 = vpop.f32.mrb[79].mxu1 }
 0x298   :  { %v5932_v52 = vadd.f32 %v3341_v6, %v5843_v14  ;;  %v3343_v4 = vpop.f32.mrb[15].mxu0 }
 0x299   :  { %4644 = vmatmul.mubr.bf16.gmra.mrb[184].mxu1 %v5497_v44 }
 0x29a   :  { %3553 = vmatmul.mubr.bf16.gmra.mrb[120].mxu0 %v5496_v54  ;;  %4647 = vmatprep.mubr.bf16.mxu1 %v5500_v56 }
 0x29b   :  { %3560 = vmatprep.mubr.bf16.mxu0 %v5498_v1 }
 0x29c   :  { %v5934_v7 = vpop.f32.mrb[80].mxu1 }
 0x29d   :  { %v3346_v11 = vpop.f32.mrb[16].mxu0  ;;  %v2898_v10 = vpop.f32.mrb[81].mxu1 }
 0x29e   :  { %v5937_v16 = vadd.f32 %v3346_v11, %v5845_v19  ;;  %v3348_v20 = vpop.f32.mrb[17].mxu0  ;;  %v5939_v24 = vpop.f32.mrb[82].mxu1 }
 0x29f   :  { %v3349_v31 = vpop.f32.mrb[18].mxu0  ;;  %v2901_v14 = vpop.f32.mrb[83].mxu1 }
 0x2a0   :  { %v5942_v60 = vadd.f32 %v3349_v31, %v5847_v22  ;;  %v3351_v32 = vpop.f32.mrb[19].mxu0 }
 0x2a1   :  { %4648 = vmatmul.mubr.bf16.gmra.mrb[188].mxu1 %v5502_v57 }
 0x2a2   :  { %3561 = vmatmul.mubr.bf16.gmra.mrb[124].mxu0 %v5501_v28 }
 0x2a4   :  { %v5944_v35 = vpop.f32.mrb[84].mxu1 }
 0x2a5   :  { %v3354_v40 = vpop.f32.mrb[20].mxu0  ;;  %v2906_v2 = vpop.f32.mrb[85].mxu1 }
 0x2a6   :  { %v5947_v43 = vadd.f32 %v3354_v40, %v5849_v27  ;;  %v3356_v19 = vpop.f32.mrb[21].mxu0  ;;  %v5949_v44 = vpop.f32.mrb[86].mxu1 }
 0x2a7   :  { %v3357_v49 = vpop.f32.mrb[22].mxu0  ;;  %v2909_v54 = vpop.f32.mrb[87].mxu1 }
 0x2a8   :  { %v5952_v56 = vadd.f32 %v3357_v49, %v5851_v30  ;;  %v3359_v22 = vpop.f32.mrb[23].mxu0 }
 0x2ac   :  { %v5954_v6 = vpop.f32.mrb[88].mxu1 }
 0x2ad   :  { %v3362_v62 = vpop.f32.mrb[24].mxu0  ;;  %v2914_v1 = vpop.f32.mrb[89].mxu1 }
 0x2ae   :  { %v5957_v4 = vadd.f32 %v3362_v62, %v5854_v36  ;;  %v3364_v11 = vpop.f32.mrb[25].mxu0  ;;  %v5959_v10 = vpop.f32.mrb[90].mxu1 }
 0x2af   :  { %v3365_v27 = vpop.f32.mrb[26].mxu0  ;;  %v2917_v57 = vpop.f32.mrb[91].mxu1 }
 0x2b0   :  { %v5962_v20 = vadd.f32 %v3365_v27, %v5856_v39  ;;  %v3367_v28 = vpop.f32.mrb[27].mxu0 }
 0x2b4   :  { %v5964_v31 = vpop.f32.mrb[92].mxu1 }
 0x2b5   :  { %v3370_v30 = vpop.f32.mrb[28].mxu0  ;;  %v2922_v14 = vpop.f32.mrb[93].mxu1 }
 0x2b6   :  { %v5967_v32 = vadd.f32 %v3370_v30, %v5858_v5  ;;  %v3372_v40 = vpop.f32.mrb[29].mxu0  ;;  %v5969_v2 = vpop.f32.mrb[94].mxu1 }
 0x2b7   :  { %v3373_v36 = vpop.f32.mrb[30].mxu0  ;;  %v2925_v19 = vpop.f32.mrb[95].mxu1 }
 0x2b8   :  { %v5972_v49 = vadd.f32 %v3373_v36, %v5860_v48  ;;  %v3375_v54 = vpop.f32.mrb[31].mxu0 }
 0x2bc   :  { %v5974_v22 = vpop.f32.mrb[96].mxu1 }
 0x2bd   :  { %6225 = vst [vmem:[#allocation15_spill] sm:$0xff] %v5974_v22  ;;  %v3378_v39 = vpop.f32.mrb[32].mxu0  ;;  %v2930_v62 = vpop.f32.mrb[97].mxu1 }
 0x2be   :  { %v5977_v1 = vadd.f32 %v3378_v39, %v5862_v59  ;;  %v3380_v11 = vpop.f32.mrb[33].mxu0  ;;  %v5979_v27 = vpop.f32.mrb[98].mxu1 }
 0x2bf   :  { %6226 = vst [vmem:[#allocation16_spill] sm:$0xff] %v5979_v27  ;;  %v3381_v5 = vpop.f32.mrb[34].mxu0  ;;  %v2933_v57 = vpop.f32.mrb[99].mxu1 }
 0x2c0   :  { %v5982_v28 = vadd.f32 %v3381_v5, %v5864_v63  ;;  %v3383_v30 = vpop.f32.mrb[35].mxu0 }
 0x2c4   :  { %v5984_v14 = vpop.f32.mrb[100].mxu1 }
 0x2c5   :  { %6227 = vst [vmem:[#allocation17_spill] sm:$0xff] %v5984_v14  ;;  %v3386_v48 = vpop.f32.mrb[36].mxu0  ;;  %v2938_v40 = vpop.f32.mrb[101].mxu1 }
 0x2c6   :  { %v5987_v36 = vadd.f32 %v3386_v48, %v5866_v8  ;;  %v3388_v19 = vpop.f32.mrb[37].mxu0  ;;  %v5989_v54 = vpop.f32.mrb[102].mxu1 }
 0x2c7   :  { %6228 = vst [vmem:[#allocation18_spill] sm:$0xff] %v5989_v54  ;;  %v3389_v59 = vpop.f32.mrb[38].mxu0  ;;  %v2941_v39 = vpop.f32.mrb[103].mxu1 }
 0x2c8   :  { %v5992_v62 = vadd.f32 %v3389_v59, %v5868_v12  ;;  %v3391_v11 = vpop.f32.mrb[39].mxu0 }
 0x2cc   :  { %v5994_v57 = vpop.f32.mrb[104].mxu1 }
 0x2cd   :  { %6229 = vst [vmem:[#allocation19_spill] sm:$0xff] %v5994_v57  ;;  %v3394_v63 = vpop.f32.mrb[40].mxu0  ;;  %v2946_v5 = vpop.f32.mrb[105].mxu1 }
 0x2ce   :  { %v5997_v30 = vadd.f32 %v3394_v63, %v5870_v18  ;;  %v3396_v40 = vpop.f32.mrb[41].mxu0  ;;  %v5999_v14 = vpop.f32.mrb[106].mxu1 }
 0x2cf   :  { %6230 = vst [vmem:[#allocation20_spill] sm:$0xff] %v5999_v14  ;;  %v3397_v8 = vpop.f32.mrb[42].mxu0  ;;  %v2949_v48 = vpop.f32.mrb[107].mxu1 }
 0x2d0   :  { %v6002_v19 = vadd.f32 %v3397_v8, %v5872_v23  ;;  %v3399_v39 = vpop.f32.mrb[43].mxu0 }
 0x2d4   :  { %v6004_v54 = vpop.f32.mrb[108].mxu1 }
 0x2d5   :  { %6231 = vst [vmem:[#allocation21_spill] sm:$0xff] %v6004_v54  ;;  %v3402_v12 = vpop.f32.mrb[44].mxu0  ;;  %v2954_v59 = vpop.f32.mrb[109].mxu1 }
 0x2d6   :  { %v6007_v11 = vadd.f32 %v3402_v12, %v5874_v29  ;;  %v3404_v5 = vpop.f32.mrb[45].mxu0  ;;  %v6009_v57 = vpop.f32.mrb[110].mxu1 }
 0x2d7   :  { %6232 = vst [vmem:[#allocation22_spill] sm:$0xff] %v6009_v57  ;;  %v3405_v18 = vpop.f32.mrb[46].mxu0  ;;  %v2957_v63 = vpop.f32.mrb[111].mxu1 }
 0x2d8   :  { %v6012_v40 = vadd.f32 %v3405_v18, %v5876_v33  ;;  %v3407_v48 = vpop.f32.mrb[47].mxu0 }
 0x2dc   :  { %v6014_v14 = vpop.f32.mrb[112].mxu1 }
 0x2dd   :  { %6233 = vst [vmem:[#allocation23_spill] sm:$0xff] %v6014_v14  ;;  %v3410_v23 = vpop.f32.mrb[48].mxu0  ;;  %v2962_v8 = vpop.f32.mrb[113].mxu1 }
 0x2de   :  { %v6017_v39 = vadd.f32 %v3410_v23, %v5878_v38  ;;  %v3412_v59 = vpop.f32.mrb[49].mxu0  ;;  %v6019_v54 = vpop.f32.mrb[114].mxu1 }
 0x2df   :  { %6234 = vst [vmem:[#allocation24_spill] sm:$0xff] %v6019_v54  ;;  %v3413_v29 = vpop.f32.mrb[50].mxu0  ;;  %v2965_v12 = vpop.f32.mrb[115].mxu1 }
 0x2e0   :  { %v6022_v5 = vadd.f32 %v3413_v29, %v5880_v42  ;;  %v3415_v63 = vpop.f32.mrb[51].mxu0 }
 0x2e4   :  { %v6024_v57 = vpop.f32.mrb[116].mxu1 }
 0x2e5   :  { %6235 = vst [vmem:[#allocation25_spill] sm:$0xff] %v6024_v57  ;;  %v3418_v33 = vpop.f32.mrb[52].mxu0  ;;  %v2970_v18 = vpop.f32.mrb[117].mxu1 }
 0x2e6   :  { %v6027_v48 = vadd.f32 %v3418_v33, %v5882_v47  ;;  %v3420_v8 = vpop.f32.mrb[53].mxu0  ;;  %v6029_v14 = vpop.f32.mrb[118].mxu1 }
 0x2e7   :  { %6236 = vst [vmem:[#allocation26_spill] sm:$0xff] %v6029_v14  ;;  %v3421_v38 = vpop.f32.mrb[54].mxu0  ;;  %v2973_v23 = vpop.f32.mrb[119].mxu1 }
 0x2e8   :  { %v6032_v59 = vadd.f32 %v3421_v38, %v5884_v53  ;;  %v3423_v12 = vpop.f32.mrb[55].mxu0 }
 0x2ec   :  { %v6034_v54 = vpop.f32.mrb[120].mxu1 }
 0x2ed   :  { %6237 = vst [vmem:[#allocation27_spill] sm:$0xff] %v6034_v54  ;;  %v3426_v42 = vpop.f32.mrb[56].mxu0  ;;  %v2978_v29 = vpop.f32.mrb[121].mxu1 }
 0x2ee   :  { %v6037_v63 = vadd.f32 %v3426_v42, %v5886_v61  ;;  %v3428_v18 = vpop.f32.mrb[57].mxu0  ;;  %v6039_v57 = vpop.f32.mrb[122].mxu1 }
 0x2ef   :  { %6238 = vst [vmem:[#allocation28_spill] sm:$0xff] %v6039_v57  ;;  %v3429_v47 = vpop.f32.mrb[58].mxu0  ;;  %v2981_v33 = vpop.f32.mrb[123].mxu1 }
 0x2f0   :  { %v6042_v8 = vadd.f32 %v3429_v47, %v5888_v3  ;;  %v3431_v23 = vpop.f32.mrb[59].mxu0 }
 0x2f4   :  { %v6044_v14 = vpop.f32.mrb[124].mxu1 }
 0x2f5   :  { %6239 = vst [vmem:[#allocation29_spill] sm:$0xff] %v6044_v14  ;;  %v3434_v53 = vpop.f32.mrb[60].mxu0  ;;  %v2986_v38 = vpop.f32.mrb[125].mxu1 }
 0x2f6   :  { %v6047_v12 = vadd.f32 %v3434_v53, %v5890_v13  ;;  %v3436_v29 = vpop.f32.mrb[61].mxu0  ;;  %v6049_v54 = vpop.f32.mrb[126].mxu1 }
 0x2f7   :  { %6240 = vst [vmem:[#allocation30_spill] sm:$0xff] %v6049_v54  ;;  %v3437_v61 = vpop.f32.mrb[62].mxu0  ;;  %v2989_v42 = vpop.f32.mrb[127].mxu1 }
 0x2f8   :  { %v6052_v18 = vadd.f32 %v3437_v61, %v5892_v17  ;;  %v3439_v33 = vpop.f32.mrb[63].mxu0 }
 0x2fc   :  { %v4589_v57 = vpop.f32.mrb[128].mxu1 }
 0x2fd   :  { %v3442_v3 = vpop.f32.mrb[64].mxu0  ;;  %v3612_v47 = vadd.f32 %v5907_v55, %v4589_v57  ;;  %v3603_v23 = vpop.f32.mrb[129].mxu1 }
 0x2fe   :  { %v6056_v14 = vadd.f32 %v3442_v3, %v5894_v26  ;;  %v3444_v38 = vpop.f32.mrb[65].mxu0  ;;  %v3604_v13 = vadd.f32 %v5897_v34, %v3603_v23  ;;  %v4590_v53 = vpop.f32.mrb[130].mxu1 }
 0x2ff   :  { %3860 = vst [vmem:[#allocation7 + $0x10] sm:$0xff] %v3612_v47  ;;  %v3445_v29 = vpop.f32.mrb[66].mxu0  ;;  %v3615_v42 = vadd.f32 %v5912_v9, %v4590_v53  ;;  %v3606_v54 = vpop.f32.mrb[131].mxu1  ;;  %v3993_v3 = vmul.f32 %v3612_v47, %v3612_v47 }
 0x300   :  { %6241 = vst [vmem:[#allocation31_spill] sm:$0xff] %v6056_v14  ;;  %3858 = vst [vmem:[#allocation7] sm:$0xff] %v3604_v13  ;;  %v6061_v17 = vadd.f32 %v3445_v29, %v5899_v0  ;;  %v3447_v61 = vpop.f32.mrb[67].mxu0  ;;  %v3607_v55 = vadd.f32 %v5902_v45, %v3606_v54  ;;  %v3991_v57 = vmul.f32 %v3604_v13, %v3604_v13 }
 0x301   :  { %3861 = vst [vmem:[#allocation7 + $0x18] sm:$0xff] %v3615_v42  ;;  %v3994_v27 = vmul.f32 %v3615_v42, %v3615_v42 }
 0x302   :  { %3859 = vst [vmem:[#allocation7 + $0x8] sm:$0xff] %v3607_v55  ;;  %v3922_v26 = vadd.f32 %v3607_v55, %v3604_v13  ;;  %v3992_v33 = vmul.f32 %v3607_v55, %v3607_v55 }
 0x304   :  { %v3923_v34 = vadd.f32 %v3922_v26, %v3612_v47  ;;  %v4055_v23 = vadd.f32 %v3992_v33, %v3991_v57  ;;  %v4593_v38 = vpop.f32.mrb[132].mxu1 }
 0x305   :  { %v3450_v14 = vpop.f32.mrb[68].mxu0  ;;  %v3628_v9 = vadd.f32 %v5927_v46, %v4593_v38  ;;  %v3619_v53 = vpop.f32.mrb[133].mxu1 }
 0x306   :  { %v4056_v22 = vadd.f32 %v4055_v23, %v3993_v3  ;;  %v6066_v0 = vadd.f32 %v3450_v14, %v5904_v50  ;;  %v3452_v29 = vpop.f32.mrb[69].mxu0  ;;  %v3620_v45 = vadd.f32 %v5917_v21, %v3619_v53  ;;  %v3924_v54 = vadd.f32 %v3923_v34, %v3615_v42  ;;  %v4594_v61 = vpop.f32.mrb[134].mxu1 }
 0x307   :  { %3864 = vst [vmem:[#allocation7 + $0x30] sm:$0xff] %v3628_v9  ;;  %v3453_v13 = vpop.f32.mrb[70].mxu0  ;;  %v3631_v47 = vadd.f32 %v5932_v52, %v4594_v61  ;;  %v3622_v55 = vpop.f32.mrb[135].mxu1  ;;  %v3997_v23 = vmul.f32 %v3628_v9, %v3628_v9 }
 0x308   :  { %3862 = vst [vmem:[#allocation7 + $0x20] sm:$0xff] %v3620_v45  ;;  %v3925_v57 = vadd.f32 %v3924_v54, %v3620_v45  ;;  %v3995_v26 = vmul.f32 %v3620_v45, %v3620_v45  ;;  %v4057_v33 = vadd.f32 %v4056_v22, %v3994_v27  ;;  %v6071_v46 = vadd.f32 %v3453_v13, %v5909_v58  ;;  %v3455_v3 = vpop.f32.mrb[71].mxu0 }
 0x309   :  { %3865 = vst [vmem:[#allocation7 + $0x38] sm:$0xff] %v3631_v47  ;;  %v3623_v50 = vadd.f32 %v5922_v37, %v3622_v55  ;;  %v3998_v37 = vmul.f32 %v3631_v47, %v3631_v47 }
 0x30a   :  { %v4058_v14 = vadd.f32 %v4057_v33, %v3995_v26 }
 0x30b   :  { %3863 = vst [vmem:[#allocation7 + $0x28] sm:$0xff] %v3623_v50  ;;  %v3926_v21 = vadd.f32 %v3925_v57, %v3623_v50  ;;  %v3996_v42 = vmul.f32 %v3623_v50, %v3623_v50 }
 0x30c   :  { %v4597_v34 = vpop.f32.mrb[136].mxu1 }
 0x30d   :  { %v3927_v38 = vadd.f32 %v3926_v21, %v3628_v9  ;;  %v4059_v52 = vadd.f32 %v4058_v14, %v3996_v42  ;;  %v3458_v53 = vpop.f32.mrb[72].mxu0  ;;  %v3644_v29 = vadd.f32 %v5947_v43, %v4597_v34  ;;  %v3635_v45 = vpop.f32.mrb[137].mxu1 }
 0x30e   :  { %v6076_v22 = vadd.f32 %v3458_v53, %v5914_v15  ;;  %v3460_v58 = vpop.f32.mrb[73].mxu0  ;;  %v3636_v27 = vadd.f32 %v5937_v16, %v3635_v45  ;;  %v4598_v54 = vpop.f32.mrb[138].mxu1 }
 0x30f   :  { %v4060_v61 = vadd.f32 %v4059_v52, %v3997_v23  ;;  %3868 = vst [vmem:[#allocation7 + $0x50] sm:$0xff] %v3644_v29  ;;  %v3928_v13 = vadd.f32 %v3927_v38, %v3631_v47  ;;  %v3461_v55 = vpop.f32.mrb[74].mxu0  ;;  %v3647_v57 = vadd.f32 %v5952_v56, %v4598_v54  ;;  %v3638_v9 = vpop.f32.mrb[139].mxu1  ;;  %v4001_v42 = vmul.f32 %v3644_v29, %v3644_v29 }
 0x310   :  { %3866 = vst [vmem:[#allocation7 + $0x40] sm:$0xff] %v3636_v27  ;;  %v3999_v26 = vmul.f32 %v3636_v27, %v3636_v27  ;;  %v6081_v43 = vadd.f32 %v3461_v55, %v5919_v25  ;;  %v3463_v33 = vpop.f32.mrb[75].mxu0  ;;  %v3639_v15 = vadd.f32 %v5942_v60, %v3638_v9 }
 0x311   :  { %v3929_v3 = vadd.f32 %v3928_v13, %v3636_v27  ;;  %v4061_v50 = vadd.f32 %v4060_v61, %v3998_v37  ;;  %3869 = vst [vmem:[#allocation7 + $0x58] sm:$0xff] %v3647_v57  ;;  %v4002_v58 = vmul.f32 %v3647_v57, %v3647_v57 }
 0x312   :  { %3867 = vst [vmem:[#allocation7 + $0x48] sm:$0xff] %v3639_v15  ;;  %v4000_v16 = vmul.f32 %v3639_v15, %v3639_v15 }
 0x313   :  { %v4062_v14 = vadd.f32 %v4061_v50, %v3999_v26  ;;  %v3930_v21 = vadd.f32 %v3929_v3, %v3639_v15 }
 0x314   :  { %v4601_v47 = vpop.f32.mrb[140].mxu1 }
 0x315   :  { %v3931_v34 = vadd.f32 %v3930_v21, %v3644_v29  ;;  %v4063_v56 = vadd.f32 %v4062_v14, %v4000_v16  ;;  %v3466_v23 = vpop.f32.mrb[76].mxu0  ;;  %v3660_v38 = vadd.f32 %v5967_v32, %v4601_v47  ;;  %v3651_v52 = vpop.f32.mrb[141].mxu1 }
 0x316   :  { %v6086_v25 = vadd.f32 %v3466_v23, %v5924_v41  ;;  %v3468_v53 = vpop.f32.mrb[77].mxu0  ;;  %v3652_v60 = vadd.f32 %v5957_v4, %v3651_v52  ;;  %v4602_v45 = vpop.f32.mrb[142].mxu1 }
 0x317   :  { %v4064_v27 = vadd.f32 %v4063_v56, %v4001_v42  ;;  %3872 = vst [vmem:[#allocation7 + $0x70] sm:$0xff] %v3660_v38  ;;  %v3932_v54 = vadd.f32 %v3931_v34, %v3647_v57  ;;  %v3469_v37 = vpop.f32.mrb[78].mxu0  ;;  %v3663_v61 = vadd.f32 %v5972_v49, %v4602_v45  ;;  %v3654_v29 = vpop.f32.mrb[143].mxu1  ;;  %v4005_v3 = vmul.f32 %v3660_v38, %v3660_v38 }
 0x318   :  { %3870 = vst [vmem:[#allocation7 + $0x60] sm:$0xff] %v3652_v60  ;;  %v4003_v13 = vmul.f32 %v3652_v60, %v3652_v60  ;;  %v6091_v32 = vadd.f32 %v3469_v37, %v5929_v51  ;;  %v3471_v55 = vpop.f32.mrb[79].mxu0  ;;  %v3655_v41 = vadd.f32 %v5962_v20, %v3654_v29 }
 0x319   :  { %v3933_v9 = vadd.f32 %v3932_v54, %v3652_v60  ;;  %v4065_v26 = vadd.f32 %v4064_v27, %v4002_v58  ;;  %3873 = vst [vmem:[#allocation7 + $0x78] sm:$0xff] %v3663_v61  ;;  %v4006_v34 = vmul.f32 %v3663_v61, %v3663_v61 }
 0x31a   :  { %3871 = vst [vmem:[#allocation7 + $0x68] sm:$0xff] %v3655_v41  ;;  %v4004_v4 = vmul.f32 %v3655_v41, %v3655_v41 }
 0x31b   :  { %v4066_v33 = vadd.f32 %v4065_v26, %v4003_v13  ;;  %v3934_v15 = vadd.f32 %v3933_v9, %v3655_v41 }
 0x31c   :  { %v4605_v57 = vpop.f32.mrb[144].mxu1 }
 0x31d   :  { %v3935_v50 = vadd.f32 %v3934_v15, %v3660_v38  ;;  %v4067_v49 = vadd.f32 %v4066_v33, %v4004_v4  ;;  %v3474_v16 = vpop.f32.mrb[80].mxu0  ;;  %v3676_v14 = vadd.f32 %v5987_v36, %v4605_v57  ;;  %v3667_v21 = vpop.f32.mrb[145].mxu1 }
 0x31e   :  { %v6096_v51 = vadd.f32 %v3474_v16, %v5934_v7  ;;  %v3476_v47 = vpop.f32.mrb[81].mxu0  ;;  %v3668_v20 = vadd.f32 %v5977_v1, %v3667_v21  ;;  %v4606_v42 = vpop.f32.mrb[146].mxu1 }
 0x31f   :  { %v4068_v56 = vadd.f32 %v4067_v49, %v4005_v3  ;;  %3876 = vst [vmem:[#allocation7 + $0x90] sm:$0xff] %v3676_v14  ;;  %v3936_v23 = vadd.f32 %v3935_v50, %v3663_v61  ;;  %v3477_v52 = vpop.f32.mrb[82].mxu0  ;;  %v3679_v53 = vadd.f32 %v5992_v62, %v4606_v42  ;;  %v3670_v38 = vpop.f32.mrb[147].mxu1  ;;  %v4009_v29 = vmul.f32 %v3676_v14, %v3676_v14 }
 0x320   :  { %3874 = vst [vmem:[#allocation7 + $0x80] sm:$0xff] %v3668_v20  ;;  %v4007_v60 = vmul.f32 %v3668_v20, %v3668_v20  ;;  %v6101_v36 = vadd.f32 %v3477_v52, %v5939_v24  ;;  %v3479_v45 = vpop.f32.mrb[83].mxu0  ;;  %v3671_v7 = vadd.f32 %v5982_v28, %v3670_v38 }
 0x321   :  { %v3937_v58 = vadd.f32 %v3936_v23, %v3668_v20  ;;  %v4069_v27 = vadd.f32 %v4068_v56, %v4006_v34  ;;  %3877 = vst [vmem:[#allocation7 + $0x98] sm:$0xff] %v3679_v53  ;;  %v4010_v33 = vmul.f32 %v3679_v53, %v3679_v53 }
 0x322   :  { %3875 = vst [vmem:[#allocation7 + $0x88] sm:$0xff] %v3671_v7  ;;  %v4008_v1 = vmul.f32 %v3671_v7, %v3671_v7 }
 0x323   :  { %v4070_v54 = vadd.f32 %v4069_v27, %v4007_v60  ;;  %v3938_v37 = vadd.f32 %v3937_v58, %v3671_v7 }
 0x324   :  { %v4609_v61 = vpop.f32.mrb[148].mxu1 }
 0x325   :  { %v3939_v13 = vadd.f32 %v3938_v37, %v3676_v14  ;;  %v4071_v62 = vadd.f32 %v4070_v54, %v4008_v1  ;;  %v3482_v55 = vpop.f32.mrb[84].mxu0  ;;  %v3692_v41 = vadd.f32 %v6007_v11, %v4609_v61  ;;  %v3683_v9 = vpop.f32.mrb[149].mxu1 }
 0x326   :  { %v6106_v24 = vadd.f32 %v3482_v55, %v5944_v35  ;;  %v3484_v26 = vpop.f32.mrb[85].mxu0  ;;  %v3684_v28 = vadd.f32 %v5997_v30, %v3683_v9  ;;  %v4610_v4 = vpop.f32.mrb[150].mxu1 }
 0x327   :  { %v4072_v15 = vadd.f32 %v4071_v62, %v4009_v29  ;;  %3880 = vst [vmem:[#allocation7 + $0xb0] sm:$0xff] %v3692_v41  ;;  %v3940_v57 = vadd.f32 %v3939_v13, %v3679_v53  ;;  %v3485_v3 = vpop.f32.mrb[86].mxu0  ;;  %v3695_v50 = vadd.f32 %v6012_v40, %v4610_v4  ;;  %v3686_v49 = vpop.f32.mrb[151].mxu1  ;;  %v4013_v56 = vmul.f32 %v3692_v41, %v3692_v41 }
 0x328   :  { %3878 = vst [vmem:[#allocation7 + $0xa0] sm:$0xff] %v3684_v28  ;;  %v4011_v16 = vmul.f32 %v3684_v28, %v3684_v28  ;;  %v6111_v11 = vadd.f32 %v3485_v3, %v5949_v44  ;;  %v3487_v14 = vpop.f32.mrb[87].mxu0  ;;  %v3687_v35 = vadd.f32 %v6002_v19, %v3686_v49 }
 0x329   :  { %v3941_v21 = vadd.f32 %v3940_v57, %v3684_v28  ;;  %v4073_v47 = vadd.f32 %v4072_v15, %v4010_v33  ;;  %3881 = vst [vmem:[#allocation7 + $0xb8] sm:$0xff] %v3695_v50  ;;  %v4014_v7 = vmul.f32 %v3695_v50, %v3695_v50 }
 0x32a   :  { %3879 = vst [vmem:[#allocation7 + $0xa8] sm:$0xff] %v3687_v35  ;;  %v4012_v30 = vmul.f32 %v3687_v35, %v3687_v35 }
 0x32b   :  { %v4074_v20 = vadd.f32 %v4073_v47, %v4011_v16  ;;  %v3942_v42 = vadd.f32 %v3941_v21, %v3687_v35 }
 0x32c   :  { %v4613_v34 = vpop.f32.mrb[152].mxu1 }
 0x32d   :  { %v3943_v23 = vadd.f32 %v3942_v42, %v3692_v41  ;;  %v4075_v40 = vadd.f32 %v4074_v20, %v4012_v30  ;;  %v3490_v52 = vpop.f32.mrb[88].mxu0  ;;  %v3708_v53 = vadd.f32 %v6027_v48, %v4613_v34  ;;  %v3699_v38 = vpop.f32.mrb[153].mxu1 }
 0x32e   :  { %v6116_v44 = vadd.f32 %v3490_v52, %v5954_v6  ;;  %v3492_v60 = vpop.f32.mrb[89].mxu0  ;;  %v3700_v19 = vadd.f32 %v6017_v39, %v3699_v38  ;;  %v4614_v45 = vpop.f32.mrb[154].mxu1 }
 0x32f   :  { %v4076_v58 = vadd.f32 %v4075_v40, %v4013_v56  ;;  %3884 = vst [vmem:[#allocation7 + $0xd0] sm:$0xff] %v3708_v53  ;;  %v3944_v27 = vadd.f32 %v3943_v23, %v3695_v50  ;;  %v3493_v1 = vpop.f32.mrb[90].mxu0  ;;  %v3711_v54 = vadd.f32 %v6032_v59, %v4614_v45  ;;  %v3702_v37 = vpop.f32.mrb[155].mxu1  ;;  %v4017_v26 = vmul.f32 %v3708_v53, %v3708_v53 }
 0x330   :  { %3882 = vst [vmem:[#allocation7 + $0xc0] sm:$0xff] %v3700_v19  ;;  %v4015_v61 = vmul.f32 %v3700_v19, %v3700_v19  ;;  %v6121_v48 = vadd.f32 %v3493_v1, %v5959_v10  ;;  %v3495_v29 = vpop.f32.mrb[91].mxu0  ;;  %v3703_v6 = vadd.f32 %v6022_v5, %v3702_v37 }
 0x331   :  { %v3945_v13 = vadd.f32 %v3944_v27, %v3700_v19  ;;  %v4077_v62 = vadd.f32 %v4076_v58, %v4014_v7  ;;  %3885 = vst [vmem:[#allocation7 + $0xd8] sm:$0xff] %v3711_v54  ;;  %v4018_v50 = vmul.f32 %v3711_v54, %v3711_v54 }
 0x332   :  { %3883 = vst [vmem:[#allocation7 + $0xc8] sm:$0xff] %v3703_v6  ;;  %v4016_v39 = vmul.f32 %v3703_v6, %v3703_v6 }
 0x333   :  { %v4078_v55 = vadd.f32 %v4077_v62, %v4015_v61  ;;  %v3946_v41 = vadd.f32 %v3945_v13, %v3703_v6  ;;  %v6244_v13 = vld [vmem:[#allocation16_spill] sm:$0xff] }
 0x334   :  { %v4617_v9 = vpop.f32.mrb[156].mxu1 }
 0x335   :  { %v3947_v28 = vadd.f32 %v3946_v41, %v3708_v53  ;;  %v4079_v59 = vadd.f32 %v4078_v55, %v4016_v39  ;;  %v3498_v4 = vpop.f32.mrb[92].mxu0  ;;  %v3724_v33 = vadd.f32 %v6047_v12, %v4617_v9  ;;  %v3715_v15 = vpop.f32.mrb[157].mxu1 }
 0x336   :  { %v6126_v10 = vadd.f32 %v3498_v4, %v5964_v31  ;;  %v3500_v57 = vpop.f32.mrb[93].mxu0  ;;  %v3716_v5 = vadd.f32 %v6037_v63, %v3715_v15  ;;  %v4618_v3 = vpop.f32.mrb[158].mxu1 }
 0x337   :  { %v4080_v49 = vadd.f32 %v4079_v59, %v4017_v26  ;;  %3888 = vst [vmem:[#allocation7 + $0xf0] sm:$0xff] %v3724_v33  ;;  %v3948_v16 = vadd.f32 %v3947_v28, %v3711_v54  ;;  %v3501_v14 = vpop.f32.mrb[94].mxu0  ;;  %v3727_v35 = vadd.f32 %v6052_v18, %v4618_v3  ;;  %v3718_v21 = vpop.f32.mrb[159].mxu1  ;;  %v4021_v40 = vmul.f32 %v3724_v33, %v3724_v33  ;;  %v6245_v3 = vld [vmem:[#allocation17_spill] sm:$0xff] }
 0x338   :  { %3886 = vst [vmem:[#allocation7 + $0xe0] sm:$0xff] %v3716_v5  ;;  %v4019_v47 = vmul.f32 %v3716_v5, %v3716_v5  ;;  %v6131_v12 = vadd.f32 %v3501_v14, %v5969_v2  ;;  %v3503_v30 = vpop.f32.mrb[95].mxu0  ;;  %v3719_v31 = vadd.f32 %v6042_v8, %v3718_v21  ;;  %v6242_v2 = vld [vmem:[#allocation15_spill] sm:$0xff] }
 0x339   :  { %v3949_v20 = vadd.f32 %v3948_v16, %v3716_v5  ;;  %v4081_v42 = vadd.f32 %v4080_v49, %v4018_v50  ;;  %3889 = vst [vmem:[#allocation7 + $0xf8] sm:$0xff] %v3727_v35  ;;  %v6243_v8 = vld [vmem:[#allocation31_spill] sm:$0xff]  ;;  %v4022_v27 = vmul.f32 %v3727_v35, %v3727_v35 }
 0x33a   :  { %3887 = vst [vmem:[#allocation7 + $0xe8] sm:$0xff] %v3719_v31  ;;  %v4020_v63 = vmul.f32 %v3719_v31, %v3719_v31 }
 0x33b   :  { %v4082_v34 = vadd.f32 %v4081_v42, %v4019_v47  ;;  %v3950_v56 = vadd.f32 %v3949_v20, %v3719_v31  ;;  %v6246_v42 = vld [vmem:[#allocation18_spill] sm:$0xff] }
 0x33c   :  { %v4621_v23 = vpop.f32.mrb[160].mxu1 }
 0x33d   :  { %v3951_v52 = vadd.f32 %v3950_v56, %v3724_v33  ;;  %v4083_v18 = vadd.f32 %v4082_v34, %v4020_v63  ;;  %v3506_v53 = vpop.f32.mrb[96].mxu0  ;;  %v3740_v38 = vadd.f32 %v6066_v0, %v4621_v23  ;;  %v3731_v60 = vpop.f32.mrb[161].mxu1 }
 0x33e   :  { %v6136_v19 = vadd.f32 %v3506_v53, %v6242_v2  ;;  %v3508_v45 = vpop.f32.mrb[97].mxu0  ;;  %v3732_v7 = vadd.f32 %v6243_v8, %v3731_v60  ;;  %v4622_v58 = vpop.f32.mrb[162].mxu1  ;;  %v6247_v8 = vld [vmem:[#allocation19_spill] sm:$0xff] }
 0x33f   :  { %v4084_v1 = vadd.f32 %v4083_v18, %v4021_v40  ;;  %3892 = vst [vmem:[#allocation7 + $0x110] sm:$0xff] %v3740_v38  ;;  %v3952_v54 = vadd.f32 %v3951_v52, %v3727_v35  ;;  %v3509_v37 = vpop.f32.mrb[98].mxu0  ;;  %v3743_v61 = vadd.f32 %v6071_v46, %v4622_v58  ;;  %v3734_v29 = vpop.f32.mrb[163].mxu1  ;;  %v4025_v4 = vmul.f32 %v3740_v38, %v3740_v38 }
 0x340   :  { %3890 = vst [vmem:[#allocation7 + $0x100] sm:$0xff] %v3732_v7  ;;  %v4023_v6 = vmul.f32 %v3732_v7, %v3732_v7  ;;  %v6141_v0 = vadd.f32 %v3509_v37, %v6244_v13  ;;  %v3511_v62 = vpop.f32.mrb[99].mxu0  ;;  %v3735_v39 = vadd.f32 %v6061_v17, %v3734_v29 }
 0x341   :  { %v3953_v55 = vadd.f32 %v3952_v54, %v3732_v7  ;;  %v4085_v41 = vadd.f32 %v4084_v1, %v4022_v27  ;;  %3893 = vst [vmem:[#allocation7 + $0x118] sm:$0xff] %v3743_v61  ;;  %v4026_v14 = vmul.f32 %v3743_v61, %v3743_v61  ;;  %v6248_v62 = vld [vmem:[#allocation20_spill] sm:$0xff] }
 0x342   :  { %3891 = vst [vmem:[#allocation7 + $0x108] sm:$0xff] %v3735_v39  ;;  %v4024_v9 = vmul.f32 %v3735_v39, %v3735_v39 }
 0x343   :  { %v4086_v26 = vadd.f32 %v4085_v41, %v4023_v6  ;;  %v3954_v28 = vadd.f32 %v3953_v55, %v3735_v39 }
 0x344   :  { %v4625_v59 = vpop.f32.mrb[164].mxu1 }
 0x345   :  { %v3955_v33 = vadd.f32 %v3954_v28, %v3740_v38  ;;  %v4087_v46 = vadd.f32 %v4086_v26, %v4024_v9  ;;  %v3514_v15 = vpop.f32.mrb[100].mxu0  ;;  %v3756_v57 = vadd.f32 %v6086_v25, %v4625_v59  ;;  %v3747_v5 = vpop.f32.mrb[165].mxu1 }
 0x346   :  { %v6146_v50 = vadd.f32 %v3514_v15, %v6245_v3  ;;  %v3516_v49 = vpop.f32.mrb[101].mxu0  ;;  %v3748_v17 = vadd.f32 %v6076_v22, %v3747_v5  ;;  %v4626_v16 = vpop.f32.mrb[166].mxu1  ;;  %v6249_v5 = vld [vmem:[#allocation21_spill] sm:$0xff] }
 0x347   :  { %v4088_v35 = vadd.f32 %v4087_v46, %v4025_v4  ;;  %3896 = vst [vmem:[#allocation7 + $0x130] sm:$0xff] %v3756_v57  ;;  %v3956_v21 = vadd.f32 %v3955_v33, %v3743_v61  ;;  %v3517_v47 = vpop.f32.mrb[102].mxu0  ;;  %v3759_v30 = vadd.f32 %v6091_v32, %v4626_v16  ;;  %v3750_v31 = vpop.f32.mrb[167].mxu1  ;;  %v4029_v53 = vmul.f32 %v3756_v57, %v3756_v57 }
 0x348   :  { %3894 = vst [vmem:[#allocation7 + $0x120] sm:$0xff] %v3748_v17  ;;  %v4027_v20 = vmul.f32 %v3748_v17, %v3748_v17  ;;  %v6151_v25 = vadd.f32 %v3517_v47, %v6246_v42  ;;  %v3519_v63 = vpop.f32.mrb[103].mxu0  ;;  %v3751_v34 = vadd.f32 %v6081_v43, %v3750_v31 }
 0x349   :  { %v3957_v56 = vadd.f32 %v3956_v21, %v3748_v17  ;;  %v4089_v23 = vadd.f32 %v4088_v35, %v4026_v14  ;;  %3897 = vst [vmem:[#allocation7 + $0x138] sm:$0xff] %v3759_v30  ;;  %v4030_v1 = vmul.f32 %v3759_v30, %v3759_v30 }
 0x34a   :  { %3895 = vst [vmem:[#allocation7 + $0x128] sm:$0xff] %v3751_v34  ;;  %v4028_v22 = vmul.f32 %v3751_v34, %v3751_v34 }
 0x34b   :  { %v4090_v40 = vadd.f32 %v4089_v23, %v4027_v20  ;;  %v3958_v52 = vadd.f32 %v3957_v56, %v3751_v34  ;;  %v6250_v20 = vld [vmem:[#allocation22_spill] sm:$0xff] }
 0x34c   :  { %v4629_v18 = vpop.f32.mrb[168].mxu1 }
 0x34d   :  { %v3959_v38 = vadd.f32 %v3958_v52, %v3756_v57  ;;  %v4091_v32 = vadd.f32 %v4090_v40, %v4028_v22  ;;  %v3522_v60 = vpop.f32.mrb[104].mxu0  ;;  %v3772_v2 = vadd.f32 %v6106_v24, %v4629_v18  ;;  %v3763_v45 = vpop.f32.mrb[169].mxu1 }
 0x34e   :  { %v6156_v7 = vadd.f32 %v3522_v60, %v6247_v8  ;;  %v3524_v58 = vpop.f32.mrb[105].mxu0  ;;  %v3764_v43 = vadd.f32 %v6096_v51, %v3763_v45  ;;  %v4630_v27 = vpop.f32.mrb[170].mxu1  ;;  %v6251_v60 = vld [vmem:[#allocation23_spill] sm:$0xff] }
 0x34f   :  { %v4092_v54 = vadd.f32 %v4091_v32, %v4029_v53  ;;  %3900 = vst [vmem:[#allocation7 + $0x150] sm:$0xff] %v3772_v2  ;;  %v3960_v37 = vadd.f32 %v3959_v38, %v3759_v30  ;;  %v3525_v61 = vpop.f32.mrb[106].mxu0  ;;  %v3775_v29 = vadd.f32 %v6111_v11, %v4630_v27  ;;  %v3766_v6 = vpop.f32.mrb[171].mxu1  ;;  %v4033_v4 = vmul.f32 %v3772_v2, %v3772_v2 }
 0x350   :  { %3898 = vst [vmem:[#allocation7 + $0x140] sm:$0xff] %v3764_v43  ;;  %v4031_v13 = vmul.f32 %v3764_v43, %v3764_v43  ;;  %v6161_v24 = vadd.f32 %v3525_v61, %v6248_v62  ;;  %v3527_v39 = vpop.f32.mrb[107].mxu0  ;;  %v3767_v55 = vadd.f32 %v6101_v36, %v3766_v6 }
 0x351   :  { %v3961_v41 = vadd.f32 %v3960_v37, %v3764_v43  ;;  %v4093_v9 = vadd.f32 %v4092_v54, %v4030_v1  ;;  %3901 = vst [vmem:[#allocation7 + $0x158] sm:$0xff] %v3775_v29  ;;  %v4034_v16 = vmul.f32 %v3775_v29, %v3775_v29 }
 0x352   :  { %3899 = vst [vmem:[#allocation7 + $0x148] sm:$0xff] %v3767_v55  ;;  %v4032_v51 = vmul.f32 %v3767_v55, %v3767_v55 }
 0x353   :  { %v4094_v26 = vadd.f32 %v4093_v9, %v4031_v13  ;;  %v3962_v28 = vadd.f32 %v3961_v41, %v3767_v55 }
 0x354   :  { %v4633_v59 = vpop.f32.mrb[172].mxu1 }
 0x355   :  { %v3963_v33 = vadd.f32 %v3962_v28, %v3772_v2  ;;  %v4095_v11 = vadd.f32 %v4094_v26, %v4032_v51  ;;  %v3530_v46 = vpop.f32.mrb[108].mxu0  ;;  %v3788_v15 = vadd.f32 %v6126_v10, %v4633_v59  ;;  %v3779_v57 = vpop.f32.mrb[173].mxu1 }
 0x356   :  { %v4737_v3 = vadd.f32 %v3530_v46, %v6249_v5  ;;  %v3532_v49 = vpop.f32.mrb[109].mxu0  ;;  %v3780_v36 = vadd.f32 %v6116_v44, %v3779_v57  ;;  %v4634_v17 = vpop.f32.mrb[174].mxu1 }
 0x357   :  { %v4096_v14 = vadd.f32 %v4095_v11, %v4033_v4  ;;  %3904 = vst [vmem:[#allocation7 + $0x170] sm:$0xff] %v3788_v15  ;;  %v3964_v35 = vadd.f32 %v3963_v33, %v3775_v29  ;;  %v3533_v21 = vpop.f32.mrb[110].mxu0  ;;  %v3791_v47 = vadd.f32 %v6131_v12, %v4634_v17  ;;  %v3782_v30 = vpop.f32.mrb[175].mxu1  ;;  %v4037_v52 = vmul.f32 %v3788_v15, %v3788_v15  ;;  %v6252_v29 = vld [vmem:[#allocation24_spill] sm:$0xff]  ;;  %v6253_v33 = vld [vmem:[#allocation25_spill] sm:$0xff] }
 0x358   :  { %3902 = vst [vmem:[#allocation7 + $0x160] sm:$0xff] %v3780_v36  ;;  %v4035_v31 = vmul.f32 %v3780_v36, %v3780_v36  ;;  %v4738_v42 = vadd.f32 %v3533_v21, %v6250_v20  ;;  %v3535_v10 = vpop.f32.mrb[111].mxu0  ;;  %v3783_v63 = vadd.f32 %v6121_v48, %v3782_v30 }
 0x359   :  { %v3965_v34 = vadd.f32 %v3964_v35, %v3780_v36  ;;  %v4097_v56 = vadd.f32 %v4096_v14, %v4034_v16  ;;  %3905 = vst [vmem:[#allocation7 + $0x178] sm:$0xff] %v3791_v47  ;;  %v4038_v58 = vmul.f32 %v3791_v47, %v3791_v47  ;;  %v6254_v35 = vld [vmem:[#allocation26_spill] sm:$0xff] }
 0x35a   :  { %3903 = vst [vmem:[#allocation7 + $0x168] sm:$0xff] %v3783_v63  ;;  %v4036_v44 = vmul.f32 %v3783_v63, %v3783_v63 }
 0x35b   :  { %v4098_v23 = vadd.f32 %v4097_v56, %v4035_v31  ;;  %v3966_v22 = vadd.f32 %v3965_v34, %v3783_v63 }
 0x35c   :  { %v4637_v40 = vpop.f32.mrb[176].mxu1 }
 0x35d   :  { %v3967_v18 = vadd.f32 %v3966_v22, %v3788_v15  ;;  %v4099_v53 = vadd.f32 %v4098_v23, %v4036_v44  ;;  %v3538_v12 = vpop.f32.mrb[112].mxu0  ;;  %v3804_v38 = vadd.f32 %v6146_v50, %v4637_v40  ;;  %v3795_v32 = vpop.f32.mrb[177].mxu1  ;;  %v6255_v40 = vld [vmem:[#allocation27_spill] sm:$0xff] }
 0x35e   :  { %v4739_v2 = vadd.f32 %v3538_v12, %v6251_v60  ;;  %v3540_v45 = vpop.f32.mrb[113].mxu0  ;;  %v3796_v48 = vadd.f32 %v6136_v19, %v3795_v32  ;;  %v4638_v8 = vpop.f32.mrb[178].mxu1 }
 0x35f   :  { %v4100_v43 = vadd.f32 %v4099_v53, %v4037_v52  ;;  %3908 = vst [vmem:[#allocation7 + $0x190] sm:$0xff] %v3804_v38  ;;  %v3968_v27 = vadd.f32 %v3967_v18, %v3791_v47  ;;  %v3541_v1 = vpop.f32.mrb[114].mxu0  ;;  %v3807_v54 = vadd.f32 %v6151_v25, %v4638_v8  ;;  %v3798_v37 = vpop.f32.mrb[179].mxu1  ;;  %v4041_v51 = vmul.f32 %v3804_v38, %v3804_v38 }
 0x360   :  { %3906 = vst [vmem:[#allocation7 + $0x180] sm:$0xff] %v3796_v48  ;;  %v4039_v61 = vmul.f32 %v3796_v48, %v3796_v48  ;;  %v4740_v6 = vadd.f32 %v3541_v1, %v6252_v29  ;;  %v3543_v50 = vpop.f32.mrb[115].mxu0  ;;  %v3799_v13 = vadd.f32 %v6141_v0, %v3798_v37 }
 0x361   :  { %v3969_v62 = vadd.f32 %v3968_v27, %v3796_v48  ;;  %v4101_v39 = vadd.f32 %v4100_v43, %v4038_v58  ;;  %3909 = vst [vmem:[#allocation7 + $0x198] sm:$0xff] %v3807_v54  ;;  %v4042_v57 = vmul.f32 %v3807_v54, %v3807_v54  ;;  %v6256_v58 = vld [vmem:[#allocation28_spill] sm:$0xff] }
 0x362   :  { %3907 = vst [vmem:[#allocation7 + $0x188] sm:$0xff] %v3799_v13  ;;  %v4040_v19 = vmul.f32 %v3799_v13, %v3799_v13 }
 0x363   :  { %v4102_v55 = vadd.f32 %v4101_v39, %v4039_v61  ;;  %v3970_v41 = vadd.f32 %v3969_v62, %v3799_v13 }
 0x364   :  { %v4641_v9 = vpop.f32.mrb[180].mxu1 }
 0x365   :  { %v3971_v26 = vadd.f32 %v3970_v41, %v3804_v38  ;;  %v4103_v28 = vadd.f32 %v4102_v55, %v4040_v19  ;;  %v3546_v25 = vpop.f32.mrb[116].mxu0  ;;  %v3820_v59 = vadd.f32 %v4737_v3, %v4641_v9  ;;  %v3811_v4 = vpop.f32.mrb[181].mxu1  ;;  %v6257_v41 = vld [vmem:[#allocation29_spill] sm:$0xff] }
 0x366   :  { %v4741_v11 = vadd.f32 %v3546_v25, %v6253_v33  ;;  %v3548_v46 = vpop.f32.mrb[117].mxu0  ;;  %v3812_v15 = vadd.f32 %v6156_v7, %v3811_v4  ;;  %v4642_v0 = vpop.f32.mrb[182].mxu1 }
 0x367   :  { %v4104_v5 = vadd.f32 %v4103_v28, %v4041_v51  ;;  %3912 = vst [vmem:[#allocation7 + $0x1b0] sm:$0xff] %v3820_v59  ;;  %v3972_v49 = vadd.f32 %v3971_v26, %v3807_v54  ;;  %v3549_v36 = vpop.f32.mrb[118].mxu0  ;;  %v3823_v17 = vadd.f32 %v4738_v42, %v4642_v0  ;;  %v3814_v16 = vpop.f32.mrb[183].mxu1  ;;  %v4045_v34 = vmul.f32 %v3820_v59, %v3820_v59 }
 0x368   :  { %3910 = vst [vmem:[#allocation7 + $0x1a0] sm:$0xff] %v3812_v15  ;;  %v4043_v14 = vmul.f32 %v3812_v15, %v3812_v15  ;;  %v4742_v21 = vadd.f32 %v3549_v36, %v6254_v35  ;;  %v3551_v47 = vpop.f32.mrb[119].mxu0  ;;  %v3815_v3 = vadd.f32 %v6161_v24, %v3814_v16 }
 0x369   :  { %v3973_v30 = vadd.f32 %v3972_v49, %v3812_v15  ;;  %v4105_v31 = vadd.f32 %v4104_v5, %v4042_v57  ;;  %3913 = vst [vmem:[#allocation7 + $0x1b8] sm:$0xff] %v3823_v17  ;;  %v4046_v24 = vmul.f32 %v3823_v17, %v3823_v17  ;;  %v6258_v15 = vld [vmem:[#allocation30_spill] sm:$0xff] }
 0x36a   :  { %3911 = vst [vmem:[#allocation7 + $0x1a8] sm:$0xff] %v3815_v3  ;;  %v4044_v7 = vmul.f32 %v3815_v3, %v3815_v3 }
 0x36b   :  { %v4106_v20 = vadd.f32 %v4105_v31, %v4043_v14  ;;  %v3974_v10 = vadd.f32 %v3973_v30, %v3815_v3 }
 0x36c   :  { %v4645_v63 = vpop.f32.mrb[184].mxu1 }
 0x36d   :  { %v3975_v56 = vadd.f32 %v3974_v10, %v3820_v59  ;;  %v4107_v44 = vadd.f32 %v4106_v20, %v4044_v7  ;;  %v3554_v42 = vpop.f32.mrb[120].mxu0  ;;  %v3836_v23 = vadd.f32 %v4741_v11, %v4645_v63  ;;  %v3827_v22 = vpop.f32.mrb[185].mxu1 }
 0x36e   :  { %v4743_v52 = vadd.f32 %v3554_v42, %v6255_v40  ;;  %v3556_v18 = vpop.f32.mrb[121].mxu0  ;;  %v3828_v53 = vadd.f32 %v4739_v2, %v3827_v22  ;;  %v4646_v12 = vpop.f32.mrb[186].mxu1 }
 0x36f   :  { %v4108_v38 = vadd.f32 %v4107_v44, %v4045_v34  ;;  %3916 = vst [vmem:[#allocation7 + $0x1d0] sm:$0xff] %v3836_v23  ;;  %v3976_v32 = vadd.f32 %v3975_v56, %v3823_v17  ;;  %v3557_v60 = vpop.f32.mrb[122].mxu0  ;;  %v3839_v45 = vadd.f32 %v4742_v21, %v4646_v12  ;;  %v3830_v48 = vpop.f32.mrb[187].mxu1  ;;  %v4049_v13 = vmul.f32 %v3836_v23, %v3836_v23 }
 0x370   :  { %3914 = vst [vmem:[#allocation7 + $0x1c0] sm:$0xff] %v3828_v53  ;;  %v4047_v8 = vmul.f32 %v3828_v53, %v3828_v53  ;;  %v4744_v43 = vadd.f32 %v3557_v60, %v6256_v58  ;;  %v3559_v27 = vpop.f32.mrb[123].mxu0  ;;  %v3831_v1 = vadd.f32 %v4740_v6, %v3830_v48 }
 0x371   :  { %v3977_v54 = vadd.f32 %v3976_v32, %v3828_v53  ;;  %v4109_v37 = vadd.f32 %v4108_v38, %v4046_v24  ;;  %3917 = vst [vmem:[#allocation7 + $0x1d8] sm:$0xff] %v3839_v45  ;;  %v4050_v6 = vmul.f32 %v3839_v45, %v3839_v45 }
 0x372   :  { %3915 = vst [vmem:[#allocation7 + $0x1c8] sm:$0xff] %v3831_v1  ;;  %v4048_v61 = vmul.f32 %v3831_v1, %v3831_v1 }
 0x373   :  { %v4110_v2 = vadd.f32 %v4109_v37, %v4047_v8  ;;  %v3978_v29 = vadd.f32 %v3977_v54, %v3831_v1 }
 0x374   :  { %v4649_v50 = vpop.f32.mrb[188].mxu1 }
 0x375   :  { %v3979_v62 = vadd.f32 %v3978_v29, %v3836_v23  ;;  %v4111_v39 = vadd.f32 %v4110_v2, %v4048_v61  ;;  %v3562_v19 = vpop.f32.mrb[124].mxu0  ;;  %v3843_v55 = vpop.f32.mrb[189].mxu1 }
 0x376   :  { %v4745_v9 = vadd.f32 %v3562_v19, %v6257_v41  ;;  %v3564_v51 = vpop.f32.mrb[125].mxu0  ;;  %v3844_v26 = vadd.f32 %v4743_v52, %v3843_v55  ;;  %v4650_v28 = vpop.f32.mrb[190].mxu1 }
 0x377   :  { %v4112_v25 = vadd.f32 %v4111_v39, %v4049_v13  ;;  %v3980_v59 = vadd.f32 %v3979_v62, %v3839_v45  ;;  %v3565_v4 = vpop.f32.mrb[126].mxu0  ;;  %v3846_v33 = vpop.f32.mrb[191].mxu1 }
 0x378   :  { %v3852_v11 = vadd.f32 %v4745_v9, %v4649_v50  ;;  %3918 = vst [vmem:[#allocation7 + $0x1e0] sm:$0xff] %v3844_v26  ;;  %v4051_v46 = vmul.f32 %v3844_v26, %v3844_v26  ;;  %v4746_v0 = vadd.f32 %v3565_v4, %v6258_v15  ;;  %v3567_v57 = vpop.f32.mrb[127].mxu0  ;;  %v3847_v5 = vadd.f32 %v4744_v43, %v3846_v33 }
 0x379   :  { %v3981_v49 = vadd.f32 %v3980_v59, %v3844_v26  ;;  %v4113_v36 = vadd.f32 %v4112_v25, %v4050_v6 }
 0x37a   :  { %3920 = vst [vmem:[#allocation7 + $0x1f0] sm:$0xff] %v3852_v11  ;;  %v3855_v17 = vadd.f32 %v4746_v0, %v4650_v28  ;;  %3919 = vst [vmem:[#allocation7 + $0x1e8] sm:$0xff] %v3847_v5  ;;  %v4052_v16 = vmul.f32 %v3847_v5, %v3847_v5  ;;  %v4053_v21 = vmul.f32 %v3852_v11, %v3852_v11 }
 0x37b   :  { %v4114_v14 = vadd.f32 %v4113_v36, %v4051_v46  ;;  %v3982_v35 = vadd.f32 %v3981_v49, %v3847_v5 }
 0x37c   :  { %3921 = vst [vmem:[#allocation7 + $0x1f8] sm:$0xff] %v3855_v17 }
 0x37d   :  { %v3983_v47 = vadd.f32 %v3982_v35, %v3852_v11  ;;  %v4115_v3 = vadd.f32 %v4114_v14, %v4052_v16 }
 0x37e   :  { %5558 = shalt.err (!%p5555_p6)
}
 0x37f   :  { %s5559_s20 = scalar_lea.hbm %s6222_s2, 8192 }
 0x380   :  { %p5560_p7 = scmp.ne.s32.totalorder %s6222_s2, %s5559_s20  ;;  %p5563_p8 = scmp.lt.u32.totalorder %s5559_s20, %s6222_s2 }
 0x382   :  { %p5565_p9 = pnand %p5563_p8, %p5560_p7 }
 0x384   :  { %5568 = shalt.err (!%p5565_p9)
}
 0x385   :  { %s5629_s25 = smov 128   ;;  %s5630_s26 = smov 8   ;;  %v4054_v30 = vmul.f32 %v3855_v17, %v3855_v17  ;;  %v3984_v31 = vadd.f32 %v3983_v47, %v3855_v17  ;;  %v4116_v7 = vadd.f32 %v4115_v3, %v4053_v21 }
 0x386   :  { %4137 = dma.vmem_to_hbm [thread:$0]  %s4132_s16, 8192, %s6222_s2, [#allocation4], %s5629_s25, %s5629_s25, %s5630_s26  }
 0x387   :  { %v4117_v20 = vadd.f32 %v4116_v7, %v4054_v30  ;;  %v3985_v10 = vrot.slane %v3984_v31, 4  ;;  %s5631_s29 = smov [#allocation8]   ;;  %s5632_s5 = smov [#allocation10]  }
 0x388   :  { %s4144_s30 = sshll.u32 %s5631_s29, 4  ;;  %s4154_s6 = sshll.u32 %s5632_s5, 4  ;;  %s4145_s30 = int_to_ptr.vmem [resolvable:$true] %s4144_s30  ;;  %s4155_s6 = int_to_ptr.vmem [resolvable:$true] %s4154_s6 }
 0x389   :  { %v3986_v63 = vadd.f32 %v3985_v10, %v3984_v31  ;;  %v4118_v34 = vrot.slane %v4117_v20, 4  ;;  %s5569_s2 = scalar_lea.vmem %s4145_s30, 128  ;;  %p5574_p11 = scmp.lt.s32.totalorder %s4145_s30, %s4145_s30 }
 0x38a   :  { %p5570_p10 = scmp.ne.s32.totalorder %s4145_s30, %s5569_s2  ;;  %p5575_p12 = scmp.lt.s32.totalorder %s5569_s2, %s5569_s2 }
 0x38b   :  { %v3987_v56 = vrot.slane %v3986_v63, 2  ;;  %v4119_v44 = vadd.f32 %v4118_v34, %v4117_v20 }
 0x38c   :  { %p5576_p13 = por %p5575_p12, %p5574_p11 }
 0x38d   :  { %v3988_v42 = vadd.f32 %v3987_v56, %v3986_v63  ;;  %v4120_v23 = vrot.slane %v4119_v44, 2 }
 0x38e   :  { %p5577_p0 = pnand %p5576_p13, %p5570_p10 }
 0x38f   :  { %v3989_v22 = vrot.slane %v3988_v42, 1  ;;  %v4121_v40 = vadd.f32 %v4120_v23, %v4119_v44 }
 0x391   :  { %v3990_v52 = vadd.f32 %v3989_v22, %v3988_v42  ;;  %v4122_v18 = vrot.slane %v4121_v40, 1 }
 0x393   :  { %4124 = vst [vmem:[#allocation8] sm:$0xff] %v3990_v52  ;;  %v4123_v53 = vadd.f32 %v4122_v18, %v4121_v40 }
 0x394   :  { %5580 = shalt.err (!%p5577_p0)
}
 0x395   :  { %s5581_s9 = scalar_lea.hbm %s6223_s3, 128 }
 0x396   :  { %p5582_p1 = scmp.ne.s32.totalorder %s6223_s3, %s5581_s9  ;;  %p5585_p2 = scmp.lt.u32.totalorder %s5581_s9, %s6223_s3 }
 0x398   :  { %p5587_p3 = pnand %p5585_p2, %p5582_p1 }
 0x39a   :  { %5590 = shalt.err (!%p5587_p3)
}
 0x39b   :  { %4147 = dma.vmem_to_hbm [thread:$0]  %s4145_s30, 128, %s6223_s3, [#allocation9]   ;;  %4125 = vst [vmem:[#allocation10] sm:$0xff] %v4123_v53 }
 0x39c   :  { %s5591_s15 = scalar_lea.vmem %s4155_s6, 128  ;;  %p5596_p5 = scmp.lt.s32.totalorder %s4155_s6, %s4155_s6 }
 0x39d   :  { %p5592_p4 = scmp.ne.s32.totalorder %s4155_s6, %s5591_s15  ;;  %p5597_p6 = scmp.lt.s32.totalorder %s5591_s15, %s5591_s15 }
 0x39f   :  { %p5598_p7 = por %p5597_p6, %p5596_p5 }
 0x3a1   :  { %p5599_p8 = pnand %p5598_p7, %p5592_p4 }
 0x3a3   :  { %5602 = shalt.err (!%p5599_p8)
}
 0x3a4   :  { %s5603_s17 = scalar_lea.hbm %s6224_s4, 128 }
 0x3a5   :  { %p5604_p9 = scmp.ne.s32.totalorder %s6224_s4, %s5603_s17  ;;  %p5607_p10 = scmp.lt.u32.totalorder %s5603_s17, %s6224_s4 }
 0x3a7   :  { %p5609_p11 = pnand %p5607_p10, %p5604_p9 }
 0x3a9   :  { %5612 = shalt.err (!%p5609_p11)
}
 0x3aa   :  { %4157 = dma.vmem_to_hbm [thread:$0]  %s4155_s6, 128, %s6224_s4, [#allocation9]  }
 0x3ab   :  { %5617 = dma.done.wait [#allocation4], 8192  }
 0x3ac   :  { %5618 = vsyncadd [#allocation4], 4294959104 }
 0x3ad   :  { %5619 = dma.done.wait [#allocation9], 256  }
 0x3ae   :  { %5620 = vsyncadd [#allocation9], 4294967040 }
 0x3af   :  { %4167 = vsyncpa [#allocation3], 1 }
 0x3b0   :  { %4168 = vsyncpa [#allocation6], 1 }
 0x3b1   :  { %4169 = vsyncpa [#allocation4], 1 }
 0x3b2   :  { %4170 = vsyncpa [#allocation9], 1 }

// kernel: basic_block_forward.7
= control target key start
LH: loop header
LB: loop body
LE: loop exit
PB: predicated region body
PF: predicated region fallthrough
CT: control target
= control target key end

     0   :  { %9 = vsyncpa [#allocation3], 0  ;;  %s924_s0 = inlined_call_operand.hbm [shape: f32[512,128], index: 0, kind: input, shape index: {}]   ;;  %s925_s1 = inlined_call_operand.hbm [shape: f32[1,128], index: 1, kind: input, shape index: {}]   ;;  %s926_s2 = inlined_call_operand.hbm [shape: f32[1,128], index: 2, kind: input, shape index: {}]   ;;  %s927_s3 = inlined_call_operand.hbm [shape: f32[512,128], index: 3, kind: input, shape index: {}]   ;;  %s928_s4 = inlined_call_operand.hbm [shape: f32[512,128], index: 4, kind: output, shape index: {}]  }
   0x1   :  { %10 = vsyncpa [#allocation6], 0 }
   0x2   :  { %11 = vsyncpa [#allocation9], 0 }
   0x3   :  { %12 = vsyncpa [#allocation4], 0  ;;  %s677_s15 = smov [#allocation5]   ;;  %s678_s17 = smov [#allocation2]  }
   0x4   :  { %s31_s16 = sshll.u32 %s677_s15, 4  ;;  %s18_s18 = sshll.u32 %s678_s17, 4  ;;  %s32_s16 = int_to_ptr.vmem [resolvable:$true] %s31_s16  ;;  %s709_s18 = int_to_ptr.vmem [resolvable:$true] %s18_s18 }
   0x5   :  { %s559_s21 = scalar_lea.hbm %s925_s1, 16 }
   0x6   :  { %p560_p0 = scmp.ne.s32.totalorder %s925_s1, %s559_s21  ;;  %p563_p1 = scmp.lt.u32.totalorder %s559_s21, %s925_s1 }
   0x8   :  { %p565_p2 = pnand %p563_p1, %p560_p0 }
   0xa   :  { %568 = shalt.err (!%p565_p2)
}
   0xb   :  { %s569_s26 = scalar_lea.vmem %s32_s16, 16  ;;  %s573_s27 = scalar_lea.vmem %s32_s16, 32 }
   0xc   :  { %p570_p3 = scmp.ne.s32.totalorder %s32_s16, %s569_s26  ;;  %p574_p4 = scmp.lt.s32.totalorder %s32_s16, %s32_s16 }
   0xd   :  { %p575_p5 = scmp.lt.s32.totalorder %s573_s27, %s569_s26 }
   0xf   :  { %p576_p6 = por %p575_p5, %p574_p4 }
  0x11   :  { %p577_p7 = pnand %p576_p6, %p570_p3 }
  0x13   :  { %580 = shalt.err (!%p577_p7)
}
  0x14   :  { %34 = dma.hbm_to_vmem [thread:$0]  %s925_s1, 16, %s32_s16, [#allocation6]  }
  0x15   :  { %s581_s6 = scalar_lea.hbm %s924_s0, 8192 }
  0x16   :  { %p582_p8 = scmp.ne.s32.totalorder %s924_s0, %s581_s6  ;;  %p585_p9 = scmp.lt.u32.totalorder %s581_s6, %s924_s0 }
  0x18   :  { %p587_p10 = pnand %p585_p9, %p582_p8 }
  0x1a   :  { %590 = shalt.err (!%p587_p10)
}
  0x1b   :  { %s591_s11 = scalar_lea.vmem %s709_s18, 8192  ;;  %p596_p12 = scmp.lt.s32.totalorder %s709_s18, %s709_s18 }
  0x1c   :  { %p592_p11 = scmp.ne.s32.totalorder %s709_s18, %s591_s11  ;;  %p597_p13 = scmp.lt.s32.totalorder %s591_s11, %s591_s11 }
  0x1e   :  { %p598_p0 = por %p597_p13, %p596_p12 }
  0x20   :  { %p599_p1 = pnand %p598_p0, %p592_p11 }
  0x22   :  { %602 = shalt.err (!%p599_p1)
}
  0x23   :  { %s679_s1 = smov 128   ;;  %s680_s12 = smov 8  }
  0x24   :  { %24 = dma.hbm_to_vmem [thread:$0]  %s924_s0, 8192, %s709_s18, [#allocation3], %s679_s1, %s679_s1, %s680_s12  }
  0x25   :  { %s681_s15 = smov [#allocation7]   ;;  %s682_s17 = smov [#allocation8]  }
  0x26   :  { %s41_s16 = sshll.u32 %s681_s15, 4  ;;  %s50_s19 = sshll.u32 %s682_s17, 4  ;;  %s42_s16 = int_to_ptr.vmem [resolvable:$true] %s41_s16  ;;  %s743_s19 = int_to_ptr.vmem [resolvable:$true] %s50_s19 }
  0x27   :  { %s603_s22 = scalar_lea.hbm %s926_s2, 16 }
  0x28   :  { %p604_p2 = scmp.ne.s32.totalorder %s926_s2, %s603_s22  ;;  %p607_p3 = scmp.lt.u32.totalorder %s603_s22, %s926_s2 }
  0x2a   :  { %p609_p4 = pnand %p607_p3, %p604_p2 }
  0x2c   :  { %612 = shalt.err (!%p609_p4)
}
  0x2d   :  { %s613_s0 = scalar_lea.vmem %s42_s16, 16  ;;  %s617_s18 = scalar_lea.vmem %s42_s16, 32 }
  0x2e   :  { %p614_p5 = scmp.ne.s32.totalorder %s42_s16, %s613_s0  ;;  %p618_p6 = scmp.lt.s32.totalorder %s42_s16, %s42_s16 }
  0x2f   :  { %p619_p7 = scmp.lt.s32.totalorder %s617_s18, %s613_s0 }
  0x31   :  { %p620_p8 = por %p619_p7, %p618_p6 }
  0x33   :  { %p621_p9 = pnand %p620_p8, %p614_p5 }
  0x35   :  { %624 = shalt.err (!%p621_p9)
}
  0x36   :  { %44 = dma.hbm_to_vmem [thread:$0]  %s926_s2, 16, %s42_s16, [#allocation6]  }
  0x37   :  { %s625_s5 = scalar_lea.hbm %s927_s3, 8192 }
  0x38   :  { %p626_p10 = scmp.ne.s32.totalorder %s927_s3, %s625_s5  ;;  %p629_p11 = scmp.lt.u32.totalorder %s625_s5, %s927_s3 }
  0x3a   :  { %p631_p12 = pnand %p629_p11, %p626_p10 }
  0x3c   :  { %634 = shalt.err (!%p631_p12)
}
  0x3d   :  { %s635_s10 = scalar_lea.vmem %s743_s19, 8192  ;;  %p640_p0 = scmp.lt.s32.totalorder %s743_s19, %s743_s19 }
  0x3e   :  { %p636_p13 = scmp.ne.s32.totalorder %s743_s19, %s635_s10  ;;  %p641_p1 = scmp.lt.s32.totalorder %s635_s10, %s635_s10 }
  0x40   :  { %p642_p2 = por %p641_p1, %p640_p0 }
  0x42   :  { %p643_p3 = pnand %p642_p2, %p636_p13 }
  0x44   :  { %646 = shalt.err (!%p643_p3)
}
  0x45   :  { %56 = dma.hbm_to_vmem [thread:$0]  %s927_s3, 8192, %s743_s19, [#allocation9], %s679_s1, %s679_s1, %s680_s12  }
  0x46   :  { %669 = dma.done.wait [#allocation3], 8192  }
  0x47   :  { %670 = vsyncadd [#allocation3], 4294959104 }
  0x48   :  { %671 = dma.done.wait [#allocation6], 32  }
  0x49   :  { %672 = vsyncadd [#allocation6], 4294967264 }
  0x4a   :  { %673 = dma.done.wait [#allocation9], 8192  }
  0x4b   :  { %674 = vsyncadd [#allocation9], 4294959104  ;;  %v69_v0 = vld [vmem:[#allocation2] sm:$0xff]  ;;  %v70_v4 = vld [vmem:[#allocation2 + $0x8] sm:$0xff]  ;;  %s683_s3 = smov [#allocation10]  }
  0x4c   :  { %v777_v1 = vld [vmem:[#allocation5] ss:$0 sm:$0xff]  ;;  %v779_v2 = vld [vmem:[#allocation7] ss:$0 sm:$0xff]  ;;  %v275_v5 = vld [vmem:[#allocation8] sm:$0xff]  ;;  %s536_s13 = sshll.u32 %s683_s3, 4  ;;  %s537_s13 = int_to_ptr.vmem [resolvable:$true] %s536_s13 }
  0x4d   :  { %v140_v3 = vmul.f32 %v777_v1, %v69_v0  ;;  %v141_v6 = vmul.f32 %v777_v1, %v70_v4  ;;  %v71_v7 = vld [vmem:[#allocation2 + $0x10] sm:$0xff]  ;;  %v72_v8 = vld [vmem:[#allocation2 + $0x18] sm:$0xff]  ;;  %v73_v14 = vld [vmem:[#allocation2 + $0x20] sm:$0xff]  ;;  %s647_s14 = scalar_lea.vmem %s537_s13, 8192  ;;  %p652_p5 = scmp.lt.s32.totalorder %s537_s13, %s537_s13 }
  0x4e   :  { %v276_v10 = vld [vmem:[#allocation8 + $0x8] sm:$0xff]  ;;  %v142_v11 = vmul.f32 %v777_v1, %v71_v7  ;;  %v277_v12 = vld [vmem:[#allocation8 + $0x10] sm:$0xff]  ;;  %v143_v13 = vmul.f32 %v777_v1, %v72_v8  ;;  %v278_v16 = vld [vmem:[#allocation8 + $0x18] sm:$0xff]  ;;  %v144_v17 = vmul.f32 %v777_v1, %v73_v14  ;;  %p648_p4 = scmp.ne.s32.totalorder %s537_s13, %s647_s14  ;;  %p653_p6 = scmp.lt.s32.totalorder %s647_s14, %s647_s14 }
  0x4f   :  { %v211_v9 = vadd.f32 %v779_v2, %v140_v3  ;;  %v212_v15 = vadd.f32 %v779_v2, %v141_v6  ;;  %v74_v18 = vld [vmem:[#allocation2 + $0x28] sm:$0xff]  ;;  %v75_v19 = vld [vmem:[#allocation2 + $0x30] sm:$0xff]  ;;  %v76_v25 = vld [vmem:[#allocation2 + $0x38] sm:$0xff] }
  0x50   :  { %v213_v21 = vadd.f32 %v779_v2, %v142_v11  ;;  %v214_v22 = vadd.f32 %v779_v2, %v143_v13  ;;  %v279_v23 = vld [vmem:[#allocation8 + $0x20] sm:$0xff]  ;;  %v145_v24 = vmul.f32 %v777_v1, %v74_v18  ;;  %v215_v27 = vadd.f32 %v779_v2, %v144_v17  ;;  %v280_v28 = vld [vmem:[#allocation8 + $0x28] sm:$0xff]  ;;  %v281_v36 = vld [vmem:[#allocation8 + $0x30] sm:$0xff]  ;;  %p654_p7 = por %p653_p6, %p652_p5 }
  0x51   :  { %v339_v20 = vadd.f32 %v275_v5, %v211_v9  ;;  %v340_v26 = vadd.f32 %v276_v10, %v212_v15  ;;  %v146_v29 = vmul.f32 %v777_v1, %v75_v19  ;;  %v147_v30 = vmul.f32 %v777_v1, %v76_v25  ;;  %v77_v31 = vld [vmem:[#allocation2 + $0x40] sm:$0xff]  ;;  %v78_v38 = vld [vmem:[#allocation2 + $0x48] sm:$0xff]  ;;  %v79_v43 = vld [vmem:[#allocation2 + $0x50] sm:$0xff] }
  0x52   :  { %v341_v33 = vadd.f32 %v277_v12, %v213_v21  ;;  %v342_v34 = vadd.f32 %v278_v16, %v214_v22  ;;  %v216_v35 = vadd.f32 %v779_v2, %v145_v24  ;;  %v282_v37 = vld [vmem:[#allocation8 + $0x38] sm:$0xff]  ;;  %v343_v40 = vadd.f32 %v279_v23, %v215_v27  ;;  %v283_v53 = vld [vmem:[#allocation8 + $0x40] sm:$0xff]  ;;  %v284_v58 = vld [vmem:[#allocation8 + $0x48] sm:$0xff]  ;;  %p655_p8 = pnand %p654_p7, %p648_p4 }
  0x53   :  { %v403_v32 = vmax.f32 %v339_v20, 0.0  ;;  %v404_v39 = vmax.f32 %v340_v26, 0.0  ;;  %v217_v41 = vadd.f32 %v779_v2, %v146_v29  ;;  %v218_v42 = vadd.f32 %v779_v2, %v147_v30  ;;  %v80_v44 = vld [vmem:[#allocation2 + $0x58] sm:$0xff]  ;;  %v81_v49 = vld [vmem:[#allocation2 + $0x60] sm:$0xff]  ;;  %v82_v55 = vld [vmem:[#allocation2 + $0x68] sm:$0xff] }
  0x54   :  { %v405_v45 = vmax.f32 %v341_v33, 0.0  ;;  %v406_v46 = vmax.f32 %v342_v34, 0.0  ;;  %v344_v47 = vadd.f32 %v280_v28, %v216_v35  ;;  %v148_v48 = vmul.f32 %v777_v1, %v77_v31  ;;  %v83_v61 = vld [vmem:[#allocation2 + $0x70] sm:$0xff]  ;;  %v84_v62 = vld [vmem:[#allocation2 + $0x78] sm:$0xff]  ;;  %v287_v10 = vld [vmem:[#allocation8 + $0x60] sm:$0xff] }
  0x55   :  { %467 = vst [vmem:[#allocation10] sm:$0xff] %v403_v32  ;;  %468 = vst [vmem:[#allocation10 + $0x8] sm:$0xff] %v404_v39  ;;  %v407_v50 = vmax.f32 %v343_v40, 0.0  ;;  %v345_v51 = vadd.f32 %v281_v36, %v217_v41  ;;  %v346_v52 = vadd.f32 %v282_v37, %v218_v42  ;;  %v149_v54 = vmul.f32 %v777_v1, %v78_v38  ;;  %v285_v4 = vld [vmem:[#allocation8 + $0x50] sm:$0xff]  ;;  %v286_v5 = vld [vmem:[#allocation8 + $0x58] sm:$0xff] }
  0x56   :  { %469 = vst [vmem:[#allocation10 + $0x10] sm:$0xff] %v405_v45  ;;  %470 = vst [vmem:[#allocation10 + $0x18] sm:$0xff] %v406_v46  ;;  %v408_v56 = vmax.f32 %v344_v47, 0.0  ;;  %v219_v57 = vadd.f32 %v779_v2, %v148_v48  ;;  %v150_v59 = vmul.f32 %v777_v1, %v79_v43  ;;  %v151_v60 = vmul.f32 %v777_v1, %v80_v44  ;;  %v288_v14 = vld [vmem:[#allocation8 + $0x68] sm:$0xff]  ;;  %v85_v17 = vld [vmem:[#allocation2 + $0x80] sm:$0xff] }
  0x57   :  { %471 = vst [vmem:[#allocation10 + $0x20] sm:$0xff] %v407_v50  ;;  %v409_v63 = vmax.f32 %v345_v51, 0.0  ;;  %v410_v0 = vmax.f32 %v346_v52, 0.0  ;;  %v220_v3 = vadd.f32 %v779_v2, %v149_v54  ;;  %v152_v6 = vmul.f32 %v777_v1, %v81_v49  ;;  %v289_v22 = vld [vmem:[#allocation8 + $0x70] sm:$0xff]  ;;  %v290_v23 = vld [vmem:[#allocation8 + $0x78] sm:$0xff]  ;;  %v86_v24 = vld [vmem:[#allocation2 + $0x88] sm:$0xff] }
  0x58   :  { %472 = vst [vmem:[#allocation10 + $0x28] sm:$0xff] %v408_v56  ;;  %v347_v7 = vadd.f32 %v283_v53, %v219_v57  ;;  %v221_v8 = vadd.f32 %v779_v2, %v150_v59  ;;  %v222_v9 = vadd.f32 %v779_v2, %v151_v60  ;;  %v153_v11 = vmul.f32 %v777_v1, %v82_v55  ;;  %v87_v29 = vld [vmem:[#allocation2 + $0x90] sm:$0xff]  ;;  %v88_v30 = vld [vmem:[#allocation2 + $0x98] sm:$0xff]  ;;  %v89_v35 = vld [vmem:[#allocation2 + $0xa0] sm:$0xff] }
  0x59   :  { %473 = vst [vmem:[#allocation10 + $0x30] sm:$0xff] %v409_v63  ;;  %474 = vst [vmem:[#allocation10 + $0x38] sm:$0xff] %v410_v0  ;;  %v348_v12 = vadd.f32 %v284_v58, %v220_v3  ;;  %v223_v13 = vadd.f32 %v779_v2, %v152_v6  ;;  %v154_v15 = vmul.f32 %v777_v1, %v83_v61  ;;  %v291_v39 = vld [vmem:[#allocation8 + $0x80] sm:$0xff]  ;;  %v292_v44 = vld [vmem:[#allocation8 + $0x88] sm:$0xff] }
  0x5a   :  { %v155_v16 = vmul.f32 %v777_v1, %v84_v62  ;;  %v411_v18 = vmax.f32 %v347_v7, 0.0  ;;  %v349_v19 = vadd.f32 %v285_v4, %v221_v8  ;;  %v350_v20 = vadd.f32 %v286_v5, %v222_v9  ;;  %v90_v41 = vld [vmem:[#allocation2 + $0xa8] sm:$0xff]  ;;  %v91_v47 = vld [vmem:[#allocation2 + $0xb0] sm:$0xff]  ;;  %v92_v48 = vld [vmem:[#allocation2 + $0xb8] sm:$0xff] }
  0x5b   :  { %v224_v21 = vadd.f32 %v779_v2, %v153_v11  ;;  %v412_v25 = vmax.f32 %v348_v12, 0.0  ;;  %v351_v26 = vadd.f32 %v287_v10, %v223_v13  ;;  %v225_v27 = vadd.f32 %v779_v2, %v154_v15  ;;  %v293_v52 = vld [vmem:[#allocation8 + $0x90] sm:$0xff]  ;;  %v294_v53 = vld [vmem:[#allocation8 + $0x98] sm:$0xff]  ;;  %v295_v58 = vld [vmem:[#allocation8 + $0xa0] sm:$0xff] }
  0x5c   :  { %v226_v28 = vadd.f32 %v779_v2, %v155_v16  ;;  %475 = vst [vmem:[#allocation10 + $0x40] sm:$0xff] %v411_v18  ;;  %v413_v31 = vmax.f32 %v349_v19, 0.0  ;;  %v414_v32 = vmax.f32 %v350_v20, 0.0  ;;  %v156_v34 = vmul.f32 %v777_v1, %v85_v17  ;;  %v296_v62 = vld [vmem:[#allocation8 + $0xa8] sm:$0xff]  ;;  %v93_v3 = vld [vmem:[#allocation2 + $0xc0] sm:$0xff]  ;;  %v297_v8 = vld [vmem:[#allocation8 + $0xb0] sm:$0xff] }
  0x5d   :  { %v352_v33 = vadd.f32 %v288_v14, %v224_v21  ;;  %476 = vst [vmem:[#allocation10 + $0x48] sm:$0xff] %v412_v25  ;;  %v415_v36 = vmax.f32 %v351_v26, 0.0  ;;  %v353_v37 = vadd.f32 %v289_v22, %v225_v27  ;;  %v157_v40 = vmul.f32 %v777_v1, %v86_v24  ;;  %v298_v9 = vld [vmem:[#allocation8 + $0xb8] sm:$0xff]  ;;  %v94_v10 = vld [vmem:[#allocation2 + $0xc8] sm:$0xff]  ;;  %v95_v15 = vld [vmem:[#allocation2 + $0xd0] sm:$0xff] }
  0x5e   :  { %v354_v38 = vadd.f32 %v290_v23, %v226_v28  ;;  %477 = vst [vmem:[#allocation10 + $0x50] sm:$0xff] %v413_v31  ;;  %478 = vst [vmem:[#allocation10 + $0x58] sm:$0xff] %v414_v32  ;;  %v227_v43 = vadd.f32 %v779_v2, %v156_v34  ;;  %v158_v45 = vmul.f32 %v777_v1, %v87_v29  ;;  %v96_v16 = vld [vmem:[#allocation2 + $0xd8] sm:$0xff]  ;;  %v97_v21 = vld [vmem:[#allocation2 + $0xe0] sm:$0xff] }
  0x5f   :  { %v416_v42 = vmax.f32 %v352_v33, 0.0  ;;  %v159_v46 = vmul.f32 %v777_v1, %v88_v30  ;;  %479 = vst [vmem:[#allocation10 + $0x60] sm:$0xff] %v415_v36  ;;  %v417_v49 = vmax.f32 %v353_v37, 0.0  ;;  %v228_v51 = vadd.f32 %v779_v2, %v157_v40  ;;  %v299_v25 = vld [vmem:[#allocation8 + $0xc0] sm:$0xff]  ;;  %v300_v30 = vld [vmem:[#allocation8 + $0xc8] sm:$0xff]  ;;  %v100_v34 = vld [vmem:[#allocation2 + $0xf8] sm:$0xff] }
  0x60   :  { %v418_v50 = vmax.f32 %v354_v38, 0.0  ;;  %v160_v54 = vmul.f32 %v777_v1, %v89_v35  ;;  %v355_v55 = vadd.f32 %v291_v39, %v227_v43  ;;  %v229_v56 = vadd.f32 %v779_v2, %v158_v45  ;;  %v98_v27 = vld [vmem:[#allocation2 + $0xe8] sm:$0xff]  ;;  %v99_v33 = vld [vmem:[#allocation2 + $0xf0] sm:$0xff]  ;;  %v302_v39 = vld [vmem:[#allocation8 + $0xd8] sm:$0xff] }
  0x61   :  { %480 = vst [vmem:[#allocation10 + $0x68] sm:$0xff] %v416_v42  ;;  %v230_v57 = vadd.f32 %v779_v2, %v159_v46  ;;  %v161_v59 = vmul.f32 %v777_v1, %v90_v41  ;;  %481 = vst [vmem:[#allocation10 + $0x70] sm:$0xff] %v417_v49  ;;  %v356_v60 = vadd.f32 %v292_v44, %v228_v51  ;;  %v301_v38 = vld [vmem:[#allocation8 + $0xd0] sm:$0xff]  ;;  %v303_v44 = vld [vmem:[#allocation8 + $0xe0] sm:$0xff] }
  0x62   :  { %482 = vst [vmem:[#allocation10 + $0x78] sm:$0xff] %v418_v50  ;;  %v231_v61 = vadd.f32 %v779_v2, %v160_v54  ;;  %v162_v63 = vmul.f32 %v777_v1, %v91_v47  ;;  %v163_v0 = vmul.f32 %v777_v1, %v92_v48  ;;  %v419_v4 = vmax.f32 %v355_v55, 0.0  ;;  %v304_v48 = vld [vmem:[#allocation8 + $0xe8] sm:$0xff]  ;;  %v101_v51 = vld [vmem:[#allocation2 + $0x100] sm:$0xff] }
  0x63   :  { %v357_v5 = vadd.f32 %v293_v52, %v229_v56  ;;  %v358_v6 = vadd.f32 %v294_v53, %v230_v57  ;;  %v232_v7 = vadd.f32 %v779_v2, %v161_v59  ;;  %v420_v11 = vmax.f32 %v356_v60, 0.0  ;;  %v305_v56 = vld [vmem:[#allocation8 + $0xf0] sm:$0xff]  ;;  %v306_v57 = vld [vmem:[#allocation8 + $0xf8] sm:$0xff] }
  0x64   :  { %v359_v12 = vadd.f32 %v295_v58, %v231_v61  ;;  %v233_v13 = vadd.f32 %v779_v2, %v162_v63  ;;  %v234_v14 = vadd.f32 %v779_v2, %v163_v0  ;;  %483 = vst [vmem:[#allocation10 + $0x80] sm:$0xff] %v419_v4  ;;  %v164_v20 = vmul.f32 %v777_v1, %v93_v3  ;;  %v102_v58 = vld [vmem:[#allocation2 + $0x108] sm:$0xff]  ;;  %v103_v63 = vld [vmem:[#allocation2 + $0x110] sm:$0xff]  ;;  %v104_v0 = vld [vmem:[#allocation2 + $0x118] sm:$0xff] }
  0x65   :  { %v421_v17 = vmax.f32 %v357_v5, 0.0  ;;  %v422_v18 = vmax.f32 %v358_v6, 0.0  ;;  %v360_v19 = vadd.f32 %v296_v62, %v232_v7  ;;  %484 = vst [vmem:[#allocation10 + $0x88] sm:$0xff] %v420_v11  ;;  %v165_v26 = vmul.f32 %v777_v1, %v94_v10  ;;  %v105_v7 = vld [vmem:[#allocation2 + $0x120] sm:$0xff] }
  0x66   :  { %v423_v22 = vmax.f32 %v359_v12, 0.0  ;;  %v361_v23 = vadd.f32 %v297_v8, %v233_v13  ;;  %v362_v24 = vadd.f32 %v298_v9, %v234_v14  ;;  %v235_v29 = vadd.f32 %v779_v2, %v164_v20  ;;  %v307_v11 = vld [vmem:[#allocation8 + $0x100] sm:$0xff]  ;;  %v108_v20 = vld [vmem:[#allocation2 + $0x138] sm:$0xff] }
  0x67   :  { %485 = vst [vmem:[#allocation10 + $0x90] sm:$0xff] %v421_v17  ;;  %486 = vst [vmem:[#allocation10 + $0x98] sm:$0xff] %v422_v18  ;;  %v424_v28 = vmax.f32 %v360_v19, 0.0  ;;  %v166_v31 = vmul.f32 %v777_v1, %v95_v15  ;;  %v167_v32 = vmul.f32 %v777_v1, %v96_v16  ;;  %v236_v37 = vadd.f32 %v779_v2, %v165_v26  ;;  %v106_v13 = vld [vmem:[#allocation2 + $0x128] sm:$0xff]  ;;  %v107_v19 = vld [vmem:[#allocation2 + $0x130] sm:$0xff] }
  0x68   :  { %487 = vst [vmem:[#allocation10 + $0xa0] sm:$0xff] %v423_v22  ;;  %v425_v35 = vmax.f32 %v361_v23, 0.0  ;;  %v426_v36 = vmax.f32 %v362_v24, 0.0  ;;  %v168_v40 = vmul.f32 %v777_v1, %v97_v21  ;;  %v363_v41 = vadd.f32 %v299_v25, %v235_v29  ;;  %v308_v16 = vld [vmem:[#allocation8 + $0x108] sm:$0xff]  ;;  %v309_v24 = vld [vmem:[#allocation8 + $0x110] sm:$0xff]  ;;  %v310_v25 = vld [vmem:[#allocation8 + $0x118] sm:$0xff] }
  0x69   :  { %488 = vst [vmem:[#allocation10 + $0xa8] sm:$0xff] %v424_v28  ;;  %v237_v42 = vadd.f32 %v779_v2, %v166_v31  ;;  %v238_v43 = vadd.f32 %v779_v2, %v167_v32  ;;  %v169_v45 = vmul.f32 %v777_v1, %v98_v27  ;;  %v364_v46 = vadd.f32 %v300_v30, %v236_v37  ;;  %v311_v30 = vld [vmem:[#allocation8 + $0x120] sm:$0xff] }
  0x6a   :  { %489 = vst [vmem:[#allocation10 + $0xb0] sm:$0xff] %v425_v35  ;;  %490 = vst [vmem:[#allocation10 + $0xb8] sm:$0xff] %v426_v36  ;;  %v239_v47 = vadd.f32 %v779_v2, %v168_v40  ;;  %v170_v49 = vmul.f32 %v777_v1, %v99_v33  ;;  %v171_v50 = vmul.f32 %v777_v1, %v100_v34  ;;  %v427_v52 = vmax.f32 %v363_v41, 0.0  ;;  %v312_v34 = vld [vmem:[#allocation8 + $0x128] sm:$0xff]  ;;  %v109_v37 = vld [vmem:[#allocation2 + $0x140] sm:$0xff] }
  0x6b   :  { %v365_v53 = vadd.f32 %v301_v38, %v237_v42  ;;  %v366_v54 = vadd.f32 %v302_v39, %v238_v43  ;;  %v240_v55 = vadd.f32 %v779_v2, %v169_v45  ;;  %v428_v59 = vmax.f32 %v364_v46, 0.0  ;;  %v313_v42 = vld [vmem:[#allocation8 + $0x130] sm:$0xff]  ;;  %v314_v43 = vld [vmem:[#allocation8 + $0x138] sm:$0xff] }
  0x6c   :  { %v367_v60 = vadd.f32 %v303_v44, %v239_v47  ;;  %v241_v61 = vadd.f32 %v779_v2, %v170_v49  ;;  %v242_v62 = vadd.f32 %v779_v2, %v171_v50  ;;  %491 = vst [vmem:[#allocation10 + $0xc0] sm:$0xff] %v427_v52  ;;  %v172_v6 = vmul.f32 %v777_v1, %v101_v51  ;;  %v110_v44 = vld [vmem:[#allocation2 + $0x148] sm:$0xff]  ;;  %v111_v49 = vld [vmem:[#allocation2 + $0x150] sm:$0xff]  ;;  %v112_v50 = vld [vmem:[#allocation2 + $0x158] sm:$0xff] }
  0x6d   :  { %v429_v3 = vmax.f32 %v365_v53, 0.0  ;;  %v430_v4 = vmax.f32 %v366_v54, 0.0  ;;  %v368_v5 = vadd.f32 %v304_v48, %v240_v55  ;;  %492 = vst [vmem:[#allocation10 + $0xc8] sm:$0xff] %v428_v59  ;;  %v173_v12 = vmul.f32 %v777_v1, %v102_v58  ;;  %v113_v55 = vld [vmem:[#allocation2 + $0x160] sm:$0xff] }
  0x6e   :  { %v431_v8 = vmax.f32 %v367_v60, 0.0  ;;  %v369_v9 = vadd.f32 %v305_v56, %v241_v61  ;;  %v370_v10 = vadd.f32 %v306_v57, %v242_v62  ;;  %v243_v15 = vadd.f32 %v779_v2, %v172_v6  ;;  %v315_v59 = vld [vmem:[#allocation8 + $0x140] sm:$0xff]  ;;  %v116_v6 = vld [vmem:[#allocation2 + $0x178] sm:$0xff] }
  0x6f   :  { %493 = vst [vmem:[#allocation10 + $0xd0] sm:$0xff] %v429_v3  ;;  %494 = vst [vmem:[#allocation10 + $0xd8] sm:$0xff] %v430_v4  ;;  %v432_v14 = vmax.f32 %v368_v5, 0.0  ;;  %v174_v17 = vmul.f32 %v777_v1, %v103_v63  ;;  %v175_v18 = vmul.f32 %v777_v1, %v104_v0  ;;  %v244_v23 = vadd.f32 %v779_v2, %v173_v12  ;;  %v114_v61 = vld [vmem:[#allocation2 + $0x168] sm:$0xff]  ;;  %v115_v5 = vld [vmem:[#allocation2 + $0x170] sm:$0xff] }
  0x70   :  { %495 = vst [vmem:[#allocation10 + $0xe0] sm:$0xff] %v431_v8  ;;  %v433_v21 = vmax.f32 %v369_v9, 0.0  ;;  %v434_v22 = vmax.f32 %v370_v10, 0.0  ;;  %v176_v26 = vmul.f32 %v777_v1, %v105_v7  ;;  %v371_v27 = vadd.f32 %v307_v11, %v243_v15  ;;  %v316_v0 = vld [vmem:[#allocation8 + $0x148] sm:$0xff]  ;;  %v317_v10 = vld [vmem:[#allocation8 + $0x150] sm:$0xff]  ;;  %v318_v11 = vld [vmem:[#allocation8 + $0x158] sm:$0xff] }
  0x71   :  { %496 = vst [vmem:[#allocation10 + $0xe8] sm:$0xff] %v432_v14  ;;  %v245_v28 = vadd.f32 %v779_v2, %v174_v17  ;;  %v246_v29 = vadd.f32 %v779_v2, %v175_v18  ;;  %v177_v31 = vmul.f32 %v777_v1, %v106_v13  ;;  %v372_v32 = vadd.f32 %v308_v16, %v244_v23  ;;  %v319_v16 = vld [vmem:[#allocation8 + $0x160] sm:$0xff] }
  0x72   :  { %497 = vst [vmem:[#allocation10 + $0xf0] sm:$0xff] %v433_v21  ;;  %498 = vst [vmem:[#allocation10 + $0xf8] sm:$0xff] %v434_v22  ;;  %v247_v33 = vadd.f32 %v779_v2, %v176_v26  ;;  %v178_v35 = vmul.f32 %v777_v1, %v107_v19  ;;  %v179_v36 = vmul.f32 %v777_v1, %v108_v20  ;;  %v435_v38 = vmax.f32 %v371_v27, 0.0  ;;  %v320_v20 = vld [vmem:[#allocation8 + $0x168] sm:$0xff]  ;;  %v117_v23 = vld [vmem:[#allocation2 + $0x180] sm:$0xff] }
  0x73   :  { %v373_v39 = vadd.f32 %v309_v24, %v245_v28  ;;  %v374_v40 = vadd.f32 %v310_v25, %v246_v29  ;;  %v248_v41 = vadd.f32 %v779_v2, %v177_v31  ;;  %v436_v45 = vmax.f32 %v372_v32, 0.0  ;;  %v321_v28 = vld [vmem:[#allocation8 + $0x170] sm:$0xff]  ;;  %v322_v29 = vld [vmem:[#allocation8 + $0x178] sm:$0xff] }
  0x74   :  { %v375_v46 = vadd.f32 %v311_v30, %v247_v33  ;;  %v249_v47 = vadd.f32 %v779_v2, %v178_v35  ;;  %v250_v48 = vadd.f32 %v779_v2, %v179_v36  ;;  %499 = vst [vmem:[#allocation10 + $0x100] sm:$0xff] %v435_v38  ;;  %v180_v54 = vmul.f32 %v777_v1, %v109_v37  ;;  %v118_v30 = vld [vmem:[#allocation2 + $0x188] sm:$0xff]  ;;  %v119_v35 = vld [vmem:[#allocation2 + $0x190] sm:$0xff]  ;;  %v120_v36 = vld [vmem:[#allocation2 + $0x198] sm:$0xff] }
  0x75   :  { %v437_v51 = vmax.f32 %v373_v39, 0.0  ;;  %v438_v52 = vmax.f32 %v374_v40, 0.0  ;;  %v376_v53 = vadd.f32 %v312_v34, %v248_v41  ;;  %500 = vst [vmem:[#allocation10 + $0x108] sm:$0xff] %v436_v45  ;;  %v181_v60 = vmul.f32 %v777_v1, %v110_v44  ;;  %v121_v41 = vld [vmem:[#allocation2 + $0x1a0] sm:$0xff] }
  0x76   :  { %v439_v56 = vmax.f32 %v375_v46, 0.0  ;;  %v377_v57 = vadd.f32 %v313_v42, %v249_v47  ;;  %v378_v58 = vadd.f32 %v314_v43, %v250_v48  ;;  %v251_v63 = vadd.f32 %v779_v2, %v180_v54  ;;  %v323_v45 = vld [vmem:[#allocation8 + $0x180] sm:$0xff]  ;;  %v124_v54 = vld [vmem:[#allocation2 + $0x1b8] sm:$0xff] }
  0x77   :  { %501 = vst [vmem:[#allocation10 + $0x110] sm:$0xff] %v437_v51  ;;  %502 = vst [vmem:[#allocation10 + $0x118] sm:$0xff] %v438_v52  ;;  %v440_v62 = vmax.f32 %v376_v53, 0.0  ;;  %v182_v3 = vmul.f32 %v777_v1, %v111_v49  ;;  %v183_v4 = vmul.f32 %v777_v1, %v112_v50  ;;  %v252_v9 = vadd.f32 %v779_v2, %v181_v60  ;;  %v122_v47 = vld [vmem:[#allocation2 + $0x1a8] sm:$0xff]  ;;  %v123_v53 = vld [vmem:[#allocation2 + $0x1b0] sm:$0xff] }
  0x78   :  { %503 = vst [vmem:[#allocation10 + $0x120] sm:$0xff] %v439_v56  ;;  %v441_v7 = vmax.f32 %v377_v57, 0.0  ;;  %v442_v8 = vmax.f32 %v378_v58, 0.0  ;;  %v184_v12 = vmul.f32 %v777_v1, %v113_v55  ;;  %v379_v13 = vadd.f32 %v315_v59, %v251_v63  ;;  %v324_v50 = vld [vmem:[#allocation8 + $0x188] sm:$0xff]  ;;  %v325_v58 = vld [vmem:[#allocation8 + $0x190] sm:$0xff]  ;;  %v326_v59 = vld [vmem:[#allocation8 + $0x198] sm:$0xff] }
  0x79   :  { %504 = vst [vmem:[#allocation10 + $0x128] sm:$0xff] %v440_v62  ;;  %v253_v14 = vadd.f32 %v779_v2, %v182_v3  ;;  %v254_v15 = vadd.f32 %v779_v2, %v183_v4  ;;  %v185_v17 = vmul.f32 %v777_v1, %v114_v61  ;;  %v380_v18 = vadd.f32 %v316_v0, %v252_v9  ;;  %v327_v0 = vld [vmem:[#allocation8 + $0x1a0] sm:$0xff] }
  0x7a   :  { %505 = vst [vmem:[#allocation10 + $0x130] sm:$0xff] %v441_v7  ;;  %506 = vst [vmem:[#allocation10 + $0x138] sm:$0xff] %v442_v8  ;;  %v255_v19 = vadd.f32 %v779_v2, %v184_v12  ;;  %v186_v21 = vmul.f32 %v777_v1, %v115_v5  ;;  %v187_v22 = vmul.f32 %v777_v1, %v116_v6  ;;  %v443_v24 = vmax.f32 %v379_v13, 0.0  ;;  %v328_v6 = vld [vmem:[#allocation8 + $0x1a8] sm:$0xff]  ;;  %v125_v9 = vld [vmem:[#allocation2 + $0x1c0] sm:$0xff] }
  0x7b   :  { %v381_v25 = vadd.f32 %v317_v10, %v253_v14  ;;  %v382_v26 = vadd.f32 %v318_v11, %v254_v15  ;;  %v256_v27 = vadd.f32 %v779_v2, %v185_v17  ;;  %v444_v31 = vmax.f32 %v380_v18, 0.0  ;;  %v329_v14 = vld [vmem:[#allocation8 + $0x1b0] sm:$0xff]  ;;  %v330_v15 = vld [vmem:[#allocation8 + $0x1b8] sm:$0xff] }
  0x7c   :  { %v383_v32 = vadd.f32 %v319_v16, %v255_v19  ;;  %v257_v33 = vadd.f32 %v779_v2, %v186_v21  ;;  %v258_v34 = vadd.f32 %v779_v2, %v187_v22  ;;  %507 = vst [vmem:[#allocation10 + $0x140] sm:$0xff] %v443_v24  ;;  %v188_v40 = vmul.f32 %v777_v1, %v117_v23  ;;  %v126_v16 = vld [vmem:[#allocation2 + $0x1c8] sm:$0xff]  ;;  %v127_v21 = vld [vmem:[#allocation2 + $0x1d0] sm:$0xff]  ;;  %v128_v22 = vld [vmem:[#allocation2 + $0x1d8] sm:$0xff] }
  0x7d   :  { %v445_v37 = vmax.f32 %v381_v25, 0.0  ;;  %v446_v38 = vmax.f32 %v382_v26, 0.0  ;;  %v384_v39 = vadd.f32 %v320_v20, %v256_v27  ;;  %508 = vst [vmem:[#allocation10 + $0x148] sm:$0xff] %v444_v31  ;;  %v189_v46 = vmul.f32 %v777_v1, %v118_v30  ;;  %v129_v27 = vld [vmem:[#allocation2 + $0x1e0] sm:$0xff] }
  0x7e   :  { %v447_v42 = vmax.f32 %v383_v32, 0.0  ;;  %v385_v43 = vadd.f32 %v321_v28, %v257_v33  ;;  %v386_v44 = vadd.f32 %v322_v29, %v258_v34  ;;  %v259_v49 = vadd.f32 %v779_v2, %v188_v40  ;;  %v331_v31 = vld [vmem:[#allocation8 + $0x1c0] sm:$0xff]  ;;  %v132_v40 = vld [vmem:[#allocation2 + $0x1f8] sm:$0xff] }
  0x7f   :  { %509 = vst [vmem:[#allocation10 + $0x150] sm:$0xff] %v445_v37  ;;  %510 = vst [vmem:[#allocation10 + $0x158] sm:$0xff] %v446_v38  ;;  %v448_v48 = vmax.f32 %v384_v39, 0.0  ;;  %v190_v51 = vmul.f32 %v777_v1, %v119_v35  ;;  %v191_v52 = vmul.f32 %v777_v1, %v120_v36  ;;  %v260_v57 = vadd.f32 %v779_v2, %v189_v46  ;;  %v130_v33 = vld [vmem:[#allocation2 + $0x1e8] sm:$0xff]  ;;  %v131_v39 = vld [vmem:[#allocation2 + $0x1f0] sm:$0xff] }
  0x80   :  { %511 = vst [vmem:[#allocation10 + $0x160] sm:$0xff] %v447_v42  ;;  %v449_v55 = vmax.f32 %v385_v43, 0.0  ;;  %v450_v56 = vmax.f32 %v386_v44, 0.0  ;;  %v192_v60 = vmul.f32 %v777_v1, %v121_v41  ;;  %v387_v61 = vadd.f32 %v323_v45, %v259_v49  ;;  %v332_v36 = vld [vmem:[#allocation8 + $0x1c8] sm:$0xff]  ;;  %v333_v44 = vld [vmem:[#allocation8 + $0x1d0] sm:$0xff]  ;;  %v334_v45 = vld [vmem:[#allocation8 + $0x1d8] sm:$0xff] }
  0x81   :  { %512 = vst [vmem:[#allocation10 + $0x168] sm:$0xff] %v448_v48  ;;  %v261_v62 = vadd.f32 %v779_v2, %v190_v51  ;;  %v262_v63 = vadd.f32 %v779_v2, %v191_v52  ;;  %v193_v3 = vmul.f32 %v777_v1, %v122_v47  ;;  %v388_v4 = vadd.f32 %v324_v50, %v260_v57  ;;  %v335_v50 = vld [vmem:[#allocation8 + $0x1e0] sm:$0xff] }
  0x82   :  { %513 = vst [vmem:[#allocation10 + $0x170] sm:$0xff] %v449_v55  ;;  %514 = vst [vmem:[#allocation10 + $0x178] sm:$0xff] %v450_v56  ;;  %v263_v5 = vadd.f32 %v779_v2, %v192_v60  ;;  %v194_v7 = vmul.f32 %v777_v1, %v123_v53  ;;  %v195_v8 = vmul.f32 %v777_v1, %v124_v54  ;;  %v451_v10 = vmax.f32 %v387_v61, 0.0  ;;  %v336_v54 = vld [vmem:[#allocation8 + $0x1e8] sm:$0xff]  ;;  %v337_v61 = vld [vmem:[#allocation8 + $0x1f0] sm:$0xff] }
  0x83   :  { %v389_v11 = vadd.f32 %v325_v58, %v261_v62  ;;  %v390_v12 = vadd.f32 %v326_v59, %v262_v63  ;;  %v264_v13 = vadd.f32 %v779_v2, %v193_v3  ;;  %v452_v17 = vmax.f32 %v388_v4, 0.0  ;;  %v338_v62 = vld [vmem:[#allocation8 + $0x1f8] sm:$0xff] }
  0x84   :  { %v391_v18 = vadd.f32 %v327_v0, %v263_v5  ;;  %v265_v19 = vadd.f32 %v779_v2, %v194_v7  ;;  %v266_v20 = vadd.f32 %v779_v2, %v195_v8  ;;  %515 = vst [vmem:[#allocation10 + $0x180] sm:$0xff] %v451_v10  ;;  %v196_v26 = vmul.f32 %v777_v1, %v125_v9 }
  0x85   :  { %v453_v23 = vmax.f32 %v389_v11, 0.0  ;;  %v454_v24 = vmax.f32 %v390_v12, 0.0  ;;  %v392_v25 = vadd.f32 %v328_v6, %v264_v13  ;;  %516 = vst [vmem:[#allocation10 + $0x188] sm:$0xff] %v452_v17  ;;  %v197_v32 = vmul.f32 %v777_v1, %v126_v16 }
  0x86   :  { %v455_v28 = vmax.f32 %v391_v18, 0.0  ;;  %v393_v29 = vadd.f32 %v329_v14, %v265_v19  ;;  %v394_v30 = vadd.f32 %v330_v15, %v266_v20  ;;  %v267_v35 = vadd.f32 %v779_v2, %v196_v26 }
  0x87   :  { %517 = vst [vmem:[#allocation10 + $0x190] sm:$0xff] %v453_v23  ;;  %518 = vst [vmem:[#allocation10 + $0x198] sm:$0xff] %v454_v24  ;;  %v456_v34 = vmax.f32 %v392_v25, 0.0  ;;  %v198_v37 = vmul.f32 %v777_v1, %v127_v21  ;;  %v199_v38 = vmul.f32 %v777_v1, %v128_v22  ;;  %v268_v43 = vadd.f32 %v779_v2, %v197_v32 }
  0x88   :  { %519 = vst [vmem:[#allocation10 + $0x1a0] sm:$0xff] %v455_v28  ;;  %v457_v41 = vmax.f32 %v393_v29, 0.0  ;;  %v458_v42 = vmax.f32 %v394_v30, 0.0  ;;  %v200_v46 = vmul.f32 %v777_v1, %v129_v27  ;;  %v395_v47 = vadd.f32 %v331_v31, %v267_v35 }
  0x89   :  { %520 = vst [vmem:[#allocation10 + $0x1a8] sm:$0xff] %v456_v34  ;;  %v269_v48 = vadd.f32 %v779_v2, %v198_v37  ;;  %v270_v49 = vadd.f32 %v779_v2, %v199_v38  ;;  %v201_v51 = vmul.f32 %v777_v1, %v130_v33  ;;  %v396_v52 = vadd.f32 %v332_v36, %v268_v43 }
  0x8a   :  { %521 = vst [vmem:[#allocation10 + $0x1b0] sm:$0xff] %v457_v41  ;;  %522 = vst [vmem:[#allocation10 + $0x1b8] sm:$0xff] %v458_v42  ;;  %v271_v53 = vadd.f32 %v779_v2, %v200_v46  ;;  %v202_v55 = vmul.f32 %v777_v1, %v131_v39  ;;  %v203_v56 = vmul.f32 %v777_v1, %v132_v40  ;;  %v459_v57 = vmax.f32 %v395_v47, 0.0 }
  0x8b   :  { %v397_v58 = vadd.f32 %v333_v44, %v269_v48  ;;  %v398_v59 = vadd.f32 %v334_v45, %v270_v49  ;;  %v272_v60 = vadd.f32 %v779_v2, %v201_v51  ;;  %v460_v63 = vmax.f32 %v396_v52, 0.0 }
  0x8c   :  { %v399_v0 = vadd.f32 %v335_v50, %v271_v53  ;;  %v273_v3 = vadd.f32 %v779_v2, %v202_v55  ;;  %v274_v4 = vadd.f32 %v779_v2, %v203_v56  ;;  %523 = vst [vmem:[#allocation10 + $0x1c0] sm:$0xff] %v459_v57 }
  0x8d   :  { %v461_v5 = vmax.f32 %v397_v58, 0.0  ;;  %v462_v6 = vmax.f32 %v398_v59, 0.0  ;;  %v400_v7 = vadd.f32 %v336_v54, %v272_v60  ;;  %524 = vst [vmem:[#allocation10 + $0x1c8] sm:$0xff] %v460_v63 }
  0x8e   :  { %v463_v1 = vmax.f32 %v399_v0, 0.0  ;;  %v401_v8 = vadd.f32 %v337_v61, %v273_v3  ;;  %v402_v9 = vadd.f32 %v338_v62, %v274_v4 }
  0x8f   :  { %525 = vst [vmem:[#allocation10 + $0x1d0] sm:$0xff] %v461_v5  ;;  %526 = vst [vmem:[#allocation10 + $0x1d8] sm:$0xff] %v462_v6  ;;  %v464_v10 = vmax.f32 %v400_v7, 0.0 }
  0x90   :  { %527 = vst [vmem:[#allocation10 + $0x1e0] sm:$0xff] %v463_v1  ;;  %v465_v11 = vmax.f32 %v401_v8, 0.0  ;;  %v466_v12 = vmax.f32 %v402_v9, 0.0 }
  0x91   :  { %528 = vst [vmem:[#allocation10 + $0x1e8] sm:$0xff] %v464_v10 }
  0x92   :  { %529 = vst [vmem:[#allocation10 + $0x1f0] sm:$0xff] %v465_v11  ;;  %530 = vst [vmem:[#allocation10 + $0x1f8] sm:$0xff] %v466_v12 }
  0x93   :  { %658 = shalt.err (!%p655_p8)
}
  0x94   :  { %s659_s17 = scalar_lea.hbm %s928_s4, 8192 }
  0x95   :  { %p660_p9 = scmp.ne.s32.totalorder %s928_s4, %s659_s17  ;;  %p663_p10 = scmp.lt.u32.totalorder %s659_s17, %s928_s4 }
  0x97   :  { %p665_p11 = pnand %p663_p10, %p660_p9 }
  0x99   :  { %668 = shalt.err (!%p665_p11)
}
  0x9a   :  { %542 = dma.vmem_to_hbm [thread:$0]  %s537_s13, 8192, %s928_s4, [#allocation4], %s679_s1, %s679_s1, %s680_s12  }
  0x9b   :  { %675 = dma.done.wait [#allocation4], 8192  }
  0x9c   :  { %676 = vsyncadd [#allocation4], 4294959104 }
  0x9d   :  { %546 = vsyncpa [#allocation3], 1 }
  0x9e   :  { %547 = vsyncpa [#allocation6], 1 }
  0x9f   :  { %548 = vsyncpa [#allocation9], 1 }
  0xa0   :  { %549 = vsyncpa [#allocation4], 1 }

</bundles_post_ra>
